<compile_context>
chip_gen: v6e
topology: v6e:2x2x1
jax: 0.10.0
libtpu: 0.0.40
codegen_flags: <defaults>
</compile_context>

<pallas_src>
import math

import jax
import jax.numpy as jnp
from jax import lax
from jax.experimental import pallas as pl
from jax.experimental.pallas import tpu as pltpu

# ---------------- model hyper-parameters (small, synthetic) ----------------
B = 2       # batch
T = 8       # target sequence length
S = 8       # source (memory) sequence length
D = 32      # d_model (layer.size)
H = 4       # attention heads
DK = D // H
DFF = 64    # feed-forward hidden dim
L = 2       # n_layers
EPS = 1e-6

# ---- packed-parameter layout -------------------------------------------------
# Weight slab (bf16): (L, D, WCOLS).  Every logical weight starts on a 128-lane
# boundary so the MXU RHS slices never need a lane rotation.
C_SQKV = 0 * 128   # self-attn fused [Wq/sqrt(DK) | Wk | Wv]      (D, 3D)
C_SOUT = 1 * 128   # self-attn Wout                               (D, D)
C_CQ   = 2 * 128   # cross-attn Wq/sqrt(DK)                       (D, D)
C_CKV  = 3 * 128   # cross-attn fused [Wk | Wv]                   (D, 2D)
C_COUT = 4 * 128   # cross-attn Wout                              (D, D)
C_FF1  = 5 * 128   # FFN W1                                       (D, DFF)
C_FF2  = 6 * 128   # FFN W2^T (stored transposed, contracted on DFF)
WCOLS  = 7 * 128   # 896

# Vector slab (f32): (VROWS_PAD, 128); 13 rows per layer + 2 final-norm rows:
#   base+0..2  ln_a for sublayer 0/1/2      (width D)
#   base+3..5  ln_b for sublayer 0/1/2      (width D)
#   base+6     self-attn fused qkv bias     (width 3D, bq pre-scaled)
#   base+7     self-attn out bias           (width D)
#   base+8     cross-attn q bias            (width D, pre-scaled)
#   base+9     cross-attn fused kv bias     (width 2D)
#   base+10    cross-attn out bias          (width D)
#   base+11    FFN b1                       (width DFF)
#   base+12    FFN b2                       (width D)
#   row L*13   final-norm a, row L*13+1 final-norm b
VPL = 13
VWIDTH = 128
VROWS_PAD = ((L * VPL + 2 + 7) // 8) * 8   # 28 -> 32


def _layer_norm(x, a, b):
    # Matches the torch module: unbiased std (Bessel, n-1), divide by (std+eps).
    # sum / sum-of-squares are independent reductions so they can be co-issued.
    n = x.shape[-1]
    s1 = jnp.sum(x, axis=-1, keepdims=True)
    s2 = jnp.sum(x * x, axis=-1, keepdims=True)
    mean = s1 * (1.0 / n)
    var = jnp.maximum(s2 - mean * s1, 0.0) * (1.0 / (n - 1))
    return a * (x - mean) / (jnp.sqrt(var) + EPS) + b


def decoder_kernel(x_ref, mem_ref, sbias_ref, tbias_ref, w_ref, v_ref, out_ref):
    BB, Tq, Dm = x_ref.shape
    Sk = mem_ref.shape[1]

    hidden = x_ref[...].reshape(BB * Tq, Dm)                       # f32 residual
    mem_bf = mem_ref[...].reshape(BB * Sk, Dm).astype(jnp.bfloat16)

    # Head-tiled additive mask biases (host-precomputed 0 / -1e9), built ONCE
    # per program.  Head-batch ordering along axis 0 is (head, batch).
    tgt_bias = jnp.concatenate([tbias_ref[...]] * H, axis=0)       # (H*BB,Tq,Tq)
    src_bias = jnp.concatenate([sbias_ref[...]] * H, axis=0)       # (H*BB,Tq,Sk)

    def split_heads(x2d, col0, t):
        # (BB*t, >=col0+D) -> (H*BB, t, DK): static lane slices + leading-dim
        # reshapes only (cheap, no 4-D transposes).
        return jnp.concatenate(
            [x2d[:, col0 + h * DK: col0 + (h + 1) * DK].reshape(BB, t, DK)
             for h in range(H)], axis=0)

    def merge_heads(o, t):
        # (H*BB, t, DK) -> (BB*t, D)
        return jnp.concatenate(
            [o[h * BB:(h + 1) * BB].reshape(BB * t, DK) for h in range(H)],
            axis=-1)

    def attention(q_src, q_off, kv_src, k_off, v_off, bias, tq, tk):
        # One batched score matmul, one softmax, one batched PV matmul for ALL
        # (batch, head) pairs.  1/sqrt(DK) is folded into Wq at pack time.
        qh = split_heads(q_src, q_off, tq)
        kh = split_heads(kv_src, k_off, tk)
        vh = split_heads(kv_src, v_off, tk)
        s = jnp.einsum('bqd,bkd->bqk', qh, kh,
                       preferred_element_type=jnp.float32) + bias
        m = jnp.max(s, axis=-1, keepdims=True)
        e = jnp.exp(s - m)
        p = e * pl.reciprocal(jnp.sum(e, axis=-1, keepdims=True), approx=True)
        o = jnp.einsum('bqk,bkd->bqd', p, vh, preferred_element_type=jnp.float32)
        return merge_heads(o, tq)

    for l in range(L):                      # static unroll (L = 2)
        base = l * VPL
        # ---- sublayer 0: masked self-attention (pre-norm residual) ----
        h = _layer_norm(hidden, v_ref[base + 0, 0:D], v_ref[base + 3, 0:D])
        qkv = jnp.dot(h.astype(jnp.bfloat16), w_ref[l, :, C_SQKV:C_SQKV + 3 * D],
                      preferred_element_type=jnp.float32) + v_ref[base + 6, 0:3 * D]
        att = attention(qkv, 0, qkv, D, 2 * D, tgt_bias, Tq, Tq)
        hidden = hidden + (
            jnp.dot(att.astype(jnp.bfloat16), w_ref[l, :, C_SOUT:C_SOUT + D],
                    preferred_element_type=jnp.float32) + v_ref[base + 7, 0:D])

        # ---- sublayer 1: cross-attention over encoder memory ----
        h = _layer_norm(hidden, v_ref[base + 1, 0:D], v_ref[base + 4, 0:D])
        q = jnp.dot(h.astype(jnp.bfloat16), w_ref[l, :, C_CQ:C_CQ + D],
                    preferred_element_type=jnp.float32) + v_ref[base + 8, 0:D]
        kv = jnp.dot(mem_bf, w_ref[l, :, C_CKV:C_CKV + 2 * D],
                     preferred_element_type=jnp.float32) + v_ref[base + 9, 0:2 * D]
        att = attention(q, 0, kv, 0, D, src_bias, Tq, Sk)
        hidden = hidden + (
            jnp.dot(att.astype(jnp.bfloat16), w_ref[l, :, C_COUT:C_COUT + D],
                    preferred_element_type=jnp.float32) + v_ref[base + 10, 0:D])

        # ---- sublayer 2: position-wise feed-forward ----
        h = _layer_norm(hidden, v_ref[base + 2, 0:D], v_ref[base + 5, 0:D])
        ff = jnp.maximum(
            jnp.dot(h.astype(jnp.bfloat16), w_ref[l, :, C_FF1:C_FF1 + DFF],
                    preferred_element_type=jnp.float32) + v_ref[base + 11, 0:DFF],
            0.0)
        ff = lax.dot_general(ff.astype(jnp.bfloat16), w_ref[l, :, C_FF2:C_FF2 + DFF],
                             (((1,), (1,)), ((), ())),   # ff @ W2 (W2 stored as W2^T)
                             preferred_element_type=jnp.float32) + v_ref[base + 12, 0:D]
        hidden = hidden + ff

    # final LayerNorm (Decoder.norm)
    out = _layer_norm(hidden, v_ref[L * VPL, 0:D], v_ref[L * VPL + 1, 0:D])
    out_ref[...] = out.reshape(BB, Tq, Dm).astype(out_ref.dtype)


def decoder_forward(x, memory, src_mask, tgt_mask, wslab, vslab, batch_block=None):
    Bn, Tn, Dn = x.shape
    Sn = memory.shape[1]
    # Operands total ~150 KB and the kernel is latency-bound on every TPU
    # generation: default to ONE program covering the whole batch (no fragile
    # device-kind sniffing).  Pass batch_block to shard over grid steps.
    BB = Bn if batch_block is None else batch_block
    assert Bn % BB == 0
    n_steps = Bn // BB

    # Additive mask biases precomputed host-side (0 keep / -1e9 drop).
    src_bias = jnp.where(src_mask == 0, -1e9, 0.0).astype(jnp.float32)
    tgt_bias = jnp.where(tgt_mask == 0, -1e9, 0.0).astype(jnp.float32)

    flops = 2 * Bn * L * (
        Tn * Dn * 3 * Dn + Tn * Dn * Dn              # self qkv + out projections
        + 2 * Tn * Tn * Dn                           # self scores + PV
        + Tn * Dn * Dn + Sn * Dn * 2 * Dn + Tn * Dn * Dn   # cross q, kv, out
        + 2 * Tn * Sn * Dn                           # cross scores + PV
        + 2 * Tn * Dn * DFF)                         # feed-forward
    transcendentals = Bn * L * H * (Tn * Tn + Tn * Sn)
    bytes_accessed = sum(int(a.size) * a.dtype.itemsize
                         for a in (x, memory, src_bias, tgt_bias, wslab, vslab))
    bytes_accessed += Bn * Tn * Dn * 4

    grid_spec = pltpu.PrefetchScalarGridSpec(
        num_scalar_prefetch=0,
        grid=(n_steps,),
        in_specs=[
            pl.BlockSpec((BB, Tn, Dn), lambda i: (i, 0, 0)),       # x
            pl.BlockSpec((BB, Sn, Dn), lambda i: (i, 0, 0)),       # memory
            pl.BlockSpec((BB, Tn, Sn), lambda i: (i, 0, 0)),       # src additive bias
            pl.BlockSpec((BB, Tn, Tn), lambda i: (i, 0, 0)),       # tgt additive bias
            pl.BlockSpec((L, Dn, WCOLS), lambda i: (0, 0, 0)),     # weight slab (bf16)
            pl.BlockSpec((VROWS_PAD, VWIDTH), lambda i: (0, 0)),   # vector slab (f32)
        ],
        out_specs=pl.BlockSpec((BB, Tn, Dn), lambda i: (i, 0, 0)),
    )
    return pl.pallas_call(
        decoder_kernel,
        out_shape=jax.ShapeDtypeStruct((Bn, Tn, Dn), jnp.float32),
        grid_spec=grid_spec,
        compiler_params=pltpu.CompilerParams(
            dimension_semantics=("parallel",)),
        cost_estimate=pl.CostEstimate(
            flops=int(flops), transcendentals=int(transcendentals),
            bytes_accessed=int(bytes_accessed)),
    )(x, memory, src_bias, tgt_bias, wslab, vslab)


# ---------------- host-side parameter init & packing ----------------
def init_params(key):
    ks = jax.random.split(key, 12)
    s = 0.02
    return {
        "ln_a": 1.0 + 0.1 * jax.random.normal(ks[0], (L, 3, D), jnp.float32),
        "ln_b": 0.1 * jax.random.normal(ks[1], (L, 3, D), jnp.float32),
        "self_w": s * jax.random.normal(ks[2], (L, 4, D, D), jnp.float32),
        "self_b": s * jax.random.normal(ks[3], (L, 4, D), jnp.float32),
        "src_w": s * jax.random.normal(ks[4], (L, 4, D, D), jnp.float32),
        "src_b": s * jax.random.normal(ks[5], (L, 4, D), jnp.float32),
        "ffn_w1": s * jax.random.normal(ks[6], (L, D, DFF), jnp.float32),
        "ffn_b1": s * jax.random.normal(ks[7], (L, DFF), jnp.float32),
        "ffn_w2": s * jax.random.normal(ks[8], (L, DFF, D), jnp.float32),
        "ffn_b2": s * jax.random.normal(ks[9], (L, D), jnp.float32),
        "fin_a": 1.0 + 0.1 * jax.random.normal(ks[10], (D,), jnp.float32),
        "fin_b": 0.1 * jax.random.normal(ks[11], (D,), jnp.float32),
    }


def pack_params(p):
    inv_sqrt_dk = 1.0 / math.sqrt(DK)
    sw, cw = p["self_w"], p["src_w"]

    def pad128(block):            # pad last dim up to the next 128 multiple
        padn = (-block.shape[-1]) % 128
        return jnp.pad(block, ((0, 0), (0, 0), (0, padn)))

    blocks = [
        jnp.concatenate([sw[:, 0] * inv_sqrt_dk, sw[:, 1], sw[:, 2]], axis=-1),
        sw[:, 3],                                     # self Wout
        cw[:, 0] * inv_sqrt_dk,                       # cross Wq (pre-scaled)
        jnp.concatenate([cw[:, 1], cw[:, 2]], axis=-1),  # cross [Wk|Wv]
        cw[:, 3],                                     # cross Wout
        p["ffn_w1"],                                  # (L, D, DFF)
        jnp.transpose(p["ffn_w2"], (0, 2, 1)),        # (L, D, DFF) == W2^T
    ]
    wslab = jnp.concatenate([pad128(b) for b in blocks],
                            axis=-1).astype(jnp.bfloat16)
    assert wslab.shape == (L, D, WCOLS)

    def row(v):
        v = jnp.asarray(v, jnp.float32).reshape(-1)
        return jnp.pad(v, (0, VWIDTH - v.shape[0]))

    rows = []
    for l in range(L):
        rows += [
            row(p["ln_a"][l, 0]), row(p["ln_a"][l, 1]), row(p["ln_a"][l, 2]),
            row(p["ln_b"][l, 0]), row(p["ln_b"][l, 1]), row(p["ln_b"][l, 2]),
            row(jnp.concatenate([p["self_b"][l, 0] * inv_sqrt_dk,
                                 p["self_b"][l, 1], p["self_b"][l, 2]])),
            row(p["self_b"][l, 3]),
            row(p["src_b"][l, 0] * inv_sqrt_dk),
            row(jnp.concatenate([p["src_b"][l, 1], p["src_b"][l, 2]])),
            row(p["src_b"][l, 3]),
            row(p["ffn_b1"][l]),
            row(p["ffn_b2"][l]),
        ]
    rows += [row(p["fin_a"]), row(p["fin_b"])]
    while len(rows) < VROWS_PAD:
        rows.append(jnp.zeros((VWIDTH,), jnp.float32))
    vslab = jnp.stack(rows, axis=0)                   # (32, 128) f32
    return wslab, vslab


# ---------------- pure-JAX reference (original module semantics) ----------------
def decoder_reference(x, memory, src_mask, tgt_mask, p):
    def ln(h, a, b):
        mean = jnp.mean(h, axis=-1, keepdims=True)
        var = jnp.sum((h - mean) ** 2, axis=-1, keepdims=True) / (h.shape[-1] - 1)
        return a * (h - mean) / (jnp.sqrt(var) + EPS) + b

    def mha(q_in, k_in, v_in, mask, w, bias):
        q = q_in @ w[0] + bias[0]
        k = k_in @ w[1] + bias[1]
        v = v_in @ w[2] + bias[2]
        tq, tk = q.shape[0], k.shape[0]
        q = q.reshape(tq, H, DK).transpose(1, 0, 2)
        k = k.reshape(tk, H, DK).transpose(1, 0, 2)
        v = v.reshape(tk, H, DK).transpose(1, 0, 2)
        s = jnp.einsum('htd,hsd->hts', q, k) / math.sqrt(DK)
        s = jnp.where(mask[None] == 0, -1e9, s)
        pr = jax.nn.softmax(s, axis=-1)
        o = jnp.einsum('hts,hsd->htd', pr, v).transpose(1, 0, 2).reshape(tq, D)
        return o @ w[3] + bias[3]

    outs = []
    for b in range(x.shape[0]):
        h, m = x[b], memory[b]
        for l in range(L):
            t = ln(h, p["ln_a"][l, 0], p["ln_b"][l, 0])
            h = h + mha(t, t, t, tgt_mask[b], p["self_w"][l], p["self_b"][l])
            t = ln(h, p["ln_a"][l, 1], p["ln_b"][l, 1])
            h = h + mha(t, m, m, src_mask[b], p["src_w"][l], p["src_b"][l])
            t = ln(h, p["ln_a"][l, 2], p["ln_b"][l, 2])
            ff = jnp.maximum(t @ p["ffn_w1"][l] + p["ffn_b1"][l], 0.0)
            h = h + ff @ p["ffn_w2"][l] + p["ffn_b2"][l]
        outs.append(ln(h, p["fin_a"], p["fin_b"]))
    return jnp.stack(outs, axis=0)


if __name__ == "__main__":
    key = jax.random.PRNGKey(0)
    k_x, k_m, k_p = jax.random.split(key, 3)

    x = jax.random.normal(k_x, (B, T, D), jnp.float32)       # decoder input
    memory = jax.random.normal(k_m, (B, S, D), jnp.float32)  # encoder memory
    src_mask = jnp.ones((B, T, S), jnp.float32)              # no source padding
    tgt_mask = jnp.broadcast_to(
        jnp.tril(jnp.ones((T, T), jnp.float32))[None], (B, T, T))  # causal

    params = init_params(k_p)
    wslab, vslab = pack_params(params)

    out = decoder_forward(x, memory, src_mask, tgt_mask, wslab, vslab)
    out = jax.block_until_ready(out)
    assert out.shape == (B, T, D)
    assert bool(jnp.all(jnp.isfinite(out)))

    # Loose tolerance: bf16 matmul operands + approx EUP reciprocal in softmax
    # vs exact-division fp32 reference (catches structural/packing bugs,
    # ignores ~1e-2-level drift).
    ref = decoder_reference(x, memory, src_mask, tgt_mask, params)
    max_err = float(jnp.max(jnp.abs(out - ref)))
    assert jnp.allclose(out, ref, atol=5e-2, rtol=5e-2), max_err

    print("KERNEL_OK")
</pallas_src>

<mosaic_0001>
module attributes {stable_mosaic.version = 11 : i64} {
  func.func @decoder_kernel(%arg0: i32, %arg1: memref<2x8x32xf32, #tpu.memory_space<vmem>>, %arg2: memref<2x8x32xf32, #tpu.memory_space<vmem>>, %arg3: memref<2x8x8xf32, #tpu.memory_space<vmem>>, %arg4: memref<2x8x8xf32, #tpu.memory_space<vmem>>, %arg5: memref<2x32x896xbf16, #tpu.memory_space<vmem>>, %arg6: memref<32x128xf32, #tpu.memory_space<vmem>>, %arg7: memref<2x8x32xf32, #tpu.memory_space<vmem>>) attributes {dimension_semantics = [#tpu.dimension_semantics<parallel>], iteration_bounds = array<i64: 1>, scalar_prefetch = 0 : i64, scratch_operands = 0 : i64, tpu.core_type = #tpu.core_type<tc>, window_params = [{transform_indices = @transform_0, window_bounds = array<i64: 2, 8, 32>}, {transform_indices = @transform_1, window_bounds = array<i64: 2, 8, 32>}, {transform_indices = @transform_2, window_bounds = array<i64: 2, 8, 8>}, {transform_indices = @transform_3, window_bounds = array<i64: 2, 8, 8>}, {pipeline_mode = #tpu.pipeline_mode<synchronous>, transform_indices = @transform_4, window_bounds = array<i64: 2, 32, 896>}, {pipeline_mode = #tpu.pipeline_mode<synchronous>, transform_indices = @transform_5, window_bounds = array<i64: 32, 128>}, {transform_indices = @transform_6, window_bounds = array<i64: 2, 8, 32>}]} {
    %c0 = arith.constant 0 : index
    %c0_0 = arith.constant 0 : index
    %c0_1 = arith.constant 0 : index
    %0 = vector.load %arg1[%c0, %c0_0, %c0_1] : memref<2x8x32xf32, #tpu.memory_space<vmem>>, vector<2x8x32xf32>
    %1 = vector.shape_cast %0 : vector<2x8x32xf32> to vector<16x32xf32>
    %c0_2 = arith.constant 0 : index
    %c0_3 = arith.constant 0 : index
    %c0_4 = arith.constant 0 : index
    %2 = vector.load %arg2[%c0_2, %c0_3, %c0_4] : memref<2x8x32xf32, #tpu.memory_space<vmem>>, vector<2x8x32xf32>
    %3 = vector.shape_cast %2 : vector<2x8x32xf32> to vector<16x32xf32>
    %4 = arith.truncf %3 : vector<16x32xf32> to vector<16x32xbf16>
    %c0_5 = arith.constant 0 : index
    %c0_6 = arith.constant 0 : index
    %c0_7 = arith.constant 0 : index
    %5 = vector.load %arg4[%c0_5, %c0_6, %c0_7] : memref<2x8x8xf32, #tpu.memory_space<vmem>>, vector<2x8x8xf32>
    %6 = tpu.concatenate %5, %5, %5, %5 in 0 : vector<2x8x8xf32>, vector<2x8x8xf32>, vector<2x8x8xf32>, vector<2x8x8xf32> -> vector<8x8x8xf32>
    %c0_8 = arith.constant 0 : index
    %c0_9 = arith.constant 0 : index
    %c0_10 = arith.constant 0 : index
    %7 = vector.load %arg3[%c0_8, %c0_9, %c0_10] : memref<2x8x8xf32, #tpu.memory_space<vmem>>, vector<2x8x8xf32>
    %8 = tpu.concatenate %7, %7, %7, %7 in 0 : vector<2x8x8xf32>, vector<2x8x8xf32>, vector<2x8x8xf32>, vector<2x8x8xf32> -> vector<8x8x8xf32>
    %c0_11 = arith.constant 0 : index
    %c0_12 = arith.constant 0 : index
    %9 = vector.load %arg6[%c0_11, %c0_12] : memref<32x128xf32, #tpu.memory_space<vmem>>, vector<1x32xf32>
    %10 = vector.shape_cast %9 : vector<1x32xf32> to vector<32xf32>
    %c3 = arith.constant 3 : index
    %c0_13 = arith.constant 0 : index
    %11 = vector.load %arg6[%c3, %c0_13] : memref<32x128xf32, #tpu.memory_space<vmem>>, vector<1x32xf32>
    %12 = vector.shape_cast %11 : vector<1x32xf32> to vector<32xf32>
    %cst = arith.constant dense<0.000000e+00> : vector<16xf32>
    %13 = vector.multi_reduction <add>, %1, %cst [1] : vector<16x32xf32> to vector<16xf32>
    %14 = vector.shape_cast %13 : vector<16xf32> to vector<16x1xf32>
    %15 = arith.mulf %1, %1 : vector<16x32xf32>
    %cst_14 = arith.constant dense<0.000000e+00> : vector<16xf32>
    %16 = vector.multi_reduction <add>, %15, %cst_14 [1] : vector<16x32xf32> to vector<16xf32>
    %17 = vector.shape_cast %16 : vector<16xf32> to vector<16x1xf32>
    %cst_15 = arith.constant 3.125000e-02 : f32
    %18 = vector.broadcast %cst_15 : f32 to vector<16x1xf32>
    %19 = arith.mulf %14, %18 : vector<16x1xf32>
    %20 = arith.mulf %19, %14 : vector<16x1xf32>
    %21 = arith.subf %17, %20 : vector<16x1xf32>
    %cst_16 = arith.constant 0.000000e+00 : f32
    %22 = vector.broadcast %cst_16 : f32 to vector<16x1xf32>
    %23 = arith.maximumf %21, %22 : vector<16x1xf32>
    %cst_17 = arith.constant 0.0322580636 : f32
    %24 = vector.broadcast %cst_17 : f32 to vector<16x1xf32>
    %25 = arith.mulf %23, %24 : vector<16x1xf32>
    %26 = vector.broadcast %19 : vector<16x1xf32> to vector<16x32xf32>
    %27 = arith.subf %1, %26 : vector<16x32xf32>
    %28 = vector.shape_cast %10 : vector<32xf32> to vector<1x32xf32>
    %29 = vector.broadcast %28 : vector<1x32xf32> to vector<16x32xf32>
    %30 = arith.mulf %29, %27 : vector<16x32xf32>
    %31 = math.sqrt %25 : vector<16x1xf32>
    %cst_18 = arith.constant 9.99999997E-7 : f32
    %32 = vector.broadcast %cst_18 : f32 to vector<16x1xf32>
    %33 = arith.addf %31, %32 : vector<16x1xf32>
    %34 = vector.broadcast %33 : vector<16x1xf32> to vector<16x32xf32>
    %35 = arith.divf %30, %34 : vector<16x32xf32>
    %36 = vector.shape_cast %12 : vector<32xf32> to vector<1x32xf32>
    %37 = vector.broadcast %36 : vector<1x32xf32> to vector<16x32xf32>
    %38 = arith.addf %35, %37 : vector<16x32xf32>
    %39 = arith.truncf %38 : vector<16x32xf32> to vector<16x32xbf16>
    %c0_19 = arith.constant 0 : index
    %c0_20 = arith.constant 0 : index
    %c0_21 = arith.constant 0 : index
    %40 = vector.load %arg5[%c0_19, %c0_20, %c0_21] : memref<2x32x896xbf16, #tpu.memory_space<vmem>>, vector<1x32x96xbf16>
    %41 = vector.shape_cast %40 : vector<1x32x96xbf16> to vector<32x96xbf16>
    %cst_22 = arith.constant dense<0.000000e+00> : vector<16x96xf32>
    %42 = tpu.matmul %39, %41, %cst_22 {dimension_numbers = #tpu.dot_dimension_numbers<[1], [0], [0], [1], [0, 0, 1, 1], [], []>} : vector<16x32xbf16>, vector<32x96xbf16>, vector<16x96xf32> -> vector<16x96xf32>
    %c6 = arith.constant 6 : index
    %c0_23 = arith.constant 0 : index
    %43 = vector.load %arg6[%c6, %c0_23] : memref<32x128xf32, #tpu.memory_space<vmem>>, vector<1x96xf32>
    %44 = vector.shape_cast %43 : vector<1x96xf32> to vector<96xf32>
    %45 = vector.shape_cast %44 : vector<96xf32> to vector<1x96xf32>
    %46 = vector.broadcast %45 : vector<1x96xf32> to vector<16x96xf32>
    %47 = arith.addf %42, %46 : vector<16x96xf32>
    %48 = vector.extract_strided_slice %47 {offsets = [0, 0], sizes = [16, 8], strides = [1, 1]} : vector<16x96xf32> to vector<16x8xf32>
    %49 = vector.shape_cast %48 : vector<16x8xf32> to vector<2x8x8xf32>
    %50 = vector.extract_strided_slice %47 {offsets = [0, 8], sizes = [16, 8], strides = [1, 1]} : vector<16x96xf32> to vector<16x8xf32>
    %51 = vector.shape_cast %50 : vector<16x8xf32> to vector<2x8x8xf32>
    %52 = vector.extract_strided_slice %47 {offsets = [0, 16], sizes = [16, 8], strides = [1, 1]} : vector<16x96xf32> to vector<16x8xf32>
    %53 = vector.shape_cast %52 : vector<16x8xf32> to vector<2x8x8xf32>
    %54 = vector.extract_strided_slice %47 {offsets = [0, 24], sizes = [16, 8], strides = [1, 1]} : vector<16x96xf32> to vector<16x8xf32>
    %55 = vector.shape_cast %54 : vector<16x8xf32> to vector<2x8x8xf32>
    %56 = tpu.concatenate %49, %51, %53, %55 in 0 : vector<2x8x8xf32>, vector<2x8x8xf32>, vector<2x8x8xf32>, vector<2x8x8xf32> -> vector<8x8x8xf32>
    %57 = vector.extract_strided_slice %47 {offsets = [0, 32], sizes = [16, 8], strides = [1, 1]} : vector<16x96xf32> to vector<16x8xf32>
    %58 = vector.shape_cast %57 : vector<16x8xf32> to vector<2x8x8xf32>
    %59 = vector.extract_strided_slice %47 {offsets = [0, 40], sizes = [16, 8], strides = [1, 1]} : vector<16x96xf32> to vector<16x8xf32>
    %60 = vector.shape_cast %59 : vector<16x8xf32> to vector<2x8x8xf32>
    %61 = vector.extract_strided_slice %47 {offsets = [0, 48], sizes = [16, 8], strides = [1, 1]} : vector<16x96xf32> to vector<16x8xf32>
    %62 = vector.shape_cast %61 : vector<16x8xf32> to vector<2x8x8xf32>
    %63 = vector.extract_strided_slice %47 {offsets = [0, 56], sizes = [16, 8], strides = [1, 1]} : vector<16x96xf32> to vector<16x8xf32>
    %64 = vector.shape_cast %63 : vector<16x8xf32> to vector<2x8x8xf32>
    %65 = tpu.concatenate %58, %60, %62, %64 in 0 : vector<2x8x8xf32>, vector<2x8x8xf32>, vector<2x8x8xf32>, vector<2x8x8xf32> -> vector<8x8x8xf32>
    %66 = vector.extract_strided_slice %47 {offsets = [0, 64], sizes = [16, 8], strides = [1, 1]} : vector<16x96xf32> to vector<16x8xf32>
    %67 = vector.shape_cast %66 : vector<16x8xf32> to vector<2x8x8xf32>
    %68 = vector.extract_strided_slice %47 {offsets = [0, 72], sizes = [16, 8], strides = [1, 1]} : vector<16x96xf32> to vector<16x8xf32>
    %69 = vector.shape_cast %68 : vector<16x8xf32> to vector<2x8x8xf32>
    %70 = vector.extract_strided_slice %47 {offsets = [0, 80], sizes = [16, 8], strides = [1, 1]} : vector<16x96xf32> to vector<16x8xf32>
    %71 = vector.shape_cast %70 : vector<16x8xf32> to vector<2x8x8xf32>
    %72 = vector.extract_strided_slice %47 {offsets = [0, 88], sizes = [16, 8], strides = [1, 1]} : vector<16x96xf32> to vector<16x8xf32>
    %73 = vector.shape_cast %72 : vector<16x8xf32> to vector<2x8x8xf32>
    %74 = tpu.concatenate %67, %69, %71, %73 in 0 : vector<2x8x8xf32>, vector<2x8x8xf32>, vector<2x8x8xf32>, vector<2x8x8xf32> -> vector<8x8x8xf32>
    "tpu.trace_start"() <{level = 10 : i32, message = "bqd,bkd->bqk"}> : () -> ()
    %cst_24 = arith.constant dense<0.000000e+00> : vector<8x8x8xf32>
    %75 = tpu.matmul %56, %65, %cst_24 {dimension_numbers = #tpu.dot_dimension_numbers<[2], [2], [1], [1], [0, 0, 0, 1, 1, 1], [0], [0]>} : vector<8x8x8xf32>, vector<8x8x8xf32>, vector<8x8x8xf32> -> vector<8x8x8xf32>
    "tpu.trace_stop"() : () -> ()
    %76 = arith.addf %75, %6 : vector<8x8x8xf32>
    %cst_25 = arith.constant dense<0xFF800000> : vector<8x8xf32>
    %77 = vector.multi_reduction <maximumf>, %76, %cst_25 [2] : vector<8x8x8xf32> to vector<8x8xf32>
    %78 = vector.shape_cast %77 : vector<8x8xf32> to vector<8x8x1xf32>
    %79 = vector.broadcast %78 : vector<8x8x1xf32> to vector<8x8x8xf32>
    %80 = arith.subf %76, %79 : vector<8x8x8xf32>
    %81 = math.exp %80 : vector<8x8x8xf32>
    %cst_26 = arith.constant dense<0.000000e+00> : vector<8x8xf32>
    %82 = vector.multi_reduction <add>, %81, %cst_26 [2] : vector<8x8x8xf32> to vector<8x8xf32>
    %83 = vector.shape_cast %82 : vector<8x8xf32> to vector<8x8x1xf32>
    %84 = tpu.reciprocal %83 {approx = true} : vector<8x8x1xf32> -> vector<8x8x1xf32>
    %85 = vector.broadcast %84 : vector<8x8x1xf32> to vector<8x8x8xf32>
    %86 = arith.mulf %81, %85 : vector<8x8x8xf32>
    "tpu.trace_start"() <{level = 10 : i32, message = "bqk,bkd->bqd"}> : () -> ()
    %cst_27 = arith.constant dense<0.000000e+00> : vector<8x8x8xf32>
    %87 = tpu.matmul %86, %74, %cst_27 {dimension_numbers = #tpu.dot_dimension_numbers<[2], [1], [1], [2], [0, 0, 0, 1, 1, 2], [0], [0]>} : vector<8x8x8xf32>, vector<8x8x8xf32>, vector<8x8x8xf32> -> vector<8x8x8xf32>
    "tpu.trace_stop"() : () -> ()
    %88 = vector.extract_strided_slice %87 {offsets = [0, 0, 0], sizes = [2, 8, 8], strides = [1, 1, 1]} : vector<8x8x8xf32> to vector<2x8x8xf32>
    %89 = vector.shape_cast %88 : vector<2x8x8xf32> to vector<16x8xf32>
    %90 = vector.extract_strided_slice %87 {offsets = [2, 0, 0], sizes = [2, 8, 8], strides = [1, 1, 1]} : vector<8x8x8xf32> to vector<2x8x8xf32>
    %91 = vector.shape_cast %90 : vector<2x8x8xf32> to vector<16x8xf32>
    %92 = vector.extract_strided_slice %87 {offsets = [4, 0, 0], sizes = [2, 8, 8], strides = [1, 1, 1]} : vector<8x8x8xf32> to vector<2x8x8xf32>
    %93 = vector.shape_cast %92 : vector<2x8x8xf32> to vector<16x8xf32>
    %94 = vector.extract_strided_slice %87 {offsets = [6, 0, 0], sizes = [2, 8, 8], strides = [1, 1, 1]} : vector<8x8x8xf32> to vector<2x8x8xf32>
    %95 = vector.shape_cast %94 : vector<2x8x8xf32> to vector<16x8xf32>
    %96 = tpu.concatenate %89, %91, %93, %95 in 1 : vector<16x8xf32>, vector<16x8xf32>, vector<16x8xf32>, vector<16x8xf32> -> vector<16x32xf32>
    %97 = arith.truncf %96 : vector<16x32xf32> to vector<16x32xbf16>
    %c0_28 = arith.constant 0 : index
    %c0_29 = arith.constant 0 : index
    %c128 = arith.constant 128 : index
    %98 = vector.load %arg5[%c0_28, %c0_29, %c128] : memref<2x32x896xbf16, #tpu.memory_space<vmem>>, vector<1x32x32xbf16>
    %99 = vector.shape_cast %98 : vector<1x32x32xbf16> to vector<32x32xbf16>
    %cst_30 = arith.constant dense<0.000000e+00> : vector<16x32xf32>
    %100 = tpu.matmul %97, %99, %cst_30 {dimension_numbers = #tpu.dot_dimension_numbers<[1], [0], [0], [1], [0, 0, 1, 1], [], []>} : vector<16x32xbf16>, vector<32x32xbf16>, vector<16x32xf32> -> vector<16x32xf32>
    %c7 = arith.constant 7 : index
    %c0_31 = arith.constant 0 : index
    %101 = vector.load %arg6[%c7, %c0_31] : memref<32x128xf32, #tpu.memory_space<vmem>>, vector<1x32xf32>
    %102 = vector.shape_cast %101 : vector<1x32xf32> to vector<32xf32>
    %103 = vector.shape_cast %102 : vector<32xf32> to vector<1x32xf32>
    %104 = vector.broadcast %103 : vector<1x32xf32> to vector<16x32xf32>
    %105 = arith.addf %100, %104 : vector<16x32xf32>
    %106 = arith.addf %1, %105 : vector<16x32xf32>
    %c1 = arith.constant 1 : index
    %c0_32 = arith.constant 0 : index
    %107 = vector.load %arg6[%c1, %c0_32] : memref<32x128xf32, #tpu.memory_space<vmem>>, vector<1x32xf32>
    %108 = vector.shape_cast %107 : vector<1x32xf32> to vector<32xf32>
    %c4 = arith.constant 4 : index
    %c0_33 = arith.constant 0 : index
    %109 = vector.load %arg6[%c4, %c0_33] : memref<32x128xf32, #tpu.memory_space<vmem>>, vector<1x32xf32>
    %110 = vector.shape_cast %109 : vector<1x32xf32> to vector<32xf32>
    %cst_34 = arith.constant dense<0.000000e+00> : vector<16xf32>
    %111 = vector.multi_reduction <add>, %106, %cst_34 [1] : vector<16x32xf32> to vector<16xf32>
    %112 = vector.shape_cast %111 : vector<16xf32> to vector<16x1xf32>
    %113 = arith.mulf %106, %106 : vector<16x32xf32>
    %cst_35 = arith.constant dense<0.000000e+00> : vector<16xf32>
    %114 = vector.multi_reduction <add>, %113, %cst_35 [1] : vector<16x32xf32> to vector<16xf32>
    %115 = vector.shape_cast %114 : vector<16xf32> to vector<16x1xf32>
    %cst_36 = arith.constant 3.125000e-02 : f32
    %116 = vector.broadcast %cst_36 : f32 to vector<16x1xf32>
    %117 = arith.mulf %112, %116 : vector<16x1xf32>
    %118 = arith.mulf %117, %112 : vector<16x1xf32>
    %119 = arith.subf %115, %118 : vector<16x1xf32>
    %cst_37 = arith.constant 0.000000e+00 : f32
    %120 = vector.broadcast %cst_37 : f32 to vector<16x1xf32>
    %121 = arith.maximumf %119, %120 : vector<16x1xf32>
    %cst_38 = arith.constant 0.0322580636 : f32
    %122 = vector.broadcast %cst_38 : f32 to vector<16x1xf32>
    %123 = arith.mulf %121, %122 : vector<16x1xf32>
    %124 = vector.broadcast %117 : vector<16x1xf32> to vector<16x32xf32>
    %125 = arith.subf %106, %124 : vector<16x32xf32>
    %126 = vector.shape_cast %108 : vector<32xf32> to vector<1x32xf32>
    %127 = vector.broadcast %126 : vector<1x32xf32> to vector<16x32xf32>
    %128 = arith.mulf %127, %125 : vector<16x32xf32>
    %129 = math.sqrt %123 : vector<16x1xf32>
    %cst_39 = arith.constant 9.99999997E-7 : f32
    %130 = vector.broadcast %cst_39 : f32 to vector<16x1xf32>
    %131 = arith.addf %129, %130 : vector<16x1xf32>
    %132 = vector.broadcast %131 : vector<16x1xf32> to vector<16x32xf32>
    %133 = arith.divf %128, %132 : vector<16x32xf32>
    %134 = vector.shape_cast %110 : vector<32xf32> to vector<1x32xf32>
    %135 = vector.broadcast %134 : vector<1x32xf32> to vector<16x32xf32>
    %136 = arith.addf %133, %135 : vector<16x32xf32>
    %137 = arith.truncf %136 : vector<16x32xf32> to vector<16x32xbf16>
    %c0_40 = arith.constant 0 : index
    %c0_41 = arith.constant 0 : index
    %c256 = arith.constant 256 : index
    %138 = vector.load %arg5[%c0_40, %c0_41, %c256] : memref<2x32x896xbf16, #tpu.memory_space<vmem>>, vector<1x32x32xbf16>
    %139 = vector.shape_cast %138 : vector<1x32x32xbf16> to vector<32x32xbf16>
    %cst_42 = arith.constant dense<0.000000e+00> : vector<16x32xf32>
    %140 = tpu.matmul %137, %139, %cst_42 {dimension_numbers = #tpu.dot_dimension_numbers<[1], [0], [0], [1], [0, 0, 1, 1], [], []>} : vector<16x32xbf16>, vector<32x32xbf16>, vector<16x32xf32> -> vector<16x32xf32>
    %c8 = arith.constant 8 : index
    %c0_43 = arith.constant 0 : index
    %141 = vector.load %arg6[%c8, %c0_43] : memref<32x128xf32, #tpu.memory_space<vmem>>, vector<1x32xf32>
    %142 = vector.shape_cast %141 : vector<1x32xf32> to vector<32xf32>
    %143 = vector.shape_cast %142 : vector<32xf32> to vector<1x32xf32>
    %144 = vector.broadcast %143 : vector<1x32xf32> to vector<16x32xf32>
    %145 = arith.addf %140, %144 : vector<16x32xf32>
    %c0_44 = arith.constant 0 : index
    %c0_45 = arith.constant 0 : index
    %c384 = arith.constant 384 : index
    %146 = vector.load %arg5[%c0_44, %c0_45, %c384] : memref<2x32x896xbf16, #tpu.memory_space<vmem>>, vector<1x32x64xbf16>
    %147 = vector.shape_cast %146 : vector<1x32x64xbf16> to vector<32x64xbf16>
    %cst_46 = arith.constant dense<0.000000e+00> : vector<16x64xf32>
    %148 = tpu.matmul %4, %147, %cst_46 {dimension_numbers = #tpu.dot_dimension_numbers<[1], [0], [0], [1], [0, 0, 1, 1], [], []>} : vector<16x32xbf16>, vector<32x64xbf16>, vector<16x64xf32> -> vector<16x64xf32>
    %c9 = arith.constant 9 : index
    %c0_47 = arith.constant 0 : index
    %149 = vector.load %arg6[%c9, %c0_47] : memref<32x128xf32, #tpu.memory_space<vmem>>, vector<1x64xf32>
    %150 = vector.shape_cast %149 : vector<1x64xf32> to vector<64xf32>
    %151 = vector.shape_cast %150 : vector<64xf32> to vector<1x64xf32>
    %152 = vector.broadcast %151 : vector<1x64xf32> to vector<16x64xf32>
    %153 = arith.addf %148, %152 : vector<16x64xf32>
    %154 = vector.extract_strided_slice %145 {offsets = [0, 0], sizes = [16, 8], strides = [1, 1]} : vector<16x32xf32> to vector<16x8xf32>
    %155 = vector.shape_cast %154 : vector<16x8xf32> to vector<2x8x8xf32>
    %156 = vector.extract_strided_slice %145 {offsets = [0, 8], sizes = [16, 8], strides = [1, 1]} : vector<16x32xf32> to vector<16x8xf32>
    %157 = vector.shape_cast %156 : vector<16x8xf32> to vector<2x8x8xf32>
    %158 = vector.extract_strided_slice %145 {offsets = [0, 16], sizes = [16, 8], strides = [1, 1]} : vector<16x32xf32> to vector<16x8xf32>
    %159 = vector.shape_cast %158 : vector<16x8xf32> to vector<2x8x8xf32>
    %160 = vector.extract_strided_slice %145 {offsets = [0, 24], sizes = [16, 8], strides = [1, 1]} : vector<16x32xf32> to vector<16x8xf32>
    %161 = vector.shape_cast %160 : vector<16x8xf32> to vector<2x8x8xf32>
    %162 = tpu.concatenate %155, %157, %159, %161 in 0 : vector<2x8x8xf32>, vector<2x8x8xf32>, vector<2x8x8xf32>, vector<2x8x8xf32> -> vector<8x8x8xf32>
    %163 = vector.extract_strided_slice %153 {offsets = [0, 0], sizes = [16, 8], strides = [1, 1]} : vector<16x64xf32> to vector<16x8xf32>
    %164 = vector.shape_cast %163 : vector<16x8xf32> to vector<2x8x8xf32>
    %165 = vector.extract_strided_slice %153 {offsets = [0, 8], sizes = [16, 8], strides = [1, 1]} : vector<16x64xf32> to vector<16x8xf32>
    %166 = vector.shape_cast %165 : vector<16x8xf32> to vector<2x8x8xf32>
    %167 = vector.extract_strided_slice %153 {offsets = [0, 16], sizes = [16, 8], strides = [1, 1]} : vector<16x64xf32> to vector<16x8xf32>
    %168 = vector.shape_cast %167 : vector<16x8xf32> to vector<2x8x8xf32>
    %169 = vector.extract_strided_slice %153 {offsets = [0, 24], sizes = [16, 8], strides = [1, 1]} : vector<16x64xf32> to vector<16x8xf32>
    %170 = vector.shape_cast %169 : vector<16x8xf32> to vector<2x8x8xf32>
    %171 = tpu.concatenate %164, %166, %168, %170 in 0 : vector<2x8x8xf32>, vector<2x8x8xf32>, vector<2x8x8xf32>, vector<2x8x8xf32> -> vector<8x8x8xf32>
    %172 = vector.extract_strided_slice %153 {offsets = [0, 32], sizes = [16, 8], strides = [1, 1]} : vector<16x64xf32> to vector<16x8xf32>
    %173 = vector.shape_cast %172 : vector<16x8xf32> to vector<2x8x8xf32>
    %174 = vector.extract_strided_slice %153 {offsets = [0, 40], sizes = [16, 8], strides = [1, 1]} : vector<16x64xf32> to vector<16x8xf32>
    %175 = vector.shape_cast %174 : vector<16x8xf32> to vector<2x8x8xf32>
    %176 = vector.extract_strided_slice %153 {offsets = [0, 48], sizes = [16, 8], strides = [1, 1]} : vector<16x64xf32> to vector<16x8xf32>
    %177 = vector.shape_cast %176 : vector<16x8xf32> to vector<2x8x8xf32>
    %178 = vector.extract_strided_slice %153 {offsets = [0, 56], sizes = [16, 8], strides = [1, 1]} : vector<16x64xf32> to vector<16x8xf32>
    %179 = vector.shape_cast %178 : vector<16x8xf32> to vector<2x8x8xf32>
    %180 = tpu.concatenate %173, %175, %177, %179 in 0 : vector<2x8x8xf32>, vector<2x8x8xf32>, vector<2x8x8xf32>, vector<2x8x8xf32> -> vector<8x8x8xf32>
    "tpu.trace_start"() <{level = 10 : i32, message = "bqd,bkd->bqk"}> : () -> ()
    %cst_48 = arith.constant dense<0.000000e+00> : vector<8x8x8xf32>
    %181 = tpu.matmul %162, %171, %cst_48 {dimension_numbers = #tpu.dot_dimension_numbers<[2], [2], [1], [1], [0, 0, 0, 1, 1, 1], [0], [0]>} : vector<8x8x8xf32>, vector<8x8x8xf32>, vector<8x8x8xf32> -> vector<8x8x8xf32>
    "tpu.trace_stop"() : () -> ()
    %182 = arith.addf %181, %8 : vector<8x8x8xf32>
    %cst_49 = arith.constant dense<0xFF800000> : vector<8x8xf32>
    %183 = vector.multi_reduction <maximumf>, %182, %cst_49 [2] : vector<8x8x8xf32> to vector<8x8xf32>
    %184 = vector.shape_cast %183 : vector<8x8xf32> to vector<8x8x1xf32>
    %185 = vector.broadcast %184 : vector<8x8x1xf32> to vector<8x8x8xf32>
    %186 = arith.subf %182, %185 : vector<8x8x8xf32>
    %187 = math.exp %186 : vector<8x8x8xf32>
    %cst_50 = arith.constant dense<0.000000e+00> : vector<8x8xf32>
    %188 = vector.multi_reduction <add>, %187, %cst_50 [2] : vector<8x8x8xf32> to vector<8x8xf32>
    %189 = vector.shape_cast %188 : vector<8x8xf32> to vector<8x8x1xf32>
    %190 = tpu.reciprocal %189 {approx = true} : vector<8x8x1xf32> -> vector<8x8x1xf32>
    %191 = vector.broadcast %190 : vector<8x8x1xf32> to vector<8x8x8xf32>
    %192 = arith.mulf %187, %191 : vector<8x8x8xf32>
    "tpu.trace_start"() <{level = 10 : i32, message = "bqk,bkd->bqd"}> : () -> ()
    %cst_51 = arith.constant dense<0.000000e+00> : vector<8x8x8xf32>
    %193 = tpu.matmul %192, %180, %cst_51 {dimension_numbers = #tpu.dot_dimension_numbers<[2], [1], [1], [2], [0, 0, 0, 1, 1, 2], [0], [0]>} : vector<8x8x8xf32>, vector<8x8x8xf32>, vector<8x8x8xf32> -> vector<8x8x8xf32>
    "tpu.trace_stop"() : () -> ()
    %194 = vector.extract_strided_slice %193 {offsets = [0, 0, 0], sizes = [2, 8, 8], strides = [1, 1, 1]} : vector<8x8x8xf32> to vector<2x8x8xf32>
    %195 = vector.shape_cast %194 : vector<2x8x8xf32> to vector<16x8xf32>
    %196 = vector.extract_strided_slice %193 {offsets = [2, 0, 0], sizes = [2, 8, 8], strides = [1, 1, 1]} : vector<8x8x8xf32> to vector<2x8x8xf32>
    %197 = vector.shape_cast %196 : vector<2x8x8xf32> to vector<16x8xf32>
    %198 = vector.extract_strided_slice %193 {offsets = [4, 0, 0], sizes = [2, 8, 8], strides = [1, 1, 1]} : vector<8x8x8xf32> to vector<2x8x8xf32>
    %199 = vector.shape_cast %198 : vector<2x8x8xf32> to vector<16x8xf32>
    %200 = vector.extract_strided_slice %193 {offsets = [6, 0, 0], sizes = [2, 8, 8], strides = [1, 1, 1]} : vector<8x8x8xf32> to vector<2x8x8xf32>
    %201 = vector.shape_cast %200 : vector<2x8x8xf32> to vector<16x8xf32>
    %202 = tpu.concatenate %195, %197, %199, %201 in 1 : vector<16x8xf32>, vector<16x8xf32>, vector<16x8xf32>, vector<16x8xf32> -> vector<16x32xf32>
    %203 = arith.truncf %202 : vector<16x32xf32> to vector<16x32xbf16>
    %c0_52 = arith.constant 0 : index
    %c0_53 = arith.constant 0 : index
    %c512 = arith.constant 512 : index
    %204 = vector.load %arg5[%c0_52, %c0_53, %c512] : memref<2x32x896xbf16, #tpu.memory_space<vmem>>, vector<1x32x32xbf16>
    %205 = vector.shape_cast %204 : vector<1x32x32xbf16> to vector<32x32xbf16>
    %cst_54 = arith.constant dense<0.000000e+00> : vector<16x32xf32>
    %206 = tpu.matmul %203, %205, %cst_54 {dimension_numbers = #tpu.dot_dimension_numbers<[1], [0], [0], [1], [0, 0, 1, 1], [], []>} : vector<16x32xbf16>, vector<32x32xbf16>, vector<16x32xf32> -> vector<16x32xf32>
    %c10 = arith.constant 10 : index
    %c0_55 = arith.constant 0 : index
    %207 = vector.load %arg6[%c10, %c0_55] : memref<32x128xf32, #tpu.memory_space<vmem>>, vector<1x32xf32>
    %208 = vector.shape_cast %207 : vector<1x32xf32> to vector<32xf32>
    %209 = vector.shape_cast %208 : vector<32xf32> to vector<1x32xf32>
    %210 = vector.broadcast %209 : vector<1x32xf32> to vector<16x32xf32>
    %211 = arith.addf %206, %210 : vector<16x32xf32>
    %212 = arith.addf %106, %211 : vector<16x32xf32>
    %c2 = arith.constant 2 : index
    %c0_56 = arith.constant 0 : index
    %213 = vector.load %arg6[%c2, %c0_56] : memref<32x128xf32, #tpu.memory_space<vmem>>, vector<1x32xf32>
    %214 = vector.shape_cast %213 : vector<1x32xf32> to vector<32xf32>
    %c5 = arith.constant 5 : index
    %c0_57 = arith.constant 0 : index
    %215 = vector.load %arg6[%c5, %c0_57] : memref<32x128xf32, #tpu.memory_space<vmem>>, vector<1x32xf32>
    %216 = vector.shape_cast %215 : vector<1x32xf32> to vector<32xf32>
    %cst_58 = arith.constant dense<0.000000e+00> : vector<16xf32>
    %217 = vector.multi_reduction <add>, %212, %cst_58 [1] : vector<16x32xf32> to vector<16xf32>
    %218 = vector.shape_cast %217 : vector<16xf32> to vector<16x1xf32>
    %219 = arith.mulf %212, %212 : vector<16x32xf32>
    %cst_59 = arith.constant dense<0.000000e+00> : vector<16xf32>
    %220 = vector.multi_reduction <add>, %219, %cst_59 [1] : vector<16x32xf32> to vector<16xf32>
    %221 = vector.shape_cast %220 : vector<16xf32> to vector<16x1xf32>
    %cst_60 = arith.constant 3.125000e-02 : f32
    %222 = vector.broadcast %cst_60 : f32 to vector<16x1xf32>
    %223 = arith.mulf %218, %222 : vector<16x1xf32>
    %224 = arith.mulf %223, %218 : vector<16x1xf32>
    %225 = arith.subf %221, %224 : vector<16x1xf32>
    %cst_61 = arith.constant 0.000000e+00 : f32
    %226 = vector.broadcast %cst_61 : f32 to vector<16x1xf32>
    %227 = arith.maximumf %225, %226 : vector<16x1xf32>
    %cst_62 = arith.constant 0.0322580636 : f32
    %228 = vector.broadcast %cst_62 : f32 to vector<16x1xf32>
    %229 = arith.mulf %227, %228 : vector<16x1xf32>
    %230 = vector.broadcast %223 : vector<16x1xf32> to vector<16x32xf32>
    %231 = arith.subf %212, %230 : vector<16x32xf32>
    %232 = vector.shape_cast %214 : vector<32xf32> to vector<1x32xf32>
    %233 = vector.broadcast %232 : vector<1x32xf32> to vector<16x32xf32>
    %234 = arith.mulf %233, %231 : vector<16x32xf32>
    %235 = math.sqrt %229 : vector<16x1xf32>
    %cst_63 = arith.constant 9.99999997E-7 : f32
    %236 = vector.broadcast %cst_63 : f32 to vector<16x1xf32>
    %237 = arith.addf %235, %236 : vector<16x1xf32>
    %238 = vector.broadcast %237 : vector<16x1xf32> to vector<16x32xf32>
    %239 = arith.divf %234, %238 : vector<16x32xf32>
    %240 = vector.shape_cast %216 : vector<32xf32> to vector<1x32xf32>
    %241 = vector.broadcast %240 : vector<1x32xf32> to vector<16x32xf32>
    %242 = arith.addf %239, %241 : vector<16x32xf32>
    %243 = arith.truncf %242 : vector<16x32xf32> to vector<16x32xbf16>
    %c0_64 = arith.constant 0 : index
    %c0_65 = arith.constant 0 : index
    %c640 = arith.constant 640 : index
    %244 = vector.load %arg5[%c0_64, %c0_65, %c640] : memref<2x32x896xbf16, #tpu.memory_space<vmem>>, vector<1x32x64xbf16>
    %245 = vector.shape_cast %244 : vector<1x32x64xbf16> to vector<32x64xbf16>
    %cst_66 = arith.constant dense<0.000000e+00> : vector<16x64xf32>
    %246 = tpu.matmul %243, %245, %cst_66 {dimension_numbers = #tpu.dot_dimension_numbers<[1], [0], [0], [1], [0, 0, 1, 1], [], []>} : vector<16x32xbf16>, vector<32x64xbf16>, vector<16x64xf32> -> vector<16x64xf32>
    %c11 = arith.constant 11 : index
    %c0_67 = arith.constant 0 : index
    %247 = vector.load %arg6[%c11, %c0_67] : memref<32x128xf32, #tpu.memory_space<vmem>>, vector<1x64xf32>
    %248 = vector.shape_cast %247 : vector<1x64xf32> to vector<64xf32>
    %249 = vector.shape_cast %248 : vector<64xf32> to vector<1x64xf32>
    %250 = vector.broadcast %249 : vector<1x64xf32> to vector<16x64xf32>
    %251 = arith.addf %246, %250 : vector<16x64xf32>
    %cst_68 = arith.constant 0.000000e+00 : f32
    %252 = vector.broadcast %cst_68 : f32 to vector<16x64xf32>
    %253 = arith.maximumf %251, %252 : vector<16x64xf32>
    %254 = arith.truncf %253 : vector<16x64xf32> to vector<16x64xbf16>
    %c0_69 = arith.constant 0 : index
    %c0_70 = arith.constant 0 : index
    %c768 = arith.constant 768 : index
    %255 = vector.load %arg5[%c0_69, %c0_70, %c768] : memref<2x32x896xbf16, #tpu.memory_space<vmem>>, vector<1x32x64xbf16>
    %256 = vector.shape_cast %255 : vector<1x32x64xbf16> to vector<32x64xbf16>
    %cst_71 = arith.constant dense<0.000000e+00> : vector<16x32xf32>
    %257 = tpu.matmul %254, %256, %cst_71 {dimension_numbers = #tpu.dot_dimension_numbers<[1], [1], [0], [0], [0, 0, 1, 0], [], []>} : vector<16x64xbf16>, vector<32x64xbf16>, vector<16x32xf32> -> vector<16x32xf32>
    %c12 = arith.constant 12 : index
    %c0_72 = arith.constant 0 : index
    %258 = vector.load %arg6[%c12, %c0_72] : memref<32x128xf32, #tpu.memory_space<vmem>>, vector<1x32xf32>
    %259 = vector.shape_cast %258 : vector<1x32xf32> to vector<32xf32>
    %260 = vector.shape_cast %259 : vector<32xf32> to vector<1x32xf32>
    %261 = vector.broadcast %260 : vector<1x32xf32> to vector<16x32xf32>
    %262 = arith.addf %257, %261 : vector<16x32xf32>
    %263 = arith.addf %212, %262 : vector<16x32xf32>
    %c13 = arith.constant 13 : index
    %c0_73 = arith.constant 0 : index
    %264 = vector.load %arg6[%c13, %c0_73] : memref<32x128xf32, #tpu.memory_space<vmem>>, vector<1x32xf32>
    %265 = vector.shape_cast %264 : vector<1x32xf32> to vector<32xf32>
    %c16 = arith.constant 16 : index
    %c0_74 = arith.constant 0 : index
    %266 = vector.load %arg6[%c16, %c0_74] : memref<32x128xf32, #tpu.memory_space<vmem>>, vector<1x32xf32>
    %267 = vector.shape_cast %266 : vector<1x32xf32> to vector<32xf32>
    %cst_75 = arith.constant dense<0.000000e+00> : vector<16xf32>
    %268 = vector.multi_reduction <add>, %263, %cst_75 [1] : vector<16x32xf32> to vector<16xf32>
    %269 = vector.shape_cast %268 : vector<16xf32> to vector<16x1xf32>
    %270 = arith.mulf %263, %263 : vector<16x32xf32>
    %cst_76 = arith.constant dense<0.000000e+00> : vector<16xf32>
    %271 = vector.multi_reduction <add>, %270, %cst_76 [1] : vector<16x32xf32> to vector<16xf32>
    %272 = vector.shape_cast %271 : vector<16xf32> to vector<16x1xf32>
    %cst_77 = arith.constant 3.125000e-02 : f32
    %273 = vector.broadcast %cst_77 : f32 to vector<16x1xf32>
    %274 = arith.mulf %269, %273 : vector<16x1xf32>
    %275 = arith.mulf %274, %269 : vector<16x1xf32>
    %276 = arith.subf %272, %275 : vector<16x1xf32>
    %cst_78 = arith.constant 0.000000e+00 : f32
    %277 = vector.broadcast %cst_78 : f32 to vector<16x1xf32>
    %278 = arith.maximumf %276, %277 : vector<16x1xf32>
    %cst_79 = arith.constant 0.0322580636 : f32
    %279 = vector.broadcast %cst_79 : f32 to vector<16x1xf32>
    %280 = arith.mulf %278, %279 : vector<16x1xf32>
    %281 = vector.broadcast %274 : vector<16x1xf32> to vector<16x32xf32>
    %282 = arith.subf %263, %281 : vector<16x32xf32>
    %283 = vector.shape_cast %265 : vector<32xf32> to vector<1x32xf32>
    %284 = vector.broadcast %283 : vector<1x32xf32> to vector<16x32xf32>
    %285 = arith.mulf %284, %282 : vector<16x32xf32>
    %286 = math.sqrt %280 : vector<16x1xf32>
    %cst_80 = arith.constant 9.99999997E-7 : f32
    %287 = vector.broadcast %cst_80 : f32 to vector<16x1xf32>
    %288 = arith.addf %286, %287 : vector<16x1xf32>
    %289 = vector.broadcast %288 : vector<16x1xf32> to vector<16x32xf32>
    %290 = arith.divf %285, %289 : vector<16x32xf32>
    %291 = vector.shape_cast %267 : vector<32xf32> to vector<1x32xf32>
    %292 = vector.broadcast %291 : vector<1x32xf32> to vector<16x32xf32>
    %293 = arith.addf %290, %292 : vector<16x32xf32>
    %294 = arith.truncf %293 : vector<16x32xf32> to vector<16x32xbf16>
    %c1_81 = arith.constant 1 : index
    %c0_82 = arith.constant 0 : index
    %c0_83 = arith.constant 0 : index
    %295 = vector.load %arg5[%c1_81, %c0_82, %c0_83] : memref<2x32x896xbf16, #tpu.memory_space<vmem>>, vector<1x32x96xbf16>
    %296 = vector.shape_cast %295 : vector<1x32x96xbf16> to vector<32x96xbf16>
    %cst_84 = arith.constant dense<0.000000e+00> : vector<16x96xf32>
    %297 = tpu.matmul %294, %296, %cst_84 {dimension_numbers = #tpu.dot_dimension_numbers<[1], [0], [0], [1], [0, 0, 1, 1], [], []>} : vector<16x32xbf16>, vector<32x96xbf16>, vector<16x96xf32> -> vector<16x96xf32>
    %c19 = arith.constant 19 : index
    %c0_85 = arith.constant 0 : index
    %298 = vector.load %arg6[%c19, %c0_85] : memref<32x128xf32, #tpu.memory_space<vmem>>, vector<1x96xf32>
    %299 = vector.shape_cast %298 : vector<1x96xf32> to vector<96xf32>
    %300 = vector.shape_cast %299 : vector<96xf32> to vector<1x96xf32>
    %301 = vector.broadcast %300 : vector<1x96xf32> to vector<16x96xf32>
    %302 = arith.addf %297, %301 : vector<16x96xf32>
    %303 = vector.extract_strided_slice %302 {offsets = [0, 0], sizes = [16, 8], strides = [1, 1]} : vector<16x96xf32> to vector<16x8xf32>
    %304 = vector.shape_cast %303 : vector<16x8xf32> to vector<2x8x8xf32>
    %305 = vector.extract_strided_slice %302 {offsets = [0, 8], sizes = [16, 8], strides = [1, 1]} : vector<16x96xf32> to vector<16x8xf32>
    %306 = vector.shape_cast %305 : vector<16x8xf32> to vector<2x8x8xf32>
    %307 = vector.extract_strided_slice %302 {offsets = [0, 16], sizes = [16, 8], strides = [1, 1]} : vector<16x96xf32> to vector<16x8xf32>
    %308 = vector.shape_cast %307 : vector<16x8xf32> to vector<2x8x8xf32>
    %309 = vector.extract_strided_slice %302 {offsets = [0, 24], sizes = [16, 8], strides = [1, 1]} : vector<16x96xf32> to vector<16x8xf32>
    %310 = vector.shape_cast %309 : vector<16x8xf32> to vector<2x8x8xf32>
    %311 = tpu.concatenate %304, %306, %308, %310 in 0 : vector<2x8x8xf32>, vector<2x8x8xf32>, vector<2x8x8xf32>, vector<2x8x8xf32> -> vector<8x8x8xf32>
    %312 = vector.extract_strided_slice %302 {offsets = [0, 32], sizes = [16, 8], strides = [1, 1]} : vector<16x96xf32> to vector<16x8xf32>
    %313 = vector.shape_cast %312 : vector<16x8xf32> to vector<2x8x8xf32>
    %314 = vector.extract_strided_slice %302 {offsets = [0, 40], sizes = [16, 8], strides = [1, 1]} : vector<16x96xf32> to vector<16x8xf32>
    %315 = vector.shape_cast %314 : vector<16x8xf32> to vector<2x8x8xf32>
    %316 = vector.extract_strided_slice %302 {offsets = [0, 48], sizes = [16, 8], strides = [1, 1]} : vector<16x96xf32> to vector<16x8xf32>
    %317 = vector.shape_cast %316 : vector<16x8xf32> to vector<2x8x8xf32>
    %318 = vector.extract_strided_slice %302 {offsets = [0, 56], sizes = [16, 8], strides = [1, 1]} : vector<16x96xf32> to vector<16x8xf32>
    %319 = vector.shape_cast %318 : vector<16x8xf32> to vector<2x8x8xf32>
    %320 = tpu.concatenate %313, %315, %317, %319 in 0 : vector<2x8x8xf32>, vector<2x8x8xf32>, vector<2x8x8xf32>, vector<2x8x8xf32> -> vector<8x8x8xf32>
    %321 = vector.extract_strided_slice %302 {offsets = [0, 64], sizes = [16, 8], strides = [1, 1]} : vector<16x96xf32> to vector<16x8xf32>
    %322 = vector.shape_cast %321 : vector<16x8xf32> to vector<2x8x8xf32>
    %323 = vector.extract_strided_slice %302 {offsets = [0, 72], sizes = [16, 8], strides = [1, 1]} : vector<16x96xf32> to vector<16x8xf32>
    %324 = vector.shape_cast %323 : vector<16x8xf32> to vector<2x8x8xf32>
    %325 = vector.extract_strided_slice %302 {offsets = [0, 80], sizes = [16, 8], strides = [1, 1]} : vector<16x96xf32> to vector<16x8xf32>
    %326 = vector.shape_cast %325 : vector<16x8xf32> to vector<2x8x8xf32>
    %327 = vector.extract_strided_slice %302 {offsets = [0, 88], sizes = [16, 8], strides = [1, 1]} : vector<16x96xf32> to vector<16x8xf32>
    %328 = vector.shape_cast %327 : vector<16x8xf32> to vector<2x8x8xf32>
    %329 = tpu.concatenate %322, %324, %326, %328 in 0 : vector<2x8x8xf32>, vector<2x8x8xf32>, vector<2x8x8xf32>, vector<2x8x8xf32> -> vector<8x8x8xf32>
    "tpu.trace_start"() <{level = 10 : i32, message = "bqd,bkd->bqk"}> : () -> ()
    %cst_86 = arith.constant dense<0.000000e+00> : vector<8x8x8xf32>
    %330 = tpu.matmul %311, %320, %cst_86 {dimension_numbers = #tpu.dot_dimension_numbers<[2], [2], [1], [1], [0, 0, 0, 1, 1, 1], [0], [0]>} : vector<8x8x8xf32>, vector<8x8x8xf32>, vector<8x8x8xf32> -> vector<8x8x8xf32>
    "tpu.trace_stop"() : () -> ()
    %331 = arith.addf %330, %6 : vector<8x8x8xf32>
    %cst_87 = arith.constant dense<0xFF800000> : vector<8x8xf32>
    %332 = vector.multi_reduction <maximumf>, %331, %cst_87 [2] : vector<8x8x8xf32> to vector<8x8xf32>
    %333 = vector.shape_cast %332 : vector<8x8xf32> to vector<8x8x1xf32>
    %334 = vector.broadcast %333 : vector<8x8x1xf32> to vector<8x8x8xf32>
    %335 = arith.subf %331, %334 : vector<8x8x8xf32>
    %336 = math.exp %335 : vector<8x8x8xf32>
    %cst_88 = arith.constant dense<0.000000e+00> : vector<8x8xf32>
    %337 = vector.multi_reduction <add>, %336, %cst_88 [2] : vector<8x8x8xf32> to vector<8x8xf32>
    %338 = vector.shape_cast %337 : vector<8x8xf32> to vector<8x8x1xf32>
    %339 = tpu.reciprocal %338 {approx = true} : vector<8x8x1xf32> -> vector<8x8x1xf32>
    %340 = vector.broadcast %339 : vector<8x8x1xf32> to vector<8x8x8xf32>
    %341 = arith.mulf %336, %340 : vector<8x8x8xf32>
    "tpu.trace_start"() <{level = 10 : i32, message = "bqk,bkd->bqd"}> : () -> ()
    %cst_89 = arith.constant dense<0.000000e+00> : vector<8x8x8xf32>
    %342 = tpu.matmul %341, %329, %cst_89 {dimension_numbers = #tpu.dot_dimension_numbers<[2], [1], [1], [2], [0, 0, 0, 1, 1, 2], [0], [0]>} : vector<8x8x8xf32>, vector<8x8x8xf32>, vector<8x8x8xf32> -> vector<8x8x8xf32>
    "tpu.trace_stop"() : () -> ()
    %343 = vector.extract_strided_slice %342 {offsets = [0, 0, 0], sizes = [2, 8, 8], strides = [1, 1, 1]} : vector<8x8x8xf32> to vector<2x8x8xf32>
    %344 = vector.shape_cast %343 : vector<2x8x8xf32> to vector<16x8xf32>
    %345 = vector.extract_strided_slice %342 {offsets = [2, 0, 0], sizes = [2, 8, 8], strides = [1, 1, 1]} : vector<8x8x8xf32> to vector<2x8x8xf32>
    %346 = vector.shape_cast %345 : vector<2x8x8xf32> to vector<16x8xf32>
    %347 = vector.extract_strided_slice %342 {offsets = [4, 0, 0], sizes = [2, 8, 8], strides = [1, 1, 1]} : vector<8x8x8xf32> to vector<2x8x8xf32>
    %348 = vector.shape_cast %347 : vector<2x8x8xf32> to vector<16x8xf32>
    %349 = vector.extract_strided_slice %342 {offsets = [6, 0, 0], sizes = [2, 8, 8], strides = [1, 1, 1]} : vector<8x8x8xf32> to vector<2x8x8xf32>
    %350 = vector.shape_cast %349 : vector<2x8x8xf32> to vector<16x8xf32>
    %351 = tpu.concatenate %344, %346, %348, %350 in 1 : vector<16x8xf32>, vector<16x8xf32>, vector<16x8xf32>, vector<16x8xf32> -> vector<16x32xf32>
    %352 = arith.truncf %351 : vector<16x32xf32> to vector<16x32xbf16>
    %c1_90 = arith.constant 1 : index
    %c0_91 = arith.constant 0 : index
    %c128_92 = arith.constant 128 : index
    %353 = vector.load %arg5[%c1_90, %c0_91, %c128_92] : memref<2x32x896xbf16, #tpu.memory_space<vmem>>, vector<1x32x32xbf16>
    %354 = vector.shape_cast %353 : vector<1x32x32xbf16> to vector<32x32xbf16>
    %cst_93 = arith.constant dense<0.000000e+00> : vector<16x32xf32>
    %355 = tpu.matmul %352, %354, %cst_93 {dimension_numbers = #tpu.dot_dimension_numbers<[1], [0], [0], [1], [0, 0, 1, 1], [], []>} : vector<16x32xbf16>, vector<32x32xbf16>, vector<16x32xf32> -> vector<16x32xf32>
    %c20 = arith.constant 20 : index
    %c0_94 = arith.constant 0 : index
    %356 = vector.load %arg6[%c20, %c0_94] : memref<32x128xf32, #tpu.memory_space<vmem>>, vector<1x32xf32>
    %357 = vector.shape_cast %356 : vector<1x32xf32> to vector<32xf32>
    %358 = vector.shape_cast %357 : vector<32xf32> to vector<1x32xf32>
    %359 = vector.broadcast %358 : vector<1x32xf32> to vector<16x32xf32>
    %360 = arith.addf %355, %359 : vector<16x32xf32>
    %361 = arith.addf %263, %360 : vector<16x32xf32>
    %c14 = arith.constant 14 : index
    %c0_95 = arith.constant 0 : index
    %362 = vector.load %arg6[%c14, %c0_95] : memref<32x128xf32, #tpu.memory_space<vmem>>, vector<1x32xf32>
    %363 = vector.shape_cast %362 : vector<1x32xf32> to vector<32xf32>
    %c17 = arith.constant 17 : index
    %c0_96 = arith.constant 0 : index
    %364 = vector.load %arg6[%c17, %c0_96] : memref<32x128xf32, #tpu.memory_space<vmem>>, vector<1x32xf32>
    %365 = vector.shape_cast %364 : vector<1x32xf32> to vector<32xf32>
    %cst_97 = arith.constant dense<0.000000e+00> : vector<16xf32>
    %366 = vector.multi_reduction <add>, %361, %cst_97 [1] : vector<16x32xf32> to vector<16xf32>
    %367 = vector.shape_cast %366 : vector<16xf32> to vector<16x1xf32>
    %368 = arith.mulf %361, %361 : vector<16x32xf32>
    %cst_98 = arith.constant dense<0.000000e+00> : vector<16xf32>
    %369 = vector.multi_reduction <add>, %368, %cst_98 [1] : vector<16x32xf32> to vector<16xf32>
    %370 = vector.shape_cast %369 : vector<16xf32> to vector<16x1xf32>
    %cst_99 = arith.constant 3.125000e-02 : f32
    %371 = vector.broadcast %cst_99 : f32 to vector<16x1xf32>
    %372 = arith.mulf %367, %371 : vector<16x1xf32>
    %373 = arith.mulf %372, %367 : vector<16x1xf32>
    %374 = arith.subf %370, %373 : vector<16x1xf32>
    %cst_100 = arith.constant 0.000000e+00 : f32
    %375 = vector.broadcast %cst_100 : f32 to vector<16x1xf32>
    %376 = arith.maximumf %374, %375 : vector<16x1xf32>
    %cst_101 = arith.constant 0.0322580636 : f32
    %377 = vector.broadcast %cst_101 : f32 to vector<16x1xf32>
    %378 = arith.mulf %376, %377 : vector<16x1xf32>
    %379 = vector.broadcast %372 : vector<16x1xf32> to vector<16x32xf32>
    %380 = arith.subf %361, %379 : vector<16x32xf32>
    %381 = vector.shape_cast %363 : vector<32xf32> to vector<1x32xf32>
    %382 = vector.broadcast %381 : vector<1x32xf32> to vector<16x32xf32>
    %383 = arith.mulf %382, %380 : vector<16x32xf32>
    %384 = math.sqrt %378 : vector<16x1xf32>
    %cst_102 = arith.constant 9.99999997E-7 : f32
    %385 = vector.broadcast %cst_102 : f32 to vector<16x1xf32>
    %386 = arith.addf %384, %385 : vector<16x1xf32>
    %387 = vector.broadcast %386 : vector<16x1xf32> to vector<16x32xf32>
    %388 = arith.divf %383, %387 : vector<16x32xf32>
    %389 = vector.shape_cast %365 : vector<32xf32> to vector<1x32xf32>
    %390 = vector.broadcast %389 : vector<1x32xf32> to vector<16x32xf32>
    %391 = arith.addf %388, %390 : vector<16x32xf32>
    %392 = arith.truncf %391 : vector<16x32xf32> to vector<16x32xbf16>
    %c1_103 = arith.constant 1 : index
    %c0_104 = arith.constant 0 : index
    %c256_105 = arith.constant 256 : index
    %393 = vector.load %arg5[%c1_103, %c0_104, %c256_105] : memref<2x32x896xbf16, #tpu.memory_space<vmem>>, vector<1x32x32xbf16>
    %394 = vector.shape_cast %393 : vector<1x32x32xbf16> to vector<32x32xbf16>
    %cst_106 = arith.constant dense<0.000000e+00> : vector<16x32xf32>
    %395 = tpu.matmul %392, %394, %cst_106 {dimension_numbers = #tpu.dot_dimension_numbers<[1], [0], [0], [1], [0, 0, 1, 1], [], []>} : vector<16x32xbf16>, vector<32x32xbf16>, vector<16x32xf32> -> vector<16x32xf32>
    %c21 = arith.constant 21 : index
    %c0_107 = arith.constant 0 : index
    %396 = vector.load %arg6[%c21, %c0_107] : memref<32x128xf32, #tpu.memory_space<vmem>>, vector<1x32xf32>
    %397 = vector.shape_cast %396 : vector<1x32xf32> to vector<32xf32>
    %398 = vector.shape_cast %397 : vector<32xf32> to vector<1x32xf32>
    %399 = vector.broadcast %398 : vector<1x32xf32> to vector<16x32xf32>
    %400 = arith.addf %395, %399 : vector<16x32xf32>
    %c1_108 = arith.constant 1 : index
    %c0_109 = arith.constant 0 : index
    %c384_110 = arith.constant 384 : index
    %401 = vector.load %arg5[%c1_108, %c0_109, %c384_110] : memref<2x32x896xbf16, #tpu.memory_space<vmem>>, vector<1x32x64xbf16>
    %402 = vector.shape_cast %401 : vector<1x32x64xbf16> to vector<32x64xbf16>
    %cst_111 = arith.constant dense<0.000000e+00> : vector<16x64xf32>
    %403 = tpu.matmul %4, %402, %cst_111 {dimension_numbers = #tpu.dot_dimension_numbers<[1], [0], [0], [1], [0, 0, 1, 1], [], []>} : vector<16x32xbf16>, vector<32x64xbf16>, vector<16x64xf32> -> vector<16x64xf32>
    %c22 = arith.constant 22 : index
    %c0_112 = arith.constant 0 : index
    %404 = vector.load %arg6[%c22, %c0_112] : memref<32x128xf32, #tpu.memory_space<vmem>>, vector<1x64xf32>
    %405 = vector.shape_cast %404 : vector<1x64xf32> to vector<64xf32>
    %406 = vector.shape_cast %405 : vector<64xf32> to vector<1x64xf32>
    %407 = vector.broadcast %406 : vector<1x64xf32> to vector<16x64xf32>
    %408 = arith.addf %403, %407 : vector<16x64xf32>
    %409 = vector.extract_strided_slice %400 {offsets = [0, 0], sizes = [16, 8], strides = [1, 1]} : vector<16x32xf32> to vector<16x8xf32>
    %410 = vector.shape_cast %409 : vector<16x8xf32> to vector<2x8x8xf32>
    %411 = vector.extract_strided_slice %400 {offsets = [0, 8], sizes = [16, 8], strides = [1, 1]} : vector<16x32xf32> to vector<16x8xf32>
    %412 = vector.shape_cast %411 : vector<16x8xf32> to vector<2x8x8xf32>
    %413 = vector.extract_strided_slice %400 {offsets = [0, 16], sizes = [16, 8], strides = [1, 1]} : vector<16x32xf32> to vector<16x8xf32>
    %414 = vector.shape_cast %413 : vector<16x8xf32> to vector<2x8x8xf32>
    %415 = vector.extract_strided_slice %400 {offsets = [0, 24], sizes = [16, 8], strides = [1, 1]} : vector<16x32xf32> to vector<16x8xf32>
    %416 = vector.shape_cast %415 : vector<16x8xf32> to vector<2x8x8xf32>
    %417 = tpu.concatenate %410, %412, %414, %416 in 0 : vector<2x8x8xf32>, vector<2x8x8xf32>, vector<2x8x8xf32>, vector<2x8x8xf32> -> vector<8x8x8xf32>
    %418 = vector.extract_strided_slice %408 {offsets = [0, 0], sizes = [16, 8], strides = [1, 1]} : vector<16x64xf32> to vector<16x8xf32>
    %419 = vector.shape_cast %418 : vector<16x8xf32> to vector<2x8x8xf32>
    %420 = vector.extract_strided_slice %408 {offsets = [0, 8], sizes = [16, 8], strides = [1, 1]} : vector<16x64xf32> to vector<16x8xf32>
    %421 = vector.shape_cast %420 : vector<16x8xf32> to vector<2x8x8xf32>
    %422 = vector.extract_strided_slice %408 {offsets = [0, 16], sizes = [16, 8], strides = [1, 1]} : vector<16x64xf32> to vector<16x8xf32>
    %423 = vector.shape_cast %422 : vector<16x8xf32> to vector<2x8x8xf32>
    %424 = vector.extract_strided_slice %408 {offsets = [0, 24], sizes = [16, 8], strides = [1, 1]} : vector<16x64xf32> to vector<16x8xf32>
    %425 = vector.shape_cast %424 : vector<16x8xf32> to vector<2x8x8xf32>
    %426 = tpu.concatenate %419, %421, %423, %425 in 0 : vector<2x8x8xf32>, vector<2x8x8xf32>, vector<2x8x8xf32>, vector<2x8x8xf32> -> vector<8x8x8xf32>
    %427 = vector.extract_strided_slice %408 {offsets = [0, 32], sizes = [16, 8], strides = [1, 1]} : vector<16x64xf32> to vector<16x8xf32>
    %428 = vector.shape_cast %427 : vector<16x8xf32> to vector<2x8x8xf32>
    %429 = vector.extract_strided_slice %408 {offsets = [0, 40], sizes = [16, 8], strides = [1, 1]} : vector<16x64xf32> to vector<16x8xf32>
    %430 = vector.shape_cast %429 : vector<16x8xf32> to vector<2x8x8xf32>
    %431 = vector.extract_strided_slice %408 {offsets = [0, 48], sizes = [16, 8], strides = [1, 1]} : vector<16x64xf32> to vector<16x8xf32>
    %432 = vector.shape_cast %431 : vector<16x8xf32> to vector<2x8x8xf32>
    %433 = vector.extract_strided_slice %408 {offsets = [0, 56], sizes = [16, 8], strides = [1, 1]} : vector<16x64xf32> to vector<16x8xf32>
    %434 = vector.shape_cast %433 : vector<16x8xf32> to vector<2x8x8xf32>
    %435 = tpu.concatenate %428, %430, %432, %434 in 0 : vector<2x8x8xf32>, vector<2x8x8xf32>, vector<2x8x8xf32>, vector<2x8x8xf32> -> vector<8x8x8xf32>
    "tpu.trace_start"() <{level = 10 : i32, message = "bqd,bkd->bqk"}> : () -> ()
    %cst_113 = arith.constant dense<0.000000e+00> : vector<8x8x8xf32>
    %436 = tpu.matmul %417, %426, %cst_113 {dimension_numbers = #tpu.dot_dimension_numbers<[2], [2], [1], [1], [0, 0, 0, 1, 1, 1], [0], [0]>} : vector<8x8x8xf32>, vector<8x8x8xf32>, vector<8x8x8xf32> -> vector<8x8x8xf32>
    "tpu.trace_stop"() : () -> ()
    %437 = arith.addf %436, %8 : vector<8x8x8xf32>
    %cst_114 = arith.constant dense<0xFF800000> : vector<8x8xf32>
    %438 = vector.multi_reduction <maximumf>, %437, %cst_114 [2] : vector<8x8x8xf32> to vector<8x8xf32>
    %439 = vector.shape_cast %438 : vector<8x8xf32> to vector<8x8x1xf32>
    %440 = vector.broadcast %439 : vector<8x8x1xf32> to vector<8x8x8xf32>
    %441 = arith.subf %437, %440 : vector<8x8x8xf32>
    %442 = math.exp %441 : vector<8x8x8xf32>
    %cst_115 = arith.constant dense<0.000000e+00> : vector<8x8xf32>
    %443 = vector.multi_reduction <add>, %442, %cst_115 [2] : vector<8x8x8xf32> to vector<8x8xf32>
    %444 = vector.shape_cast %443 : vector<8x8xf32> to vector<8x8x1xf32>
    %445 = tpu.reciprocal %444 {approx = true} : vector<8x8x1xf32> -> vector<8x8x1xf32>
    %446 = vector.broadcast %445 : vector<8x8x1xf32> to vector<8x8x8xf32>
    %447 = arith.mulf %442, %446 : vector<8x8x8xf32>
    "tpu.trace_start"() <{level = 10 : i32, message = "bqk,bkd->bqd"}> : () -> ()
    %cst_116 = arith.constant dense<0.000000e+00> : vector<8x8x8xf32>
    %448 = tpu.matmul %447, %435, %cst_116 {dimension_numbers = #tpu.dot_dimension_numbers<[2], [1], [1], [2], [0, 0, 0, 1, 1, 2], [0], [0]>} : vector<8x8x8xf32>, vector<8x8x8xf32>, vector<8x8x8xf32> -> vector<8x8x8xf32>
    "tpu.trace_stop"() : () -> ()
    %449 = vector.extract_strided_slice %448 {offsets = [0, 0, 0], sizes = [2, 8, 8], strides = [1, 1, 1]} : vector<8x8x8xf32> to vector<2x8x8xf32>
    %450 = vector.shape_cast %449 : vector<2x8x8xf32> to vector<16x8xf32>
    %451 = vector.extract_strided_slice %448 {offsets = [2, 0, 0], sizes = [2, 8, 8], strides = [1, 1, 1]} : vector<8x8x8xf32> to vector<2x8x8xf32>
    %452 = vector.shape_cast %451 : vector<2x8x8xf32> to vector<16x8xf32>
    %453 = vector.extract_strided_slice %448 {offsets = [4, 0, 0], sizes = [2, 8, 8], strides = [1, 1, 1]} : vector<8x8x8xf32> to vector<2x8x8xf32>
    %454 = vector.shape_cast %453 : vector<2x8x8xf32> to vector<16x8xf32>
    %455 = vector.extract_strided_slice %448 {offsets = [6, 0, 0], sizes = [2, 8, 8], strides = [1, 1, 1]} : vector<8x8x8xf32> to vector<2x8x8xf32>
    %456 = vector.shape_cast %455 : vector<2x8x8xf32> to vector<16x8xf32>
    %457 = tpu.concatenate %450, %452, %454, %456 in 1 : vector<16x8xf32>, vector<16x8xf32>, vector<16x8xf32>, vector<16x8xf32> -> vector<16x32xf32>
    %458 = arith.truncf %457 : vector<16x32xf32> to vector<16x32xbf16>
    %c1_117 = arith.constant 1 : index
    %c0_118 = arith.constant 0 : index
    %c512_119 = arith.constant 512 : index
    %459 = vector.load %arg5[%c1_117, %c0_118, %c512_119] : memref<2x32x896xbf16, #tpu.memory_space<vmem>>, vector<1x32x32xbf16>
    %460 = vector.shape_cast %459 : vector<1x32x32xbf16> to vector<32x32xbf16>
    %cst_120 = arith.constant dense<0.000000e+00> : vector<16x32xf32>
    %461 = tpu.matmul %458, %460, %cst_120 {dimension_numbers = #tpu.dot_dimension_numbers<[1], [0], [0], [1], [0, 0, 1, 1], [], []>} : vector<16x32xbf16>, vector<32x32xbf16>, vector<16x32xf32> -> vector<16x32xf32>
    %c23 = arith.constant 23 : index
    %c0_121 = arith.constant 0 : index
    %462 = vector.load %arg6[%c23, %c0_121] : memref<32x128xf32, #tpu.memory_space<vmem>>, vector<1x32xf32>
    %463 = vector.shape_cast %462 : vector<1x32xf32> to vector<32xf32>
    %464 = vector.shape_cast %463 : vector<32xf32> to vector<1x32xf32>
    %465 = vector.broadcast %464 : vector<1x32xf32> to vector<16x32xf32>
    %466 = arith.addf %461, %465 : vector<16x32xf32>
    %467 = arith.addf %361, %466 : vector<16x32xf32>
    %c15 = arith.constant 15 : index
    %c0_122 = arith.constant 0 : index
    %468 = vector.load %arg6[%c15, %c0_122] : memref<32x128xf32, #tpu.memory_space<vmem>>, vector<1x32xf32>
    %469 = vector.shape_cast %468 : vector<1x32xf32> to vector<32xf32>
    %c18 = arith.constant 18 : index
    %c0_123 = arith.constant 0 : index
    %470 = vector.load %arg6[%c18, %c0_123] : memref<32x128xf32, #tpu.memory_space<vmem>>, vector<1x32xf32>
    %471 = vector.shape_cast %470 : vector<1x32xf32> to vector<32xf32>
    %cst_124 = arith.constant dense<0.000000e+00> : vector<16xf32>
    %472 = vector.multi_reduction <add>, %467, %cst_124 [1] : vector<16x32xf32> to vector<16xf32>
    %473 = vector.shape_cast %472 : vector<16xf32> to vector<16x1xf32>
    %474 = arith.mulf %467, %467 : vector<16x32xf32>
    %cst_125 = arith.constant dense<0.000000e+00> : vector<16xf32>
    %475 = vector.multi_reduction <add>, %474, %cst_125 [1] : vector<16x32xf32> to vector<16xf32>
    %476 = vector.shape_cast %475 : vector<16xf32> to vector<16x1xf32>
    %cst_126 = arith.constant 3.125000e-02 : f32
    %477 = vector.broadcast %cst_126 : f32 to vector<16x1xf32>
    %478 = arith.mulf %473, %477 : vector<16x1xf32>
    %479 = arith.mulf %478, %473 : vector<16x1xf32>
    %480 = arith.subf %476, %479 : vector<16x1xf32>
    %cst_127 = arith.constant 0.000000e+00 : f32
    %481 = vector.broadcast %cst_127 : f32 to vector<16x1xf32>
    %482 = arith.maximumf %480, %481 : vector<16x1xf32>
    %cst_128 = arith.constant 0.0322580636 : f32
    %483 = vector.broadcast %cst_128 : f32 to vector<16x1xf32>
    %484 = arith.mulf %482, %483 : vector<16x1xf32>
    %485 = vector.broadcast %478 : vector<16x1xf32> to vector<16x32xf32>
    %486 = arith.subf %467, %485 : vector<16x32xf32>
    %487 = vector.shape_cast %469 : vector<32xf32> to vector<1x32xf32>
    %488 = vector.broadcast %487 : vector<1x32xf32> to vector<16x32xf32>
    %489 = arith.mulf %488, %486 : vector<16x32xf32>
    %490 = math.sqrt %484 : vector<16x1xf32>
    %cst_129 = arith.constant 9.99999997E-7 : f32
    %491 = vector.broadcast %cst_129 : f32 to vector<16x1xf32>
    %492 = arith.addf %490, %491 : vector<16x1xf32>
    %493 = vector.broadcast %492 : vector<16x1xf32> to vector<16x32xf32>
    %494 = arith.divf %489, %493 : vector<16x32xf32>
    %495 = vector.shape_cast %471 : vector<32xf32> to vector<1x32xf32>
    %496 = vector.broadcast %495 : vector<1x32xf32> to vector<16x32xf32>
    %497 = arith.addf %494, %496 : vector<16x32xf32>
    %498 = arith.truncf %497 : vector<16x32xf32> to vector<16x32xbf16>
    %c1_130 = arith.constant 1 : index
    %c0_131 = arith.constant 0 : index
    %c640_132 = arith.constant 640 : index
    %499 = vector.load %arg5[%c1_130, %c0_131, %c640_132] : memref<2x32x896xbf16, #tpu.memory_space<vmem>>, vector<1x32x64xbf16>
    %500 = vector.shape_cast %499 : vector<1x32x64xbf16> to vector<32x64xbf16>
    %cst_133 = arith.constant dense<0.000000e+00> : vector<16x64xf32>
    %501 = tpu.matmul %498, %500, %cst_133 {dimension_numbers = #tpu.dot_dimension_numbers<[1], [0], [0], [1], [0, 0, 1, 1], [], []>} : vector<16x32xbf16>, vector<32x64xbf16>, vector<16x64xf32> -> vector<16x64xf32>
    %c24 = arith.constant 24 : index
    %c0_134 = arith.constant 0 : index
    %502 = vector.load %arg6[%c24, %c0_134] : memref<32x128xf32, #tpu.memory_space<vmem>>, vector<1x64xf32>
    %503 = vector.shape_cast %502 : vector<1x64xf32> to vector<64xf32>
    %504 = vector.shape_cast %503 : vector<64xf32> to vector<1x64xf32>
    %505 = vector.broadcast %504 : vector<1x64xf32> to vector<16x64xf32>
    %506 = arith.addf %501, %505 : vector<16x64xf32>
    %cst_135 = arith.constant 0.000000e+00 : f32
    %507 = vector.broadcast %cst_135 : f32 to vector<16x64xf32>
    %508 = arith.maximumf %506, %507 : vector<16x64xf32>
    %509 = arith.truncf %508 : vector<16x64xf32> to vector<16x64xbf16>
    %c1_136 = arith.constant 1 : index
    %c0_137 = arith.constant 0 : index
    %c768_138 = arith.constant 768 : index
    %510 = vector.load %arg5[%c1_136, %c0_137, %c768_138] : memref<2x32x896xbf16, #tpu.memory_space<vmem>>, vector<1x32x64xbf16>
    %511 = vector.shape_cast %510 : vector<1x32x64xbf16> to vector<32x64xbf16>
    %cst_139 = arith.constant dense<0.000000e+00> : vector<16x32xf32>
    %512 = tpu.matmul %509, %511, %cst_139 {dimension_numbers = #tpu.dot_dimension_numbers<[1], [1], [0], [0], [0, 0, 1, 0], [], []>} : vector<16x64xbf16>, vector<32x64xbf16>, vector<16x32xf32> -> vector<16x32xf32>
    %c25 = arith.constant 25 : index
    %c0_140 = arith.constant 0 : index
    %513 = vector.load %arg6[%c25, %c0_140] : memref<32x128xf32, #tpu.memory_space<vmem>>, vector<1x32xf32>
    %514 = vector.shape_cast %513 : vector<1x32xf32> to vector<32xf32>
    %515 = vector.shape_cast %514 : vector<32xf32> to vector<1x32xf32>
    %516 = vector.broadcast %515 : vector<1x32xf32> to vector<16x32xf32>
    %517 = arith.addf %512, %516 : vector<16x32xf32>
    %518 = arith.addf %467, %517 : vector<16x32xf32>
    %c26 = arith.constant 26 : index
    %c0_141 = arith.constant 0 : index
    %519 = vector.load %arg6[%c26, %c0_141] : memref<32x128xf32, #tpu.memory_space<vmem>>, vector<1x32xf32>
    %520 = vector.shape_cast %519 : vector<1x32xf32> to vector<32xf32>
    %c27 = arith.constant 27 : index
    %c0_142 = arith.constant 0 : index
    %521 = vector.load %arg6[%c27, %c0_142] : memref<32x128xf32, #tpu.memory_space<vmem>>, vector<1x32xf32>
    %522 = vector.shape_cast %521 : vector<1x32xf32> to vector<32xf32>
    %cst_143 = arith.constant dense<0.000000e+00> : vector<16xf32>
    %523 = vector.multi_reduction <add>, %518, %cst_143 [1] : vector<16x32xf32> to vector<16xf32>
    %524 = vector.shape_cast %523 : vector<16xf32> to vector<16x1xf32>
    %525 = arith.mulf %518, %518 : vector<16x32xf32>
    %cst_144 = arith.constant dense<0.000000e+00> : vector<16xf32>
    %526 = vector.multi_reduction <add>, %525, %cst_144 [1] : vector<16x32xf32> to vector<16xf32>
    %527 = vector.shape_cast %526 : vector<16xf32> to vector<16x1xf32>
    %cst_145 = arith.constant 3.125000e-02 : f32
    %528 = vector.broadcast %cst_145 : f32 to vector<16x1xf32>
    %529 = arith.mulf %524, %528 : vector<16x1xf32>
    %530 = arith.mulf %529, %524 : vector<16x1xf32>
    %531 = arith.subf %527, %530 : vector<16x1xf32>
    %cst_146 = arith.constant 0.000000e+00 : f32
    %532 = vector.broadcast %cst_146 : f32 to vector<16x1xf32>
    %533 = arith.maximumf %531, %532 : vector<16x1xf32>
    %cst_147 = arith.constant 0.0322580636 : f32
    %534 = vector.broadcast %cst_147 : f32 to vector<16x1xf32>
    %535 = arith.mulf %533, %534 : vector<16x1xf32>
    %536 = vector.broadcast %529 : vector<16x1xf32> to vector<16x32xf32>
    %537 = arith.subf %518, %536 : vector<16x32xf32>
    %538 = vector.shape_cast %520 : vector<32xf32> to vector<1x32xf32>
    %539 = vector.broadcast %538 : vector<1x32xf32> to vector<16x32xf32>
    %540 = arith.mulf %539, %537 : vector<16x32xf32>
    %541 = math.sqrt %535 : vector<16x1xf32>
    %cst_148 = arith.constant 9.99999997E-7 : f32
    %542 = vector.broadcast %cst_148 : f32 to vector<16x1xf32>
    %543 = arith.addf %541, %542 : vector<16x1xf32>
    %544 = vector.broadcast %543 : vector<16x1xf32> to vector<16x32xf32>
    %545 = arith.divf %540, %544 : vector<16x32xf32>
    %546 = vector.shape_cast %522 : vector<32xf32> to vector<1x32xf32>
    %547 = vector.broadcast %546 : vector<1x32xf32> to vector<16x32xf32>
    %548 = arith.addf %545, %547 : vector<16x32xf32>
    %549 = vector.shape_cast %548 : vector<16x32xf32> to vector<2x8x32xf32>
    %c0_149 = arith.constant 0 : index
    %c0_150 = arith.constant 0 : index
    %c0_151 = arith.constant 0 : index
    %550 = vector.load %arg7[%c0_149, %c0_150, %c0_151] : memref<2x8x32xf32, #tpu.memory_space<vmem>>, vector<2x8x32xf32>
    tpu.vector_store %arg7[%c0_149, %c0_150, %c0_151], %549 {strides = array<i32>} : memref<2x8x32xf32, #tpu.memory_space<vmem>>, vector<2x8x32xf32>,
    return
  }
  func.func @transform_0(%arg0: i32) -> (i32, i32, i32) {
    %c0_i32 = arith.constant 0 : i32
    %c0_i32_0 = arith.constant 0 : i32
    %c0_i32_1 = arith.constant 0 : i32
    return %arg0, %c0_i32, %c0_i32_0 : i32, i32, i32
  }
  func.func @transform_1(%arg0: i32) -> (i32, i32, i32) {
    %c0_i32 = arith.constant 0 : i32
    %c0_i32_0 = arith.constant 0 : i32
    %c0_i32_1 = arith.constant 0 : i32
    return %arg0, %c0_i32, %c0_i32_0 : i32, i32, i32
  }
  func.func @transform_2(%arg0: i32) -> (i32, i32, i32) {
    %c0_i32 = arith.constant 0 : i32
    %c0_i32_0 = arith.constant 0 : i32
    %c0_i32_1 = arith.constant 0 : i32
    return %arg0, %c0_i32, %c0_i32_0 : i32, i32, i32
  }
  func.func @transform_3(%arg0: i32) -> (i32, i32, i32) {
    %c0_i32 = arith.constant 0 : i32
    %c0_i32_0 = arith.constant 0 : i32
    %c0_i32_1 = arith.constant 0 : i32
    return %arg0, %c0_i32, %c0_i32_0 : i32, i32, i32
  }
  func.func @transform_4(%arg0: i32) -> (i32, i32, i32) {
    %c0_i32 = arith.constant 0 : i32
    %c0_i32_0 = arith.constant 0 : i32
    %c0_i32_1 = arith.constant 0 : i32
    %c0_i32_2 = arith.constant 0 : i32
    return %c0_i32, %c0_i32_0, %c0_i32_1 : i32, i32, i32
  }
  func.func @transform_5(%arg0: i32) -> (i32, i32) {
    %c0_i32 = arith.constant 0 : i32
    %c0_i32_0 = arith.constant 0 : i32
    %c0_i32_1 = arith.constant 0 : i32
    return %c0_i32, %c0_i32_0 : i32, i32
  }
  func.func @transform_6(%arg0: i32) -> (i32, i32, i32) {
    %c0_i32 = arith.constant 0 : i32
    %c0_i32_0 = arith.constant 0 : i32
    %c0_i32_1 = arith.constant 0 : i32
    return %arg0, %c0_i32, %c0_i32_0 : i32, i32, i32
  }
}

</mosaic_0001>

<bundles_post_ra>
// kernel: tpu_custom_call.1
= control target key start
LH: loop header
LB: loop body
LE: loop exit
PB: predicated region body
PF: predicated region fallthrough
CT: control target
= control target key end

     0   :  { %11 = vsyncpa [#allocation3], 0  ;;  %s9107_s0 = inlined_call_operand.hbm [shape: f32[2,8,32], index: 0, kind: input, shape index: {}]   ;;  %s9108_s1 = inlined_call_operand.hbm [shape: f32[2,8,32], index: 1, kind: input, shape index: {}]   ;;  %s9109_s2 = inlined_call_operand.hbm [shape: f32[2,8,8], index: 2, kind: input, shape index: {}]   ;;  %s9110_s3 = inlined_call_operand.hbm [shape: f32[2,8,8], index: 3, kind: input, shape index: {}]   ;;  %s9111_s4 = inlined_call_operand.hbm [shape: bf16[2,32,896], index: 4, kind: input, shape index: {}]   ;;  %s9112_s5 = inlined_call_operand.hbm [shape: f32[32,128], index: 5, kind: input, shape index: {}]   ;;  %s9113_s6 = inlined_call_operand.hbm [shape: f32[2,8,32], index: 6, kind: output, shape index: {}]  }
   0x1   :  { %12 = vsyncpa [#allocation6], 0 }
   0x2   :  { %13 = vsyncpa [#allocation9], 0 }
   0x3   :  { %14 = vsyncpa [#allocation12], 0 }
   0x4   :  { %15 = vsyncpa [#allocation4], 0  ;;  %s8109_s21 = smov [#allocation5]   ;;  %s8110_s23 = smov [#allocation8]  }
   0x5   :  { %s33_s22 = sshll.u32 %s8109_s21, 4  ;;  %s57_s24 = sshll.u32 %s8110_s23, 4  ;;  %s34_s22 = int_to_ptr.vmem [resolvable:$true] %s33_s22  ;;  %s58_s24 = int_to_ptr.vmem [resolvable:$true] %s57_s24 }
   0x6   :  { %s7967_s25 = scalar_lea.vmem %s34_s22, 256  ;;  %p7972_p1 = scmp.lt.s32.totalorder %s34_s22, %s34_s22 }
   0x7   :  { %p7968_p0 = scmp.ne.s32.totalorder %s34_s22, %s7967_s25  ;;  %p7973_p2 = scmp.lt.s32.totalorder %s7967_s25, %s7967_s25 }
   0x9   :  { %p7974_p3 = por %p7973_p2, %p7972_p1 }
   0xb   :  { %p7975_p4 = pnand %p7974_p3, %p7968_p0 }
   0xd   :  { %7978 = shalt.err (!%p7975_p4)
}
   0xe   :  { %s8111_s26 = smov 128   ;;  %s8112_s27 = smov 8  }
   0xf   :  { %39 = dma.hbm_to_vmem [thread:$0]  %s9108_s1, 256, %s34_s22, [#allocation6], %s8111_s26, %s8111_s26, %s8112_s27  }
  0x10   :  { %s7987_s30 = scalar_lea.vmem %s58_s24, 256  ;;  %p7992_p6 = scmp.lt.s32.totalorder %s58_s24, %s58_s24 }
  0x11   :  { %p7988_p5 = scmp.ne.s32.totalorder %s58_s24, %s7987_s30  ;;  %p7993_p7 = scmp.lt.s32.totalorder %s7987_s30, %s7987_s30 }
  0x13   :  { %p7994_p8 = por %p7993_p7, %p7992_p6 }
  0x15   :  { %p7995_p9 = pnand %p7994_p8, %p7988_p5 }
  0x17   :  { %7998 = shalt.err (!%p7995_p9)
}
  0x18   :  { %63 = dma.hbm_to_vmem [thread:$0]  %s9110_s3, 256, %s58_s24, [#allocation9], %s8111_s26, %s8111_s26, %s8112_s27  }
  0x19   :  { %s8113_s9 = smov [#allocation2]   ;;  %s8114_s11 = smov [#allocation7]  }
  0x1a   :  { %s21_s10 = sshll.u32 %s8113_s9, 4  ;;  %s45_s12 = sshll.u32 %s8114_s11, 4  ;;  %s22_s10 = int_to_ptr.vmem [resolvable:$true] %s21_s10  ;;  %s46_s12 = int_to_ptr.vmem [resolvable:$true] %s45_s12 }
  0x1b   :  { %s8007_s1 = scalar_lea.vmem %s22_s10, 256  ;;  %p8012_p11 = scmp.lt.s32.totalorder %s22_s10, %s22_s10 }
  0x1c   :  { %p8008_p10 = scmp.ne.s32.totalorder %s22_s10, %s8007_s1  ;;  %p8013_p12 = scmp.lt.s32.totalorder %s8007_s1, %s8007_s1 }
  0x1e   :  { %p8014_p13 = por %p8013_p12, %p8012_p11 }
  0x20   :  { %p8015_p0 = pnand %p8014_p13, %p8008_p10 }
  0x22   :  { %8018 = shalt.err (!%p8015_p0)
}
  0x23   :  { %27 = dma.hbm_to_vmem [thread:$0]  %s9107_s0, 256, %s22_s10, [#allocation3], %s8111_s26, %s8111_s26, %s8112_s27  }
  0x24   :  { %s8027_s3 = scalar_lea.vmem %s46_s12, 256  ;;  %p8032_p2 = scmp.lt.s32.totalorder %s46_s12, %s46_s12 }
  0x25   :  { %p8028_p1 = scmp.ne.s32.totalorder %s46_s12, %s8027_s3  ;;  %p8033_p3 = scmp.lt.s32.totalorder %s8027_s3, %s8027_s3 }
  0x27   :  { %p8034_p4 = por %p8033_p3, %p8032_p2 }
  0x29   :  { %p8035_p5 = pnand %p8034_p4, %p8028_p1 }
  0x2b   :  { %8038 = shalt.err (!%p8035_p5)
}
  0x2c   :  { %51 = dma.hbm_to_vmem [thread:$0]  %s9109_s2, 256, %s46_s12, [#allocation6], %s8111_s26, %s8111_s26, %s8112_s27  }
  0x2d   :  { %s8115_s17 = smov [#allocation10]  }
  0x2e   :  { %s69_s18 = sshll.u32 %s8115_s17, 4  ;;  %s70_s18 = int_to_ptr.vmem [resolvable:$true] %s69_s18 }
  0x2f   :  { %s8047_s19 = scalar_lea.vmem %s70_s18, 3584  ;;  %p8052_p7 = scmp.lt.s32.totalorder %s70_s18, %s70_s18 }
  0x30   :  { %p8048_p6 = scmp.ne.s32.totalorder %s70_s18, %s8047_s19  ;;  %p8053_p8 = scmp.lt.s32.totalorder %s8047_s19, %s8047_s19 }
  0x32   :  { %p8054_p9 = por %p8053_p8, %p8052_p7 }
  0x34   :  { %p8055_p10 = pnand %p8054_p9, %p8048_p6 }
  0x36   :  { %8058 = shalt.err (!%p8055_p10)
}
  0x37   :  { %s8116_s0 = smov 448   ;;  %s8117_s20 = smov 28  }
  0x38   :  { %75 = dma.hbm_to_vmem [thread:$0]  %s9111_s4, 3584, %s70_s18, [#allocation9], %s8116_s0, %s8116_s0, %s8117_s20  }
  0x39   :  { %s8118_s23 = smov [#allocation11]  }
  0x3a   :  { %s81_s24 = sshll.u32 %s8118_s23, 4  ;;  %s82_s24 = int_to_ptr.vmem [resolvable:$true] %s81_s24 }
  0x3b   :  { %s8067_s2 = scalar_lea.vmem %s82_s24, 512  ;;  %p8072_p12 = scmp.lt.s32.totalorder %s82_s24, %s82_s24 }
  0x3c   :  { %p8068_p11 = scmp.ne.s32.totalorder %s82_s24, %s8067_s2  ;;  %p8073_p13 = scmp.lt.s32.totalorder %s8067_s2, %s8067_s2 }
  0x3e   :  { %p8074_p0 = por %p8073_p13, %p8072_p12 }
  0x40   :  { %p8075_p1 = pnand %p8074_p0, %p8068_p11 }
  0x42   :  { %8078 = shalt.err (!%p8075_p1)
}
  0x43   :  { %87 = dma.hbm_to_vmem [thread:$0]  %s9112_s5, 512, %s82_s24, [#allocation12], %s8111_s26, %s8111_s26, %s8112_s27  }
  0x44   :  { %8099 = dma.done.wait [#allocation3], 256  }
  0x45   :  { %8100 = vsyncadd [#allocation3], 4294967040 }
  0x46   :  { %8101 = dma.done.wait [#allocation6], 512  }
  0x47   :  { %8102 = vsyncadd [#allocation6], 4294966784 }
  0x48   :  { %8103 = dma.done.wait [#allocation9], 3840  }
  0x49   :  { %8104 = vsyncadd [#allocation9], 4294963456 }
  0x4a   :  { %8105 = dma.done.wait [#allocation12], 512  }
  0x4b   :  { %8106 = vsyncadd [#allocation12], 4294966784  ;;  %vm118_vm0 = vcmask 261120   ;;  %v8197_v0 = vld [vmem:[#allocation2] sm:$0xff]  ;;  %v8199_v1 = vld [vmem:[#allocation2 + $0x8] sm:$0xff]  ;;  %v8119_v9 = vmov 0.0  }
  0x4c   :  { %v119_v2 = vsel %vm118_vm0, %v8197_v0, 0.0  ;;  %v125_v3 = vmul.f32 %v8197_v0, %v8197_v0  ;;  %v122_v4 = vsel %vm118_vm0, %v8199_v1, 0.0  ;;  %v126_v5 = vmul.f32 %v8199_v1, %v8199_v1  ;;  %v7743_v8 = vld [vmem:[#allocation10 + $0x38] ss:$28 sps:$4 sm:$0xff]   ;;  %7231 = vmatprep.subr.bf16.mxu0 %v8119_v9  ;;  %v7744_v10 = vld [vmem:[#allocation10] ss:$28 sps:$4 sm:$0xff]   ;;  %7244 = vmatprep.subr.mxu1 %v8119_v9 }
  0x4d   :  { %120 = vadd.xlane.f32.xlu0 %v119_v2  ;;  %vm8120_vm1 = vmmov 0   ;;  %7232 = vmatpush3.bf16.msra.mxu0 %v7743_v8  ;;  %v6895_v38 = vld [vmem:[#allocation11] ss:$0 sm:$0xff]  ;;  %v6896_v45 = vld [vmem:[#allocation11 + $0x3] ss:$0 sm:$0xff]  ;;  %s8121_s4 = smov 112  }
  0x4e   :  { %v127_v6 = vsel %vm118_vm0, %v125_v3, 0.0  ;;  %v130_v7 = vsel %vm118_vm0, %v126_v5, 0.0  ;;  %7235 = vmatprep.mubr.msk.bf16.mxu0 %vm8120_vm1, %v8119_v9  ;;  %7233 = vmatprep.subr.bf16.mxu0 %v8119_v9  ;;  %v6897_v50 = vld [vmem:[#allocation11 + $0x6] ss:$0 sm:$0xff]  ;;  %s8122_s5 = smov 120   ;;  %s8123_s29 = smov 104  }
  0x4f   :  { %128 = vadd.xlane.f32.xlu1 %v127_v6  ;;  %7246 = vmatprep.mubr.msk.f32.mxu1 %vm8120_vm1, %v8119_v9  ;;  %s8124_s30 = smov 96   ;;  %vm259_vm6 = vcmask 64512   ;;  %s8125_s7 = smov 64   ;;  %vm1588_vm7 = vcmask 130048   ;;  %vm1591_vm8 = vcmask 195584   ;;  %vm3415_vm13 = vcmask 523264  }
  0x50   :  { %s8126_s8 = smov 16   ;;  %s8127_s9 = smov 24  }
  0x51   :  { %123 = vadd.xlane.f32.xlu0 %v122_v4  ;;  %7234 = vmatpush3.bf16.msra.mxu0 %v7744_v10  ;;  %v112_v10 = vld [vmem:[#allocation8] sm:$0xff]  ;;  %s8128_s10 = smov [#allocation13]  }
  0x52   :  { %7239 = vmatprep.subr.mxu0 %v8119_v9  ;;  %s6880_s11 = sshll.u32 %s8128_s10, 4  ;;  %s6881_s11 = int_to_ptr.vmem [resolvable:$true] %s6880_s11 }
  0x53   :  { %131 = vadd.xlane.f32.xlu1 %v130_v7  ;;  %s8079_s12 = scalar_lea.vmem %s6881_s11, 256  ;;  %p8084_p3 = scmp.lt.s32.totalorder %s6881_s11, %s6881_s11 }
  0x54   :  { %p8080_p2 = scmp.ne.s32.totalorder %s6881_s11, %s8079_s12  ;;  %p8085_p4 = scmp.lt.s32.totalorder %s8079_s12, %s8079_s12 }
  0x56   :  { %p8086_p5 = por %p8085_p4, %p8084_p3 }
  0x58   :  { %p8087_p6 = pnand %p8086_p5, %p8080_p2 }
  0xd6   :  { %v121_v11 = vpop.xlane.xlu0 %120 }
  0xd7   :  { %v133_v12 = vmul.f32 0.03125, %v121_v11 }
  0xd8   :  { %v129_v13 = vpop.xlane.xlu1 %128 }
  0xd9   :  { %v135_v14 = vmul.f32 %v133_v12, %v121_v11  ;;  %v143_v37 = vsub.f32 %v8197_v0, %v133_v12 }
  0xda   :  { %v124_v15 = vpop.xlane.xlu0 %123 }
  0xdb   :  { %v137_v16 = vsub.f32 %v129_v13, %v135_v14  ;;  %v134_v17 = vmul.f32 0.03125, %v124_v15  ;;  %v149_v41 = vmul.f32 %v6895_v38, %v143_v37 }
  0xdc   :  { %v132_v18 = vpop.xlane.xlu1 %131 }
  0xdd   :  { %v139_v19 = vmax.f32 %v137_v16, 0.0  ;;  %v136_v20 = vmul.f32 %v134_v17, %v124_v15  ;;  %v144_v39 = vsub.f32 %v8199_v1, %v134_v17  ;;  %v113_v15 = vld [vmem:[#allocation8 + $0x8] sm:$0xff] }
  0xdf   :  { %v141_v21 = vmul.f32 0.032258064, %v139_v19  ;;  %v138_v22 = vsub.f32 %v132_v18, %v136_v20  ;;  %v150_v42 = vmul.f32 %v6895_v38, %v144_v39 }
  0xe1   :  { %7771 = vrsqrt.f32 %v141_v21  ;;  %v140_v23 = vmax.f32 %v138_v22, 0.0  ;;  %vm153_vm2 = vcmp.eq.f32.partialorder %v141_v21, inf  ;;  %v156_v27 = vand.u32 2147483648, %v141_v21 }
  0xe2   :  { %vm155_vm3 = vcmp.eq.f32.partialorder %v141_v21, 0.0 }
  0xe3   :  { %v142_v24 = vmul.f32 0.032258064, %v140_v23 }
  0xe5   :  { %7773 = vrsqrt.f32 %v142_v24  ;;  %vm160_vm4 = vcmp.eq.f32.partialorder %v142_v24, inf  ;;  %v163_v33 = vand.u32 2147483648, %v142_v24  ;;  %vm162_vm5 = vcmp.eq.f32.partialorder %v142_v24, 0.0 }
  0xee   :  { %v7772_v25 = vpop.eup %7771 }
  0xef   :  { %v152_v26 = vmul.f32 %v7772_v25, %v141_v21 }
  0xf1   :  { %v154_v28 = vsel %vm153_vm2, %v141_v21, %v152_v26 }
  0xf2   :  { %v157_v29 = vsel %vm155_vm3, %v156_v27, %v154_v28  ;;  %v7774_v30 = vpop.eup %7773 }
  0xf3   :  { %v165_v31 = vadd.f32 1e-06, %v157_v29  ;;  %v159_v32 = vmul.f32 %v7774_v30, %v142_v24 }
  0xf5   :  { %7775 = vrcp.f32 %v165_v31  ;;  %v161_v34 = vsel %vm160_vm4, %v142_v24, %v159_v32 }
  0xf6   :  { %v164_v35 = vsel %vm162_vm5, %v163_v33, %v161_v34 }
  0xf7   :  { %v166_v36 = vadd.f32 1e-06, %v164_v35 }
  0xf9   :  { %7777 = vrcp.f32 %v166_v36 }
 0x102   :  { %v7776_v40 = vpop.eup %7775 }
 0x103   :  { %v168_v43 = vmul.f32 %v7776_v40, %v149_v41 }
 0x105   :  { %v175_v47 = vadd.f32 %v6896_v45, %v168_v43 }
 0x106   :  { %v7778_v44 = vpop.eup %7777 }
 0x107   :  { %v170_v46 = vmul.f32 %v7778_v44, %v150_v42 }
 0x109   :  { %v176_v48 = vadd.f32 %v6896_v45, %v170_v46 }
 0x10b   :  { %v177_v49 = vpack.c.bf16 %v176_v48, %v175_v47 }
 0x10d   :  { %7236 = vmatmul.mubr.msk.bf16.vlgmr.msra.gmra.mxu0 %vm118_vm0, %v177_v49 }
 0x10e   :  { %7241 = vmatprep.mubr.msk.f32.mxu0 %vm8120_vm1, %v8119_v9 }
 0x1cd   :  { %v236_v51 = vpop.f32.mrf.mxu0 }
 0x1ce   :  { %v8224_v52 = vadd.f32 %v6897_v50, %v236_v51 }
 0x1cf   :  { %v7237_v53 = vpop.f32.mrf.mxu0 }
 0x1d0   :  { %249 = vrot.lane.b32.xlu1 %v8224_v52, %s8121_s4  ;;  %245 = vrot.lane.b32.xlu0 %v8224_v52, %s8122_s5 }
 0x1d1   :  { %v239_v54 = vpop.f32.mrf.mxu0 }
 0x1d2   :  { %v8230_v55 = vadd.f32 %v6897_v50, %v239_v54 }
 0x1d3   :  { %v7238_v56 = vpop.f32.mrf.mxu0 }
 0x1d4   :  { %253 = vrot.lane.b32.xlu0 %v8224_v52, %s8123_s29  ;;  %247 = vrot.lane.b32.xlu1 %v8230_v55, %s8122_s5 }
 0x1d8   :  { %257 = vrot.lane.b32.xlu0 %v8224_v52, %s8124_s30  ;;  %251 = vrot.lane.b32.xlu1 %v8230_v55, %s8121_s4 }
 0x1dc   :  { %255 = vrot.lane.b32.xlu1 %v8230_v55, %s8123_s29 }
 0x1e0   :  { %334 = vrot.lane.b32.xlu1 %v8230_v55, %s8124_s30 }
 0x242   :  { %v8244_v57 = vpop.permute.xlu1 %249  ;;  %v8246_v58 = vpop.permute.xlu0 %245 }
 0x243   :  { %410 = vrot.lane.b32.xlu0 %v8246_v58, %s8124_s30 }
 0x246   :  { %v8250_v59 = vpop.permute.xlu0 %253  ;;  %v8252_v60 = vpop.permute.xlu1 %247 }
 0x247   :  { %562 = vrot.lane.b32.xlu0 %v8244_v57, %s8124_s30  ;;  %486 = vrot.lane.b32.xlu1 %v8252_v60, %s8124_s30 }
 0x24a   :  { %v258_v61 = vpop.permute.xlu0 %257  ;;  %v8258_v62 = vpop.permute.xlu1 %251 }
 0x24b   :  { %714 = vrot.lane.b32.xlu0 %v8250_v59, %s8124_s30  ;;  %7240 = vmatpush3.xpose.msk.msra.mxu0 %vm259_vm6, %v258_v61 }
 0x24c   :  { %638 = vrot.lane.b32.xlu1 %v8258_v62, %s8124_s30  ;;  %7254 = vmatprep.subr.mxu0 %v8119_v9 }
 0x24e   :  { %7242 = vmatmul.mubr.msk.f32.vlgmr.msra.gmra.mxu0 %vm259_vm6, %v8224_v52  ;;  %v8268_v63 = vpop.permute.xlu1 %255 }
 0x24f   :  { %7256 = vmatprep.mubr.msk.f32.mxu0 %vm8120_vm1, %v8119_v9 }
 0x250   :  { %790 = vrot.lane.b32.xlu1 %v8268_v63, %s8124_s30 }
 0x252   :  { %v335_v2 = vpop.permute.xlu1 %334 }
 0x253   :  { %7245 = vmatpush3.xpose.msk.msra.mxu1 %vm259_vm6, %v335_v2 }
 0x254   :  { %7249 = vmatprep.subr.mxu1 %v8119_v9 }
 0x256   :  { %7247 = vmatmul.mubr.msk.f32.vlgmr.msra.gmra.mxu1 %vm259_vm6, %v8230_v55 }
 0x257   :  { %7251 = vmatprep.mubr.msk.f32.mxu1 %vm8120_vm1, %v8119_v9 }
 0x2b5   :  { %v411_v3 = vpop.permute.xlu0 %410 }
 0x2b6   :  { %7250 = vmatpush3.xpose.msk.msra.mxu1 %vm259_vm6, %v411_v3 }
 0x2b7   :  { %7259 = vmatprep.subr.mxu1 %v8119_v9 }
 0x2b9   :  { %v563_v4 = vpop.permute.xlu0 %562  ;;  %7252 = vmatmul.mubr.msk.f32.vlgmr.msra.gmra.mxu1 %vm259_vm6, %v8246_v58  ;;  %v487_v5 = vpop.permute.xlu1 %486 }
 0x2ba   :  { %7255 = vmatpush3.xpose.msk.msra.mxu0 %vm259_vm6, %v487_v5  ;;  %7260 = vmatpush3.xpose.msk.msra.mxu1 %vm259_vm6, %v563_v4 }
 0x2bb   :  { %7261 = vmatprep.mubr.msk.f32.mxu1 %vm8120_vm1, %v8119_v9  ;;  %7264 = vmatprep.subr.mxu0 %v8119_v9 }
 0x2bc   :  { %7269 = vmatprep.subr.mxu1 %v8119_v9 }
 0x2bd   :  { %v715_v6 = vpop.permute.xlu0 %714  ;;  %7257 = vmatmul.mubr.msk.f32.vlgmr.msra.gmra.mxu0 %vm259_vm6, %v8252_v60  ;;  %7262 = vmatmul.mubr.msk.f32.vlgmr.msra.gmra.mxu1 %vm259_vm6, %v8244_v57 }
 0x2be   :  { %v639_v7 = vpop.permute.xlu1 %638  ;;  %7270 = vmatpush3.xpose.msk.msra.mxu1 %vm259_vm6, %v715_v6  ;;  %7266 = vmatprep.mubr.msk.f32.mxu0 %vm8120_vm1, %v8119_v9 }
 0x2bf   :  { %7265 = vmatpush3.xpose.msk.msra.mxu0 %vm259_vm6, %v639_v7  ;;  %7271 = vmatprep.mubr.msk.f32.mxu1 %vm8120_vm1, %v8119_v9 }
 0x2c0   :  { %7274 = vmatprep.subr.mxu0 %v8119_v9  ;;  %7279 = vmatprep.subr.mxu1 %v8119_v9 }
 0x2c1   :  { %7272 = vmatmul.mubr.msk.f32.vlgmr.msra.gmra.mxu1 %vm259_vm6, %v8250_v59 }
 0x2c2   :  { %7267 = vmatmul.mubr.msk.f32.vlgmr.msra.gmra.mxu0 %vm259_vm6, %v8258_v62  ;;  %v791_v8 = vpop.permute.xlu1 %790  ;;  %7281 = vmatprep.mubr.msk.f32.mxu1 %vm8120_vm1, %v8119_v9 }
 0x2c3   :  { %7275 = vmatpush3.xpose.msk.msra.mxu0 %vm259_vm6, %v791_v8  ;;  %7276 = vmatprep.mubr.msk.f32.mxu0 %vm8120_vm1, %v8119_v9 }
 0x2c4   :  { %7284 = vmatprep.subr.mxu0 %v8119_v9 }
 0x2c6   :  { %7277 = vmatmul.mubr.msk.f32.vlgmr.msra.gmra.mxu0 %vm259_vm6, %v8268_v63 }
 0x2c7   :  { %7286 = vmatprep.mubr.msk.f32.mxu0 %vm8120_vm1, %v8119_v9 }
 0x30e   :  { %v330_v11 = vpop.f32.mrf.mxu0 }
 0x30f   :  { %v331_v12 = vadd.f32 %v330_v11, %v112_v10 }
 0x310   :  { %v7243_v13 = vpop.f32.mrf.mxu0 }
 0x311   :  { %v866_v14 = vsel %vm259_vm6, %v331_v12, -inf }
 0x312   :  { %867 = vmax.xlane.f32.xlu0 %v866_v14 }
 0x316   :  { %v406_v16 = vpop.f32.mrf.mxu1 }
 0x317   :  { %v407_v17 = vadd.f32 %v406_v16, %v113_v15 }
 0x318   :  { %v7248_v18 = vpop.f32.mrf.mxu1 }
 0x319   :  { %v869_v19 = vsel %vm259_vm6, %v407_v17, -inf }
 0x31a   :  { %870 = vmax.xlane.f32.xlu1 %v869_v19 }
 0x379   :  { %v482_v20 = vpop.f32.mrf.mxu1 }
 0x37a   :  { %v483_v21 = vadd.f32 %v482_v20, %v112_v10 }
 0x37b   :  { %v7253_v22 = vpop.f32.mrf.mxu1 }
 0x37c   :  { %v872_v23 = vsel %vm259_vm6, %v483_v21, -inf }
 0x37d   :  { %v634_v24 = vpop.f32.mrf.mxu1  ;;  %873 = vmax.xlane.f32.xlu0 %v872_v23  ;;  %v558_v25 = vpop.f32.mrf.mxu0 }
 0x37e   :  { %v559_v26 = vadd.f32 %v558_v25, %v113_v15  ;;  %v635_v29 = vadd.f32 %v634_v24, %v112_v10 }
 0x37f   :  { %v7258_v27 = vpop.f32.mrf.mxu0  ;;  %v7263_v28 = vpop.f32.mrf.mxu1 }
 0x380   :  { %v875_v30 = vsel %vm259_vm6, %v559_v26, -inf  ;;  %v878_v37 = vsel %vm259_vm6, %v635_v29, -inf }
 0x381   :  { %v786_v31 = vpop.f32.mrf.mxu1  ;;  %876 = vmax.xlane.f32.xlu0 %v875_v30 }
 0x382   :  { %v710_v32 = vpop.f32.mrf.mxu0  ;;  %v787_v35 = vadd.f32 %v786_v31, %v112_v10 }
 0x383   :  { %v711_v33 = vadd.f32 %v710_v32, %v113_v15  ;;  %v7273_v34 = vpop.f32.mrf.mxu1 }
 0x384   :  { %v7268_v36 = vpop.f32.mrf.mxu0  ;;  %v884_v42 = vsel %vm259_vm6, %v787_v35, -inf }
 0x385   :  { %879 = vmax.xlane.f32.xlu0 %v878_v37  ;;  %v881_v38 = vsel %vm259_vm6, %v711_v33, -inf }
 0x386   :  { %882 = vmax.xlane.f32.xlu1 %v881_v38  ;;  %v862_v39 = vpop.f32.mrf.mxu0 }
 0x387   :  { %v863_v40 = vadd.f32 %v862_v39, %v113_v15 }
 0x388   :  { %v7278_v41 = vpop.f32.mrf.mxu0 }
 0x389   :  { %885 = vmax.xlane.f32.xlu0 %v884_v42  ;;  %v887_v43 = vsel %vm259_vm6, %v863_v40, -inf }
 0x38a   :  { %888 = vmax.xlane.f32.xlu1 %v887_v43 }
 0x39b   :  { %1030 = vrot.lane.b32.xlu1 %v8230_v55, %s8125_s7  ;;  %v868_v44 = vpop.xlane.xlu0 %867 }
 0x39c   :  { %v890_v45 = vsub.f32 %v331_v12, %v868_v44 }
 0x39e   :  { %v898_v46 = vmul.f32 1.442695, %v890_v45 }
 0x39f   :  { %1106 = vrot.lane.b32.xlu1 %v8246_v58, %s8125_s7  ;;  %954 = vrot.lane.b32.xlu0 %v8224_v52, %s8125_s7 }
 0x3a0   :  { %7779 = vpow2.f32 %v898_v46 }
 0x3a3   :  { %1182 = vrot.lane.b32.xlu1 %v8252_v60, %s8125_s7  ;;  %1258 = vrot.lane.b32.xlu0 %v8244_v57, %s8125_s7  ;;  %v871_v47 = vpop.xlane.xlu1 %870 }
 0x3a4   :  { %v891_v48 = vsub.f32 %v407_v17, %v871_v47 }
 0x3a6   :  { %v900_v49 = vmul.f32 1.442695, %v891_v48 }
 0x3a7   :  { %1334 = vrot.lane.b32.xlu1 %v8258_v62, %s8125_s7 }
 0x3a8   :  { %7781 = vpow2.f32 %v900_v49 }
 0x3ad   :  { %v8336_v50 = vpop.eup %7779 }
 0x3ae   :  { %v914_v51 = vsel %vm259_vm6, %v8336_v50, 0.0 }
 0x3b5   :  { %v8340_v52 = vpop.eup %7781 }
 0x3b6   :  { %v917_v53 = vsel %vm259_vm6, %v8340_v52, 0.0 }
 0x3c2   :  { %915 = vadd.xlane.f32.xlu0 %v914_v51 }
 0x3cb   :  { %918 = vadd.xlane.f32.xlu1 %v917_v53 }
 0x406   :  { %v874_v54 = vpop.xlane.xlu0 %873 }
 0x407   :  { %v892_v55 = vsub.f32 %v483_v21, %v874_v54 }
 0x409   :  { %v902_v56 = vmul.f32 1.442695, %v892_v55 }
 0x40a   :  { %v877_v57 = vpop.xlane.xlu0 %876 }
 0x40b   :  { %7783 = vpow2.f32 %v902_v56  ;;  %v893_v58 = vsub.f32 %v559_v26, %v877_v57 }
 0x40d   :  { %v904_v60 = vmul.f32 1.442695, %v893_v58 }
 0x40e   :  { %v880_v61 = vpop.xlane.xlu0 %879 }
 0x40f   :  { %7785 = vpow2.f32 %v904_v60  ;;  %v894_v62 = vsub.f32 %v635_v29, %v880_v61  ;;  %v883_v2 = vpop.xlane.xlu1 %882  ;;  %v7745_v61 = vld [vmem:[#allocation10 + $0x3c] ss:$28 sps:$4 sm:$0xff]  }
 0x410   :  { %v895_v3 = vsub.f32 %v711_v33, %v883_v2 }
 0x411   :  { %v906_v4 = vmul.f32 1.442695, %v894_v62 }
 0x412   :  { %v908_v5 = vmul.f32 1.442695, %v895_v3  ;;  %v886_v6 = vpop.xlane.xlu0 %885  ;;  %v7746_v3 = vld [vmem:[#allocation10 + $0x4] ss:$28 sps:$4 sm:$0xff]  }
 0x413   :  { %7787 = vpow2.f32 %v906_v4  ;;  %v896_v7 = vsub.f32 %v787_v35, %v886_v6  ;;  %v889_v8 = vpop.xlane.xlu1 %888 }
 0x414   :  { %7789 = vpow2.f32 %v908_v5  ;;  %v897_v10 = vsub.f32 %v863_v40, %v889_v8 }
 0x415   :  { %v910_v11 = vmul.f32 1.442695, %v896_v7 }
 0x416   :  { %v912_v12 = vmul.f32 1.442695, %v897_v10  ;;  %v955_v13 = vpop.permute.xlu0 %954 }
 0x417   :  { %7791 = vpow2.f32 %v910_v11  ;;  %v1031_v14 = vpop.permute.xlu1 %1030  ;;  %7280 = vmatpush3.msra.mxu1 %v955_v13 }
 0x418   :  { %v7784_v15 = vpop.eup %7783  ;;  %7793 = vpow2.f32 %v912_v12  ;;  %7285 = vmatpush3.msra.mxu0 %v1031_v14  ;;  %7289 = vmatprep.subr.mxu1 %v8119_v9 }
 0x419   :  { %v920_v16 = vsel %vm259_vm6, %v7784_v15, 0.0  ;;  %7294 = vmatprep.subr.mxu0 %v8119_v9 }
 0x41a   :  { %921 = vadd.xlane.f32.xlu0 %v920_v16  ;;  %v1259_v28 = vpop.permute.xlu0 %1258 }
 0x41b   :  { %v1107_v27 = vpop.permute.xlu1 %1106 }
 0x41c   :  { %v7786_v17 = vpop.eup %7785 }
 0x41d   :  { %v923_v18 = vsel %vm259_vm6, %v7786_v17, 0.0 }
 0x41e   :  { %924 = vadd.xlane.f32.xlu1 %v923_v18 }
 0x41f   :  { %v1183_v29 = vpop.permute.xlu1 %1182 }
 0x420   :  { %v7788_v19 = vpop.eup %7787 }
 0x421   :  { %v7790_v20 = vpop.eup %7789  ;;  %v926_v21 = vsel %vm259_vm6, %v7788_v19, 0.0 }
 0x422   :  { %927 = vadd.xlane.f32.xlu0 %v926_v21  ;;  %v929_v22 = vsel %vm259_vm6, %v7790_v20, 0.0 }
 0x423   :  { %930 = vadd.xlane.f32.xlu1 %v929_v22  ;;  %v1335_v31 = vpop.permute.xlu1 %1334 }
 0x424   :  { %v8350_v23 = vpop.eup %7791 }
 0x425   :  { %v8352_v24 = vpop.eup %7793  ;;  %v932_v25 = vsel %vm259_vm6, %v8350_v23, 0.0 }
 0x426   :  { %933 = vadd.xlane.f32.xlu0 %v932_v25  ;;  %v935_v26 = vsel %vm259_vm6, %v8352_v24, 0.0 }
 0x427   :  { %936 = vadd.xlane.f32.xlu1 %v935_v26 }
 0x438   :  { %1486 = vrot.lane.b32.xlu1 %v8268_v63, %s8125_s7 }
 0x43c   :  { %1410 = vrot.lane.b32.xlu0 %v8250_v59, %s8125_s7 }
 0x44b   :  { %v916_v30 = vpop.xlane.xlu0 %915 }
 0x44c   :  { %7795 = vrcp.f32 %v916_v30 }
 0x454   :  { %v919_v32 = vpop.xlane.xlu1 %918 }
 0x455   :  { %7797 = vrcp.f32 %v919_v32 }
 0x459   :  { %v7796_v33 = vpop.eup %7795 }
 0x45a   :  { %v946_v34 = vmul.f32 %v7796_v33, %v8336_v50  ;;  %v6925_v33 = vld [vmem:[#allocation11 + $0x7] ss:$0 sm:$0xff] }
 0x45c   :  { %7282 = vmatmul.mubr.msk.f32.vlgmr.msra.gmra.mxu1 %vm259_vm6, %v946_v34 }
 0x45d   :  { %7290 = vmatpush3.msra.mxu1 %v1107_v27  ;;  %7291 = vmatprep.mubr.msk.f32.mxu1 %vm8120_vm1, %v8119_v9 }
 0x45e   :  { %7299 = vmatprep.subr.mxu1 %v8119_v9 }
 0x462   :  { %v7798_v59 = vpop.eup %7797 }
 0x463   :  { %v947_v63 = vmul.f32 %v7798_v59, %v8340_v52 }
 0x465   :  { %7287 = vmatmul.mubr.msk.f32.vlgmr.msra.gmra.mxu0 %vm259_vm6, %v947_v63 }
 0x466   :  { %7295 = vmatpush3.msra.mxu0 %v1183_v29  ;;  %7296 = vmatprep.mubr.msk.f32.mxu0 %vm8120_vm1, %v8119_v9 }
 0x467   :  { %7304 = vmatprep.subr.mxu0 %v8119_v9 }
 0x4a3   :  { %v922_v35 = vpop.xlane.xlu0 %921 }
 0x4a4   :  { %7799 = vrcp.f32 %v922_v35 }
 0x4a7   :  { %v925_v36 = vpop.xlane.xlu1 %924 }
 0x4a8   :  { %7801 = vrcp.f32 %v925_v36 }
 0x4ab   :  { %v928_v37 = vpop.xlane.xlu0 %927 }
 0x4ac   :  { %7803 = vrcp.f32 %v928_v37  ;;  %v931_v38 = vpop.xlane.xlu1 %930 }
 0x4ad   :  { %7805 = vrcp.f32 %v931_v38 }
 0x4af   :  { %v934_v39 = vpop.xlane.xlu0 %933 }
 0x4b0   :  { %7807 = vrcp.f32 %v934_v39  ;;  %v937_v40 = vpop.xlane.xlu1 %936 }
 0x4b1   :  { %v7800_v41 = vpop.eup %7799  ;;  %7809 = vrcp.f32 %v937_v40 }
 0x4b2   :  { %v948_v42 = vmul.f32 %v7800_v41, %v7784_v15 }
 0x4b3   :  { %v1411_v49 = vpop.permute.xlu0 %1410 }
 0x4b4   :  { %7292 = vmatmul.mubr.msk.f32.vlgmr.msra.gmra.mxu1 %vm259_vm6, %v948_v42  ;;  %v1487_v51 = vpop.permute.xlu1 %1486 }
 0x4b5   :  { %v7802_v43 = vpop.eup %7801  ;;  %7300 = vmatpush3.msra.mxu1 %v1259_v28  ;;  %7301 = vmatprep.mubr.msk.f32.mxu1 %vm8120_vm1, %v8119_v9 }
 0x4b6   :  { %v949_v44 = vmul.f32 %v7802_v43, %v7786_v17  ;;  %7309 = vmatprep.subr.mxu1 %v8119_v9 }
 0x4b8   :  { %7297 = vmatmul.mubr.msk.f32.vlgmr.msra.gmra.mxu0 %vm259_vm6, %v949_v44 }
 0x4b9   :  { %v7804_v45 = vpop.eup %7803  ;;  %7305 = vmatpush3.msra.mxu0 %v1335_v31  ;;  %7306 = vmatprep.mubr.msk.f32.mxu0 %vm8120_vm1, %v8119_v9 }
 0x4ba   :  { %v7806_v46 = vpop.eup %7805  ;;  %7314 = vmatprep.subr.mxu0 %v8119_v9  ;;  %v950_v47 = vmul.f32 %v7804_v45, %v7788_v19  ;;  %v7747_v45 = vld [vmem:[#allocation10 + $0x44] ss:$28 sps:$4 sm:$0xff]  }
 0x4bb   :  { %v951_v48 = vmul.f32 %v7806_v46, %v7790_v20  ;;  %v7748_v46 = vld [vmem:[#allocation10 + $0xc] ss:$28 sps:$4 sm:$0xff]  }
 0x4bc   :  { %7302 = vmatmul.mubr.msk.f32.vlgmr.msra.gmra.mxu1 %vm259_vm6, %v950_v47  ;;  %v110_v47 = vld [vmem:[#allocation5 + $0x8] sm:$0xff] }
 0x4bd   :  { %v7808_v50 = vpop.eup %7807  ;;  %7307 = vmatmul.mubr.msk.f32.vlgmr.msra.gmra.mxu0 %vm259_vm6, %v951_v48  ;;  %7310 = vmatpush3.msra.mxu1 %v1411_v49  ;;  %v7749_v49 = vld [vmem:[#allocation10 + $0x40] ss:$28 sps:$4 sm:$0xff]  }
 0x4be   :  { %v7810_v52 = vpop.eup %7809  ;;  %7315 = vmatpush3.msra.mxu0 %v1487_v51  ;;  %7311 = vmatprep.mubr.msk.f32.mxu1 %vm8120_vm1, %v8119_v9  ;;  %v952_v53 = vmul.f32 %v7808_v50, %v8350_v23  ;;  %v7750_v50 = vld [vmem:[#allocation10 + $0x8] ss:$28 sps:$4 sm:$0xff]  }
 0x4bf   :  { %7316 = vmatprep.mubr.msk.f32.mxu0 %vm8120_vm1, %v8119_v9  ;;  %v953_v54 = vmul.f32 %v7810_v52, %v8352_v24  ;;  %7319 = vmatprep.subr.bf16.mxu1 %v8119_v9 }
 0x4c0   :  { %7312 = vmatmul.mubr.msk.f32.vlgmr.msra.gmra.mxu1 %vm259_vm6, %v952_v53  ;;  %7327 = vmatprep.subr.bf16.mxu0 %v8119_v9 }
 0x4c1   :  { %7317 = vmatmul.mubr.msk.f32.vlgmr.msra.gmra.mxu0 %vm259_vm6, %v953_v54  ;;  %7323 = vmatprep.mubr.msk.bf16.mxu1 %vm8120_vm1, %v8119_v9 }
 0x4c2   :  { %7331 = vmatprep.mubr.msk.bf16.mxu0 %vm8120_vm1, %v8119_v9  ;;  %7320 = vmatpush3.bf16.msra.mxu1 %v7745_v61 }
 0x4c3   :  { %7321 = vmatprep.subr.bf16.mxu1 %v8119_v9  ;;  %7328 = vmatpush3.bf16.msra.mxu0 %v7749_v49 }
 0x4c4   :  { %7329 = vmatprep.subr.bf16.mxu0 %v8119_v9 }
 0x4c6   :  { %7322 = vmatpush3.bf16.msra.mxu1 %v7746_v3 }
 0x4c7   :  { %7335 = vmatprep.subr.bf16.mxu1 %v8119_v9  ;;  %7330 = vmatpush3.bf16.msra.mxu0 %v7750_v50 }
 0x4c8   :  { %7343 = vmatprep.subr.mxu0 %v8119_v9 }
 0x51c   :  { %v1026_v55 = vpop.f32.mrf.mxu1 }
 0x51e   :  { %v7283_v56 = vpop.f32.mrf.mxu1 }
 0x525   :  { %v1102_v57 = vpop.f32.mrf.mxu0 }
 0x527   :  { %v7288_v58 = vpop.f32.mrf.mxu0 }
 0x574   :  { %v1178_v60 = vpop.f32.mrf.mxu1 }
 0x576   :  { %v7293_v62 = vpop.f32.mrf.mxu1 }
 0x578   :  { %v1254_v2 = vpop.f32.mrf.mxu0 }
 0x579   :  { %v7683_v4 = vpack.i.bf16 %v1254_v2, %v1178_v60 }
 0x57a   :  { %v7298_v5 = vpop.f32.mrf.mxu0 }
 0x57b   :  { %7684 = vrot.lane.b32.xlu0 %v7683_v4, %s8112_s27 }
 0x57c   :  { %v1330_v6 = vpop.f32.mrf.mxu1 }
 0x57d   :  { %v1406_v7 = vpop.f32.mrf.mxu0 }
 0x57e   :  { %v7688_v8 = vpack.i.bf16 %v1406_v7, %v1330_v6  ;;  %v7303_v10 = vpop.f32.mrf.mxu1 }
 0x57f   :  { %v7308_v11 = vpop.f32.mrf.mxu0 }
 0x580   :  { %7689 = vrot.lane.b32.xlu1 %v7688_v8, %s8126_s8  ;;  %v1482_v12 = vpop.f32.mrf.mxu1 }
 0x581   :  { %v1558_v13 = vpop.f32.mrf.mxu0 }
 0x582   :  { %v7693_v14 = vpack.i.bf16 %v1558_v13, %v1482_v12  ;;  %v7313_v15 = vpop.f32.mrf.mxu1 }
 0x583   :  { %v7318_v16 = vpop.f32.mrf.mxu0 }
 0x584   :  { %7694 = vrot.lane.b32.xlu0 %v7693_v14, %s8127_s9 }
 0x5ed   :  { %v7685_v17 = vpop.permute.xlu0 %7684 }
 0x5ee   :  { %v7687_v19 = vunpack.i.h.bf16 %v7685_v17  ;;  %v7686_v20 = vunpack.i.l.bf16 %v7685_v17 }
 0x5f0   :  { %v1587_v24 = vsel %vm259_vm6, %v1102_v57, %v7687_v19  ;;  %v1586_v25 = vsel %vm259_vm6, %v1026_v55, %v7686_v20  ;;  %v6929_v19 = vld [vmem:[#allocation11 + $0x1] ss:$0 sm:$0xff] }
 0x5f2   :  { %v7690_v18 = vpop.permute.xlu1 %7689 }
 0x5f3   :  { %v7692_v21 = vunpack.i.h.bf16 %v7690_v18  ;;  %v7691_v22 = vunpack.i.l.bf16 %v7690_v18 }
 0x5f5   :  { %v1590_v28 = vsel %vm1588_vm7, %v1587_v24, %v7692_v21  ;;  %v1589_v29 = vsel %vm1588_vm7, %v1586_v25, %v7691_v22 }
 0x5f6   :  { %v7695_v23 = vpop.permute.xlu0 %7694 }
 0x5f7   :  { %v7697_v26 = vunpack.i.h.bf16 %v7695_v23  ;;  %v7696_v27 = vunpack.i.l.bf16 %v7695_v23 }
 0x5f9   :  { %v1593_v30 = vsel %vm1591_vm8, %v1590_v28, %v7697_v26  ;;  %v1592_v31 = vsel %vm1591_vm8, %v1589_v29, %v7696_v27  ;;  %v6930_v26 = vld [vmem:[#allocation11 + $0x4] ss:$0 sm:$0xff] }
 0x5fa   :  { %v1594_v32 = vpack.c.bf16 %v1593_v30, %v1592_v31  ;;  %v6935_v31 = vld [vmem:[#allocation11 + $0x9] ss:$0 sm:$0xff] }
 0x5fc   :  { %7324 = vmatmul.mubr.msk.bf16.vlgmr.msra.gmra.mxu1 %vm118_vm0, %v1594_v32 }
 0x5fd   :  { %7339 = vmatprep.mubr.msk.bf16.mxu1 %vm8120_vm1, %v8119_v9  ;;  %7336 = vmatpush3.bf16.msra.mxu1 %v7747_v45 }
 0x5fe   :  { %7337 = vmatprep.subr.bf16.mxu1 %v8119_v9 }
 0x601   :  { %7338 = vmatpush3.bf16.msra.mxu1 %v7748_v46 }
 0x602   :  { %7353 = vmatprep.subr.mxu1 %v8119_v9 }
 0x6bc   :  { %v1653_v34 = vpop.f32.mrf.mxu1 }
 0x6bd   :  { %v1654_v59 = vadd.f32 %v6925_v33, %v1653_v34 }
 0x6be   :  { %v7325_v63 = vpop.f32.mrf.mxu1 }
 0x6bf   :  { %v8411_v35 = vadd.f32 %v1654_v59, %v8197_v0 }
 0x6c0   :  { %v1656_v36 = vpop.f32.mrf.mxu1 }
 0x6c1   :  { %v1657_v37 = vadd.f32 %v6925_v33, %v1656_v36  ;;  %v1664_v38 = vsel %vm118_vm0, %v8411_v35, 0.0  ;;  %v1670_v39 = vmul.f32 %v8411_v35, %v8411_v35 }
 0x6c2   :  { %1665 = vadd.xlane.f32.xlu1 %v1664_v38  ;;  %v7326_v40 = vpop.f32.mrf.mxu1  ;;  %v6931_v38 = vld [vmem:[#allocation11 + $0x8] ss:$0 sm:$0xff] }
 0x6c3   :  { %v8418_v41 = vadd.f32 %v1657_v37, %v8199_v1  ;;  %v1672_v42 = vsel %vm118_vm0, %v1670_v39, 0.0  ;;  %v109_v1 = vld [vmem:[#allocation5] sm:$0xff] }
 0x6c4   :  { %1673 = vadd.xlane.f32.xlu0 %v1672_v42  ;;  %v8427_v48 = vpack.c.bf16 %v110_v47, %v109_v1 }
 0x6c5   :  { %v1667_v0 = vsel %vm118_vm0, %v8418_v41, 0.0  ;;  %v1671_v43 = vmul.f32 %v8418_v41, %v8418_v41 }
 0x6c6   :  { %7340 = vmatmul.mubr.msk.bf16.vlgmr.msra.gmra.mxu1 %vm118_vm0, %v8427_v48 }
 0x6c7   :  { %v1675_v44 = vsel %vm118_vm0, %v1671_v43, 0.0  ;;  %7355 = vmatprep.mubr.msk.f32.mxu1 %vm8120_vm1, %v8119_v9 }
 0x6c8   :  { %1668 = vadd.xlane.f32.xlu0 %v1667_v0 }
 0x6cc   :  { %1676 = vadd.xlane.f32.xlu0 %v1675_v44 }
 0x74b   :  { %v1666_v51 = vpop.xlane.xlu1 %1665 }
 0x74c   :  { %v1678_v52 = vmul.f32 0.03125, %v1666_v51 }
 0x74d   :  { %v1674_v53 = vpop.xlane.xlu0 %1673 }
 0x74e   :  { %v1680_v54 = vmul.f32 %v1678_v52, %v1666_v51  ;;  %v1688_v18 = vsub.f32 %v8411_v35, %v1678_v52 }
 0x750   :  { %v1682_v55 = vsub.f32 %v1674_v53, %v1680_v54  ;;  %v1694_v22 = vmul.f32 %v6929_v19, %v1688_v18 }
 0x751   :  { %v1669_v56 = vpop.xlane.xlu0 %1668 }
 0x752   :  { %v1684_v57 = vmax.f32 %v1682_v55, 0.0  ;;  %v1679_v58 = vmul.f32 0.03125, %v1669_v56 }
 0x754   :  { %v1686_v60 = vmul.f32 0.032258064, %v1684_v57  ;;  %v1681_v61 = vmul.f32 %v1679_v58, %v1669_v56  ;;  %v1689_v20 = vsub.f32 %v8418_v41, %v1679_v58  ;;  %v114_v56 = vld [vmem:[#allocation7] sm:$0xff] }
 0x755   :  { %v1677_v62 = vpop.xlane.xlu0 %1676 }
 0x756   :  { %7811 = vrsqrt.f32 %v1686_v60  ;;  %v1683_v2 = vsub.f32 %v1677_v62, %v1681_v61  ;;  %vm1698_vm9 = vcmp.eq.f32.partialorder %v1686_v60, inf  ;;  %v1701_v7 = vand.u32 2147483648, %v1686_v60  ;;  %v115_v62 = vld [vmem:[#allocation7 + $0x8] sm:$0xff] }
 0x757   :  { %vm1700_vm10 = vcmp.eq.f32.partialorder %v1686_v60, 0.0  ;;  %v1695_v23 = vmul.f32 %v6929_v19, %v1689_v20 }
 0x758   :  { %v1685_v3 = vmax.f32 %v1683_v2, 0.0 }
 0x75a   :  { %v1687_v4 = vmul.f32 0.032258064, %v1685_v3 }
 0x75c   :  { %7813 = vrsqrt.f32 %v1687_v4  ;;  %vm1705_vm11 = vcmp.eq.f32.partialorder %v1687_v4, inf  ;;  %v1708_v14 = vand.u32 2147483648, %v1687_v4  ;;  %vm1707_vm12 = vcmp.eq.f32.partialorder %v1687_v4, 0.0 }
 0x763   :  { %v7812_v5 = vpop.eup %7811 }
 0x764   :  { %v1697_v6 = vmul.f32 %v7812_v5, %v1686_v60 }
 0x766   :  { %v1699_v8 = vsel %vm1698_vm9, %v1686_v60, %v1697_v6 }
 0x767   :  { %v1702_v10 = vsel %vm1700_vm10, %v1701_v7, %v1699_v8 }
 0x768   :  { %v1710_v11 = vadd.f32 1e-06, %v1702_v10 }
 0x769   :  { %v7814_v12 = vpop.eup %7813 }
 0x76a   :  { %v1704_v13 = vmul.f32 %v7814_v12, %v1687_v4  ;;  %7815 = vrcp.f32 %v1710_v11 }
 0x76c   :  { %v1706_v15 = vsel %vm1705_vm11, %v1687_v4, %v1704_v13 }
 0x76d   :  { %v1709_v16 = vsel %vm1707_vm12, %v1708_v14, %v1706_v15 }
 0x76e   :  { %v1711_v17 = vadd.f32 1e-06, %v1709_v16 }
 0x770   :  { %7817 = vrcp.f32 %v1711_v17 }
 0x777   :  { %v7816_v21 = vpop.eup %7815 }
 0x778   :  { %v1713_v24 = vmul.f32 %v7816_v21, %v1694_v22 }
 0x77a   :  { %v1720_v28 = vadd.f32 %v6930_v26, %v1713_v24 }
 0x77d   :  { %v7818_v25 = vpop.eup %7817 }
 0x77e   :  { %v1715_v27 = vmul.f32 %v7818_v25, %v1695_v23 }
 0x780   :  { %v1721_v29 = vadd.f32 %v6930_v26, %v1715_v27 }
 0x782   :  { %v1722_v30 = vpack.c.bf16 %v1721_v29, %v1720_v28 }
 0x784   :  { %7332 = vmatmul.mubr.msk.bf16.vlgmr.msra.gmra.mxu0 %vm118_vm0, %v1722_v30 }
 0x785   :  { %7345 = vmatprep.mubr.msk.f32.mxu0 %vm8120_vm1, %v8119_v9 }
 0x786   :  { %v1846_v32 = vpop.f32.mrf.mxu1 }
 0x787   :  { %v8441_v33 = vadd.f32 %v6935_v31, %v1846_v32 }
 0x788   :  { %v7341_v34 = vpop.f32.mrf.mxu1 }
 0x789   :  { %1869 = vrot.lane.b32.xlu1 %v8441_v33, %s8122_s5  ;;  %7344 = vmatpush3.xpose.msk.msra.mxu0 %vm259_vm6, %v8441_v33 }
 0x78a   :  { %v1849_v59 = vpop.f32.mrf.mxu1  ;;  %7348 = vmatprep.subr.mxu0 %v8119_v9 }
 0x78b   :  { %v8448_v63 = vadd.f32 %v6935_v31, %v1849_v59 }
 0x78c   :  { %v7342_v36 = vpop.f32.mrf.mxu1 }
 0x78d   :  { %1871 = vrot.lane.b32.xlu0 %v8448_v63, %s8122_s5  ;;  %1873 = vrot.lane.b32.xlu1 %v8441_v33, %s8121_s4 }
 0x791   :  { %1875 = vrot.lane.b32.xlu0 %v8448_v63, %s8121_s4 }
 0x795   :  { %1879 = vrot.lane.b32.xlu0 %v8448_v63, %s8123_s29 }
 0x7fb   :  { %v8458_v37 = vpop.permute.xlu1 %1869 }
 0x7fc   :  { %7354 = vmatpush3.xpose.msk.msra.mxu1 %vm259_vm6, %v8458_v37 }
 0x7fd   :  { %7363 = vmatprep.subr.mxu1 %v8119_v9 }
 0x7ff   :  { %v8473_v45 = vpop.permute.xlu0 %1871  ;;  %v8485_v46 = vpop.permute.xlu1 %1873 }
 0x803   :  { %v8487_v1 = vpop.permute.xlu0 %1875 }
 0x807   :  { %v8496_v50 = vpop.permute.xlu0 %1879 }
 0x844   :  { %v1781_v39 = vpop.f32.mrf.mxu0 }
 0x845   :  { %v1782_v40 = vadd.f32 %v6931_v38, %v1781_v39 }
 0x846   :  { %v7333_v42 = vpop.f32.mrf.mxu0 }
 0x847   :  { %1855 = vrot.lane.b32.xlu1 %v1782_v40, %s8122_s5  ;;  %7346 = vmatmul.mubr.msk.f32.vlgmr.msra.gmra.mxu0 %vm259_vm6, %v1782_v40 }
 0x848   :  { %7349 = vmatpush3.xpose.msk.msra.mxu0 %vm259_vm6, %v8448_v63  ;;  %v1784_v0 = vpop.f32.mrf.mxu0  ;;  %7350 = vmatprep.mubr.msk.f32.mxu0 %vm8120_vm1, %v8119_v9 }
 0x849   :  { %v1785_v43 = vadd.f32 %v6931_v38, %v1784_v0  ;;  %7358 = vmatprep.subr.mxu0 %v8119_v9 }
 0x84a   :  { %v7334_v44 = vpop.f32.mrf.mxu0 }
 0x84b   :  { %1859 = vrot.lane.b32.xlu1 %v1782_v40, %s8121_s4  ;;  %1861 = vrot.lane.b32.xlu0 %v1785_v43, %s8121_s4 }
 0x84c   :  { %7351 = vmatmul.mubr.msk.f32.vlgmr.msra.gmra.mxu0 %vm259_vm6, %v1785_v43 }
 0x84d   :  { %7359 = vmatpush3.xpose.msk.msra.mxu0 %vm259_vm6, %v8473_v45  ;;  %7360 = vmatprep.mubr.msk.f32.mxu0 %vm8120_vm1, %v8119_v9 }
 0x84e   :  { %7368 = vmatprep.subr.mxu0 %v8119_v9 }
 0x84f   :  { %1865 = vrot.lane.b32.xlu0 %v1785_v43, %s8123_s29  ;;  %1857 = vrot.lane.b32.xlu1 %v1785_v43, %s8122_s5 }
 0x853   :  { %1877 = vrot.lane.b32.xlu1 %v8441_v33, %s8123_s29 }
 0x857   :  { %1863 = vrot.lane.b32.xlu1 %v1782_v40, %s8123_s29 }
 0x8b9   :  { %v1856_v47 = vpop.permute.xlu1 %1855 }
 0x8ba   :  { %7356 = vmatmul.mubr.msk.f32.vlgmr.msra.gmra.mxu1 %vm259_vm6, %v1856_v47 }
 0x8bb   :  { %7364 = vmatpush3.xpose.msk.msra.mxu1 %vm259_vm6, %v8485_v46  ;;  %7365 = vmatprep.mubr.msk.f32.mxu1 %vm8120_vm1, %v8119_v9 }
 0x8bc   :  { %7373 = vmatprep.subr.mxu1 %v8119_v9 }
 0x8bd   :  { %v1860_v49 = vpop.permute.xlu1 %1859  ;;  %v1862_v52 = vpop.permute.xlu0 %1861 }
 0x8be   :  { %7366 = vmatmul.mubr.msk.f32.vlgmr.msra.gmra.mxu1 %vm259_vm6, %v1860_v49 }
 0x8bf   :  { %7375 = vmatprep.mubr.msk.f32.mxu1 %vm8120_vm1, %v8119_v9 }
 0x8c1   :  { %v1858_v51 = vpop.permute.xlu1 %1857  ;;  %v1866_v54 = vpop.permute.xlu0 %1865 }
 0x8c2   :  { %7361 = vmatmul.mubr.msk.f32.vlgmr.msra.gmra.mxu0 %vm259_vm6, %v1858_v51 }
 0x8c3   :  { %7369 = vmatpush3.xpose.msk.msra.mxu0 %vm259_vm6, %v8487_v1  ;;  %7370 = vmatprep.mubr.msk.f32.mxu0 %vm8120_vm1, %v8119_v9 }
 0x8c4   :  { %7378 = vmatprep.subr.mxu0 %v8119_v9 }
 0x8c5   :  { %v8506_v53 = vpop.permute.xlu1 %1877 }
 0x8c6   :  { %7371 = vmatmul.mubr.msk.f32.vlgmr.msra.gmra.mxu0 %vm259_vm6, %v1862_v52  ;;  %7374 = vmatpush3.xpose.msk.msra.mxu1 %vm259_vm6, %v8506_v53 }
 0x8c7   :  { %7379 = vmatpush3.xpose.msk.msra.mxu0 %vm259_vm6, %v8496_v50  ;;  %7380 = vmatprep.mubr.msk.f32.mxu0 %vm8120_vm1, %v8119_v9 }
 0x8c8   :  { %7383 = vmatprep.subr.mxu1 %v8119_v9  ;;  %7388 = vmatprep.subr.mxu0 %v8119_v9 }
 0x8c9   :  { %v1864_v55 = vpop.permute.xlu1 %1863 }
 0x8ca   :  { %7376 = vmatmul.mubr.msk.f32.vlgmr.msra.gmra.mxu1 %vm259_vm6, %v1864_v55  ;;  %7381 = vmatmul.mubr.msk.f32.vlgmr.msra.gmra.mxu0 %vm259_vm6, %v1866_v54 }
 0x8cb   :  { %7390 = vmatprep.mubr.msk.f32.mxu0 %vm8120_vm1, %v8119_v9  ;;  %7385 = vmatprep.mubr.msk.f32.mxu1 %vm8120_vm1, %v8119_v9 }
 0x907   :  { %v1951_v57 = vpop.f32.mrf.mxu0 }
 0x908   :  { %v1952_v58 = vadd.f32 %v1951_v57, %v114_v56 }
 0x909   :  { %v7347_v60 = vpop.f32.mrf.mxu0 }
 0x90a   :  { %v2473_v61 = vsel %vm259_vm6, %v1952_v58, -inf }
 0x90b   :  { %2474 = vmax.xlane.f32.xlu1 %v2473_v61 }
 0x90c   :  { %v2025_v2 = vpop.f32.mrf.mxu0 }
 0x90d   :  { %v2026_v3 = vadd.f32 %v2025_v2, %v115_v62 }
 0x90e   :  { %v7352_v4 = vpop.f32.mrf.mxu0 }
 0x90f   :  { %v2476_v5 = vsel %vm259_vm6, %v2026_v3, -inf }
 0x910   :  { %2477 = vmax.xlane.f32.xlu0 %v2476_v5 }
 0x97a   :  { %v2099_v6 = vpop.f32.mrf.mxu1 }
 0x97b   :  { %v2100_v7 = vadd.f32 %v2099_v6, %v114_v56 }
 0x97c   :  { %v7357_v8 = vpop.f32.mrf.mxu1 }
 0x97d   :  { %v2479_v10 = vsel %vm259_vm6, %v2100_v7, -inf }
 0x97e   :  { %v2247_v11 = vpop.f32.mrf.mxu1  ;;  %2480 = vmax.xlane.f32.xlu0 %v2479_v10 }
 0x97f   :  { %v2248_v12 = vadd.f32 %v2247_v11, %v114_v56 }
 0x980   :  { %v7367_v13 = vpop.f32.mrf.mxu1 }
 0x981   :  { %v2485_v14 = vsel %vm259_vm6, %v2248_v12, -inf }
 0x982   :  { %2486 = vmax.xlane.f32.xlu1 %v2485_v14  ;;  %v2173_v15 = vpop.f32.mrf.mxu0 }
 0x983   :  { %v2174_v16 = vadd.f32 %v2173_v15, %v115_v62 }
 0x984   :  { %v7362_v17 = vpop.f32.mrf.mxu0 }
 0x985   :  { %v2482_v18 = vsel %vm259_vm6, %v2174_v16, -inf }
 0x986   :  { %2483 = vmax.xlane.f32.xlu0 %v2482_v18  ;;  %v2321_v19 = vpop.f32.mrf.mxu0 }
 0x987   :  { %v2322_v20 = vadd.f32 %v2321_v19, %v115_v62 }
 0x988   :  { %v7372_v21 = vpop.f32.mrf.mxu0 }
 0x989   :  { %v2488_v22 = vsel %vm259_vm6, %v2322_v20, -inf }
 0x98a   :  { %v2395_v23 = vpop.f32.mrf.mxu1  ;;  %2489 = vmax.xlane.f32.xlu0 %v2488_v22  ;;  %v2469_v24 = vpop.f32.mrf.mxu0 }
 0x98b   :  { %v2396_v25 = vadd.f32 %v2395_v23, %v114_v56  ;;  %v2470_v26 = vadd.f32 %v2469_v24, %v115_v62 }
 0x98c   :  { %v7377_v27 = vpop.f32.mrf.mxu1  ;;  %v7382_v28 = vpop.f32.mrf.mxu0 }
 0x98d   :  { %v2491_v29 = vsel %vm259_vm6, %v2396_v25, -inf  ;;  %v2494_v30 = vsel %vm259_vm6, %v2470_v26, -inf }
 0x98e   :  { %2492 = vmax.xlane.f32.xlu1 %v2491_v29  ;;  %2495 = vmax.xlane.f32.xlu0 %v2494_v30 }
 0x994   :  { %v2475_v59 = vpop.xlane.xlu1 %2474 }
 0x999   :  { %v2478_v31 = vpop.xlane.xlu0 %2477 }
 0x99a   :  { %v2498_v32 = vsub.f32 %v2026_v3, %v2478_v31 }
 0x99c   :  { %v2507_v34 = vmul.f32 1.442695, %v2498_v32 }
 0x99e   :  { %7819 = vpow2.f32 %v2507_v34 }
 0x99f   :  { %2561 = vrot.lane.b32.xlu1 %v8441_v33, %s8124_s30  ;;  %v2497_v33 = vsub.f32 %v1952_v58, %v2475_v59 }
 0x9a1   :  { %v2505_v36 = vmul.f32 1.442695, %v2497_v33 }
 0x9a3   :  { %2713 = vrot.lane.b32.xlu1 %v8458_v37, %s8124_s30  ;;  %7821 = vpow2.f32 %v2505_v36 }
 0x9a4   :  { %2637 = vrot.lane.b32.xlu0 %v8448_v63, %s8124_s30 }
 0x9a7   :  { %2789 = vrot.lane.b32.xlu1 %v8473_v45, %s8124_s30 }
 0x9a8   :  { %2941 = vrot.lane.b32.xlu0 %v8487_v1, %s8124_s30 }
 0x9ab   :  { %2865 = vrot.lane.b32.xlu1 %v8485_v46, %s8124_s30  ;;  %v8543_v37 = vpop.eup %7819 }
 0x9ac   :  { %v2524_v63 = vsel %vm259_vm6, %v8543_v37, 0.0 }
 0x9b0   :  { %v8547_v38 = vpop.eup %7821 }
 0x9b1   :  { %v2521_v39 = vsel %vm259_vm6, %v8547_v38, 0.0 }
 0x9c7   :  { %2525 = vadd.xlane.f32.xlu0 %v2524_v63 }
 0x9cf   :  { %2522 = vadd.xlane.f32.xlu1 %v2521_v39 }
 0xa07   :  { %v2481_v40 = vpop.xlane.xlu0 %2480 }
 0xa08   :  { %v2499_v42 = vsub.f32 %v2100_v7, %v2481_v40 }
 0xa0a   :  { %v2509_v0 = vmul.f32 1.442695, %v2499_v42 }
 0xa0b   :  { %v2487_v43 = vpop.xlane.xlu1 %2486 }
 0xa0c   :  { %7823 = vpow2.f32 %v2509_v0  ;;  %v2501_v44 = vsub.f32 %v2248_v12, %v2487_v43 }
 0xa0e   :  { %v2513_v45 = vmul.f32 1.442695, %v2501_v44 }
 0xa0f   :  { %v2484_v46 = vpop.xlane.xlu0 %2483 }
 0xa10   :  { %7825 = vpow2.f32 %v2513_v45  ;;  %v2500_v1 = vsub.f32 %v2174_v16, %v2484_v46 }
 0xa12   :  { %v2511_v47 = vmul.f32 1.442695, %v2500_v1 }
 0xa13   :  { %v2490_v49 = vpop.xlane.xlu0 %2489 }
 0xa14   :  { %7827 = vpow2.f32 %v2511_v47  ;;  %v2502_v51 = vsub.f32 %v2322_v20, %v2490_v49  ;;  %v7751_v47 = vld [vmem:[#allocation10 + $0x48] ss:$28 sps:$4 sm:$0xff]  }
 0xa16   :  { %v2515_v52 = vmul.f32 1.442695, %v2502_v51 }
 0xa17   :  { %v2493_v54 = vpop.xlane.xlu1 %2492  ;;  %v2496_v55 = vpop.xlane.xlu0 %2495 }
 0xa18   :  { %7829 = vpow2.f32 %v2515_v52  ;;  %v2503_v56 = vsub.f32 %v2396_v25, %v2493_v54  ;;  %v2504_v57 = vsub.f32 %v2470_v26, %v2496_v55  ;;  %v7752_v52 = vld [vmem:[#allocation10 + $0x10] ss:$28 sps:$4 sm:$0xff]  }
 0xa19   :  { %v7824_v58 = vpop.eup %7823 }
 0xa1a   :  { %v2517_v60 = vmul.f32 1.442695, %v2503_v56  ;;  %v2519_v61 = vmul.f32 1.442695, %v2504_v57  ;;  %v2527_v62 = vsel %vm259_vm6, %v7824_v58, 0.0 }
 0xa1b   :  { %v2562_v2 = vpop.permute.xlu1 %2561  ;;  %2528 = vadd.xlane.f32.xlu1 %v2527_v62  ;;  %v2638_v3 = vpop.permute.xlu0 %2637 }
 0xa1c   :  { %7831 = vpow2.f32 %v2517_v60  ;;  %7384 = vmatpush3.msra.mxu1 %v2562_v2  ;;  %7389 = vmatpush3.msra.mxu0 %v2638_v3 }
 0xa1d   :  { %v7826_v4 = vpop.eup %7825  ;;  %7833 = vpow2.f32 %v2519_v61  ;;  %7398 = vmatprep.subr.mxu0 %v8119_v9  ;;  %7393 = vmatprep.subr.mxu1 %v8119_v9 }
 0xa1e   :  { %v2533_v5 = vsel %vm259_vm6, %v7826_v4, 0.0 }
 0xa1f   :  { %2534 = vadd.xlane.f32.xlu1 %v2533_v5  ;;  %v2714_v15 = vpop.permute.xlu1 %2713  ;;  %v2942_v16 = vpop.permute.xlu0 %2941 }
 0xa21   :  { %v7828_v6 = vpop.eup %7827 }
 0xa22   :  { %v2530_v7 = vsel %vm259_vm6, %v7828_v6, 0.0 }
 0xa23   :  { %2531 = vadd.xlane.f32.xlu0 %v2530_v7  ;;  %v2790_v17 = vpop.permute.xlu1 %2789 }
 0xa25   :  { %v8556_v8 = vpop.eup %7829 }
 0xa26   :  { %v2536_v10 = vsel %vm259_vm6, %v8556_v8, 0.0 }
 0xa27   :  { %2537 = vadd.xlane.f32.xlu0 %v2536_v10  ;;  %v2866_v19 = vpop.permute.xlu1 %2865 }
 0xa29   :  { %v8560_v11 = vpop.eup %7831 }
 0xa2a   :  { %v8562_v12 = vpop.eup %7833  ;;  %v2539_v13 = vsel %vm259_vm6, %v8560_v11, 0.0 }
 0xa2b   :  { %2540 = vadd.xlane.f32.xlu1 %v2539_v13  ;;  %v2542_v14 = vsel %vm259_vm6, %v8562_v12, 0.0 }
 0xa2c   :  { %2543 = vadd.xlane.f32.xlu0 %v2542_v14 }
 0xa3c   :  { %3017 = vrot.lane.b32.xlu1 %v8506_v53, %s8124_s30 }
 0xa42   :  { %3093 = vrot.lane.b32.xlu0 %v8496_v50, %s8124_s30 }
 0xa50   :  { %v2526_v18 = vpop.xlane.xlu0 %2525 }
 0xa51   :  { %7835 = vrcp.f32 %v2526_v18 }
 0xa58   :  { %v2523_v20 = vpop.xlane.xlu1 %2522 }
 0xa59   :  { %7837 = vrcp.f32 %v2523_v20 }
 0xa5e   :  { %v7836_v21 = vpop.eup %7835 }
 0xa5f   :  { %v2554_v22 = vmul.f32 %v7836_v21, %v8543_v37 }
 0xa61   :  { %7391 = vmatmul.mubr.msk.f32.vlgmr.msra.gmra.mxu0 %vm259_vm6, %v2554_v22  ;;  %v6963_v22 = vld [vmem:[#allocation11 + $0xa] ss:$0 sm:$0xff] }
 0xa62   :  { %7399 = vmatpush3.msra.mxu0 %v2790_v17  ;;  %7400 = vmatprep.mubr.msk.f32.mxu0 %vm8120_vm1, %v8119_v9 }
 0xa63   :  { %7408 = vmatprep.subr.mxu0 %v8119_v9 }
 0xa66   :  { %v7838_v50 = vpop.eup %7837 }
 0xa67   :  { %v2553_v53 = vmul.f32 %v7838_v50, %v8547_v38 }
 0xa69   :  { %7386 = vmatmul.mubr.msk.f32.vlgmr.msra.gmra.mxu1 %vm259_vm6, %v2553_v53 }
 0xa6a   :  { %7394 = vmatpush3.msra.mxu1 %v2714_v15  ;;  %7395 = vmatprep.mubr.msk.f32.mxu1 %vm8120_vm1, %v8119_v9 }
 0xa6b   :  { %7403 = vmatprep.subr.mxu1 %v8119_v9 }
 0xaa4   :  { %v2529_v23 = vpop.xlane.xlu1 %2528 }
 0xaa5   :  { %7839 = vrcp.f32 %v2529_v23 }
 0xaa8   :  { %v2535_v24 = vpop.xlane.xlu1 %2534 }
 0xaa9   :  { %7841 = vrcp.f32 %v2535_v24 }
 0xaac   :  { %v2532_v25 = vpop.xlane.xlu0 %2531 }
 0xaad   :  { %7843 = vrcp.f32 %v2532_v25 }
 0xab0   :  { %v2538_v26 = vpop.xlane.xlu0 %2537 }
 0xab1   :  { %7845 = vrcp.f32 %v2538_v26 }
 0xab2   :  { %v7840_v27 = vpop.eup %7839 }
 0xab3   :  { %v2555_v28 = vmul.f32 %v7840_v27, %v7824_v58 }
 0xab4   :  { %v2541_v29 = vpop.xlane.xlu1 %2540 }
 0xab5   :  { %7847 = vrcp.f32 %v2541_v29  ;;  %v2544_v30 = vpop.xlane.xlu0 %2543  ;;  %7396 = vmatmul.mubr.msk.f32.vlgmr.msra.gmra.mxu1 %vm259_vm6, %v2555_v28 }
 0xab6   :  { %v7842_v31 = vpop.eup %7841  ;;  %7849 = vrcp.f32 %v2544_v30  ;;  %7404 = vmatpush3.msra.mxu1 %v2866_v19  ;;  %7405 = vmatprep.mubr.msk.f32.mxu1 %vm8120_vm1, %v8119_v9 }
 0xab7   :  { %7413 = vmatprep.subr.mxu1 %v8119_v9  ;;  %v2557_v32 = vmul.f32 %v7842_v31, %v7826_v4 }
 0xab8   :  { %v3018_v34 = vpop.permute.xlu1 %3017 }
 0xab9   :  { %7406 = vmatmul.mubr.msk.f32.vlgmr.msra.gmra.mxu1 %vm259_vm6, %v2557_v32  ;;  %v3094_v63 = vpop.permute.xlu0 %3093 }
 0xaba   :  { %v7844_v59 = vpop.eup %7843  ;;  %7414 = vmatpush3.msra.mxu1 %v3018_v34  ;;  %7415 = vmatprep.mubr.msk.f32.mxu1 %vm8120_vm1, %v8119_v9 }
 0xabb   :  { %v2556_v33 = vmul.f32 %v7844_v59, %v7828_v6  ;;  %7423 = vmatprep.subr.bf16.mxu1 %v8119_v9  ;;  %v7753_v59 = vld [vmem:[#allocation10 + $0x4c] ss:$28 sps:$4 sm:$0xff]  }
 0xabd   :  { %7401 = vmatmul.mubr.msk.f32.vlgmr.msra.gmra.mxu0 %vm259_vm6, %v2556_v33  ;;  %v7754_v33 = vld [vmem:[#allocation10 + $0x14] ss:$28 sps:$4 sm:$0xff]  }
 0xabe   :  { %v7846_v36 = vpop.eup %7845  ;;  %7409 = vmatpush3.msra.mxu0 %v2942_v16  ;;  %7410 = vmatprep.mubr.msk.f32.mxu0 %vm8120_vm1, %v8119_v9 }
 0xabf   :  { %7418 = vmatprep.subr.mxu0 %v8119_v9  ;;  %v2558_v37 = vmul.f32 %v7846_v36, %v8556_v8 }
 0xac1   :  { %7411 = vmatmul.mubr.msk.f32.vlgmr.msra.gmra.mxu0 %vm259_vm6, %v2558_v37 }
 0xac2   :  { %v7848_v38 = vpop.eup %7847  ;;  %7419 = vmatpush3.msra.mxu0 %v3094_v63  ;;  %7420 = vmatprep.mubr.msk.f32.mxu0 %vm8120_vm1, %v8119_v9 }
 0xac3   :  { %v7850_v39 = vpop.eup %7849  ;;  %v2559_v40 = vmul.f32 %v7848_v38, %v8560_v11  ;;  %7431 = vmatprep.subr.bf16.mxu0 %v8119_v9 }
 0xac4   :  { %v2560_v42 = vmul.f32 %v7850_v39, %v8562_v12 }
 0xac5   :  { %7416 = vmatmul.mubr.msk.f32.vlgmr.msra.gmra.mxu1 %vm259_vm6, %v2559_v40 }
 0xac6   :  { %7421 = vmatmul.mubr.msk.f32.vlgmr.msra.gmra.mxu0 %vm259_vm6, %v2560_v42  ;;  %7427 = vmatprep.mubr.msk.bf16.mxu1 %vm8120_vm1, %v8119_v9 }
 0xac7   :  { %7435 = vmatprep.mubr.msk.bf16.mxu0 %vm8120_vm1, %v8119_v9  ;;  %7424 = vmatpush3.bf16.msra.mxu1 %v7751_v47 }
 0xac8   :  { %7425 = vmatprep.subr.bf16.mxu1 %v8119_v9  ;;  %7432 = vmatpush3.bf16.msra.mxu0 %v7753_v59 }
 0xac9   :  { %7433 = vmatprep.subr.bf16.mxu0 %v8119_v9 }
 0xacb   :  { %7426 = vmatpush3.bf16.msra.mxu1 %v7752_v52 }
 0xacc   :  { %7439 = vmatprep.subr.bf16.mxu1 %v8119_v9  ;;  %7434 = vmatpush3.bf16.msra.mxu0 %v7754_v33 }
 0xacd   :  { %7447 = vmatprep.subr.bf16.mxu0 %v8119_v9 }
 0xb21   :  { %v2709_v0 = vpop.f32.mrf.mxu0 }
 0xb23   :  { %v7392_v43 = vpop.f32.mrf.mxu0 }
 0xb29   :  { %v2633_v44 = vpop.f32.mrf.mxu1 }
 0xb2b   :  { %v7387_v45 = vpop.f32.mrf.mxu1 }
 0xb75   :  { %v2785_v46 = vpop.f32.mrf.mxu1 }
 0xb77   :  { %v7397_v1 = vpop.f32.mrf.mxu1 }
 0xb79   :  { %v2937_v49 = vpop.f32.mrf.mxu1 }
 0xb7b   :  { %v7407_v51 = vpop.f32.mrf.mxu1 }
 0xb7d   :  { %v2861_v54 = vpop.f32.mrf.mxu0 }
 0xb7e   :  { %v7698_v55 = vpack.i.bf16 %v2861_v54, %v2785_v46 }
 0xb7f   :  { %v7402_v56 = vpop.f32.mrf.mxu0 }
 0xb80   :  { %7699 = vrot.lane.b32.xlu1 %v7698_v55, %s8112_s27 }
 0xb81   :  { %v3013_v57 = vpop.f32.mrf.mxu0 }
 0xb82   :  { %v7703_v58 = vpack.i.bf16 %v3013_v57, %v2937_v49 }
 0xb83   :  { %v7412_v60 = vpop.f32.mrf.mxu0 }
 0xb84   :  { %7704 = vrot.lane.b32.xlu0 %v7703_v58, %s8126_s8 }
 0xb85   :  { %v3089_v61 = vpop.f32.mrf.mxu1 }
 0xb86   :  { %v3165_v62 = vpop.f32.mrf.mxu0 }
 0xb87   :  { %v7708_v2 = vpack.i.bf16 %v3165_v62, %v3089_v61  ;;  %v7417_v3 = vpop.f32.mrf.mxu1 }
 0xb88   :  { %v7422_v4 = vpop.f32.mrf.mxu0 }
 0xb89   :  { %7709 = vrot.lane.b32.xlu1 %v7708_v2, %s8127_s9 }
 0xbf2   :  { %v7700_v5 = vpop.permute.xlu1 %7699 }
 0xbf3   :  { %v7702_v7 = vunpack.i.h.bf16 %v7700_v5  ;;  %v7701_v8 = vunpack.i.l.bf16 %v7700_v5  ;;  %v6967_v5 = vld [vmem:[#allocation11 + $0x2] ss:$0 sm:$0xff] }
 0xbf5   :  { %v3194_v13 = vsel %vm259_vm6, %v2709_v0, %v7702_v7  ;;  %v3193_v14 = vsel %vm259_vm6, %v2633_v44, %v7701_v8 }
 0xbf6   :  { %v7705_v6 = vpop.permute.xlu0 %7704 }
 0xbf7   :  { %v7707_v10 = vunpack.i.h.bf16 %v7705_v6  ;;  %v7706_v11 = vunpack.i.l.bf16 %v7705_v6 }
 0xbf9   :  { %v3196_v17 = vsel %vm1588_vm7, %v3194_v13, %v7707_v10  ;;  %v3195_v18 = vsel %vm1588_vm7, %v3193_v14, %v7706_v11  ;;  %v6968_v13 = vld [vmem:[#allocation11 + $0x5] ss:$0 sm:$0xff] }
 0xbfb   :  { %v7710_v12 = vpop.permute.xlu1 %7709 }
 0xbfc   :  { %v7712_v15 = vunpack.i.h.bf16 %v7710_v12  ;;  %v7711_v16 = vunpack.i.l.bf16 %v7710_v12 }
 0xbfe   :  { %v3198_v19 = vsel %vm1591_vm8, %v3196_v17, %v7712_v15  ;;  %v3197_v20 = vsel %vm1591_vm8, %v3195_v18, %v7711_v16  ;;  %v7756_v18 = vld [vmem:[#allocation10 + $0x18] ss:$28 sps:$4 sm:$0xff]  }
 0xbff   :  { %v3199_v21 = vpack.c.bf16 %v3198_v19, %v3197_v20  ;;  %v3420_v19 = vsel %vm3415_vm13, %v7756_v18, 0  ;;  %v6969_v20 = vld [vmem:[#allocation11 + $0xb] ss:$0 sm:$0xff] }
 0xc01   :  { %7428 = vmatmul.mubr.msk.bf16.vlgmr.msra.gmra.mxu1 %vm118_vm0, %v3199_v21 }
 0xc02   :  { %7443 = vmatprep.mubr.msk.bf16.mxu1 %vm8120_vm1, %v8119_v9 }
 0xcc1   :  { %v3258_v50 = vpop.f32.mrf.mxu1 }
 0xcc2   :  { %v3259_v53 = vadd.f32 %v6963_v22, %v3258_v50 }
 0xcc3   :  { %v7429_v23 = vpop.f32.mrf.mxu1 }
 0xcc4   :  { %v8622_v24 = vadd.f32 %v3259_v53, %v8411_v35 }
 0xcc5   :  { %v3261_v25 = vpop.f32.mrf.mxu1 }
 0xcc6   :  { %v3262_v26 = vadd.f32 %v6963_v22, %v3261_v25  ;;  %v3269_v27 = vsel %vm118_vm0, %v8622_v24, 0.0  ;;  %v3275_v28 = vmul.f32 %v8622_v24, %v8622_v24 }
 0xcc7   :  { %3270 = vadd.xlane.f32.xlu0 %v3269_v27  ;;  %v7430_v29 = vpop.f32.mrf.mxu1 }
 0xcc8   :  { %v8629_v30 = vadd.f32 %v3262_v26, %v8418_v41  ;;  %v3277_v31 = vsel %vm118_vm0, %v3275_v28, 0.0  ;;  %v7755_v41 = vld [vmem:[#allocation10 + $0x50] ss:$28 sps:$4 sm:$0xff]  }
 0xcc9   :  { %v3423_v36 = vsel %vm3415_vm13, %v7755_v41, 0  ;;  %v6973_v29 = vld [vmem:[#allocation11 + $0xc] ss:$0 sm:$0xff] }
 0xcca   :  { %v3272_v32 = vsel %vm118_vm0, %v8629_v30, 0.0  ;;  %v3276_v35 = vmul.f32 %v8629_v30, %v8629_v30  ;;  %7440 = vmatpush3.bf16.xpose.msra.mxu1 %v3423_v36 }
 0xccb   :  { %3278 = vadd.xlane.f32.xlu0 %v3277_v31  ;;  %3273 = vadd.xlane.f32.xlu1 %v3272_v32 }
 0xccc   :  { %v3280_v34 = vsel %vm118_vm0, %v3276_v35, 0.0  ;;  %7441 = vmatprep.subr.bf16.mxu1 %v8119_v9 }
 0xccf   :  { %3281 = vadd.xlane.f32.xlu0 %v3280_v34 }
 0xcd2   :  { %7442 = vmatpush3.bf16.xpose.msra.mxu1 %v3420_v19  ;;  %v6978_v19 = vld [vmem:[#allocation11 + $0x10] ss:$0 sm:$0xff] }
 0xcd3   :  { %7465 = vmatprep.subr.mxu1 %v8119_v9 }
 0xd50   :  { %v3271_v37 = vpop.xlane.xlu0 %3270 }
 0xd51   :  { %v3283_v63 = vmul.f32 0.03125, %v3271_v37 }
 0xd53   :  { %v3285_v38 = vmul.f32 %v3283_v63, %v3271_v37  ;;  %v3293_v4 = vsub.f32 %v8622_v24, %v3283_v63 }
 0xd54   :  { %v3279_v39 = vpop.xlane.xlu0 %3278  ;;  %v3274_v40 = vpop.xlane.xlu1 %3273 }
 0xd55   :  { %v3287_v42 = vsub.f32 %v3279_v39, %v3285_v38  ;;  %v3284_v0 = vmul.f32 0.03125, %v3274_v40  ;;  %v3299_v8 = vmul.f32 %v6967_v5, %v3293_v4 }
 0xd57   :  { %v3289_v43 = vmax.f32 %v3287_v42, 0.0  ;;  %v3286_v44 = vmul.f32 %v3284_v0, %v3274_v40  ;;  %v3294_v6 = vsub.f32 %v8629_v30, %v3284_v0  ;;  %v7757_v42 = vld [vmem:[#allocation10 + $0xa8] ss:$28 sps:$4 sm:$0xff]   ;;  %v7758_v0 = vld [vmem:[#allocation10 + $0x70] ss:$28 sps:$4 sm:$0xff]  }
 0xd58   :  { %v3282_v45 = vpop.xlane.xlu0 %3281 }
 0xd59   :  { %v3291_v46 = vmul.f32 0.032258064, %v3289_v43  ;;  %v3288_v1 = vsub.f32 %v3282_v45, %v3286_v44  ;;  %v3300_v11 = vmul.f32 %v6967_v5, %v3294_v6 }
 0xd5b   :  { %7851 = vrsqrt.f32 %v3291_v46  ;;  %v3290_v47 = vmax.f32 %v3288_v1, 0.0  ;;  %vm3303_vm14 = vcmp.eq.f32.partialorder %v3291_v46, inf  ;;  %v3306_v54 = vand.u32 2147483648, %v3291_v46 }
 0xd5c   :  { %vm3305_vm15 = vcmp.eq.f32.partialorder %v3291_v46, 0.0 }
 0xd5d   :  { %v3292_v49 = vmul.f32 0.032258064, %v3290_v47 }
 0xd5f   :  { %7853 = vrsqrt.f32 %v3292_v49  ;;  %vm3310_vm2 = vcmp.eq.f32.partialorder %v3292_v49, inf  ;;  %v3313_v61 = vand.u32 2147483648, %v3292_v49  ;;  %vm3312_vm3 = vcmp.eq.f32.partialorder %v3292_v49, 0.0 }
 0xd68   :  { %v7852_v51 = vpop.eup %7851 }
 0xd69   :  { %v3302_v52 = vmul.f32 %v7852_v51, %v3291_v46 }
 0xd6b   :  { %v3304_v55 = vsel %vm3303_vm14, %v3291_v46, %v3302_v52 }
 0xd6c   :  { %v3307_v56 = vsel %vm3305_vm15, %v3306_v54, %v3304_v55  ;;  %v7854_v57 = vpop.eup %7853 }
 0xd6d   :  { %v3315_v58 = vadd.f32 1e-06, %v3307_v56  ;;  %v3309_v60 = vmul.f32 %v7854_v57, %v3292_v49 }
 0xd6f   :  { %7855 = vrcp.f32 %v3315_v58  ;;  %v3311_v62 = vsel %vm3310_vm2, %v3292_v49, %v3309_v60 }
 0xd70   :  { %v3314_v2 = vsel %vm3312_vm3, %v3313_v61, %v3311_v62 }
 0xd71   :  { %v3316_v3 = vadd.f32 1e-06, %v3314_v2 }
 0xd73   :  { %7857 = vrcp.f32 %v3316_v3 }
 0xd7c   :  { %v7856_v7 = vpop.eup %7855 }
 0xd7d   :  { %v3318_v10 = vmul.f32 %v7856_v7, %v3299_v8 }
 0xd7f   :  { %v3325_v15 = vadd.f32 %v6968_v13, %v3318_v10 }
 0xd80   :  { %v7858_v12 = vpop.eup %7857 }
 0xd81   :  { %v3320_v14 = vmul.f32 %v7858_v12, %v3300_v11  ;;  %v6977_v12 = vld [vmem:[#allocation11 + $0xd] ss:$0 sm:$0xff] }
 0xd83   :  { %v3326_v16 = vadd.f32 %v6968_v13, %v3320_v14 }
 0xd85   :  { %v3327_v17 = vpack.c.bf16 %v3326_v16, %v3325_v15 }
 0xd87   :  { %7436 = vmatmul.mubr.msk.bf16.vlgmr.msra.gmra.mxu0 %vm118_vm0, %v3327_v17 }
 0xd88   :  { %7451 = vmatprep.mubr.msk.bf16.mxu0 %vm8120_vm1, %v8119_v9  ;;  %7448 = vmatpush3.bf16.msra.mxu0 %v7757_v42 }
 0xd89   :  { %7449 = vmatprep.subr.bf16.mxu0 %v8119_v9 }
 0xd8c   :  { %7450 = vmatpush3.bf16.msra.mxu0 %v7758_v0 }
 0xd8d   :  { %7455 = vmatprep.subr.mxu0 %v8119_v9 }
 0xe47   :  { %v3386_v21 = vpop.f32.mrf.mxu0 }
 0xe48   :  { %v3387_v50 = vadd.f32 %v6969_v20, %v3386_v21 }
 0xe49   :  { %v7437_v22 = vpop.f32.mrf.mxu0 }
 0xe4a   :  { %v3393_v26 = vmax.f32 %v3387_v50, 0.0 }
 0xe4b   :  { %v3389_v53 = vpop.f32.mrf.mxu0 }
 0xe4c   :  { %v3390_v23 = vadd.f32 %v6969_v20, %v3389_v53  ;;  %v6979_v53 = vld [vmem:[#allocation11 + $0x13] ss:$0 sm:$0xff] }
 0xe4d   :  { %v7438_v25 = vpop.f32.mrf.mxu0 }
 0xe4e   :  { %v3394_v27 = vmax.f32 %v3390_v23, 0.0 }
 0xe50   :  { %v3395_v28 = vpack.c.bf16 %v3394_v27, %v3393_v26 }
 0xe52   :  { %7444 = vmatmul.mubr.msk.bf16.vlgmr.msra.gmra.mxu1 %vm3415_vm13, %v3395_v28 }
 0xe53   :  { %7467 = vmatprep.mubr.msk.f32.mxu1 %vm8120_vm1, %v8119_v9 }
 0xf12   :  { %v3459_v31 = vpop.f32.mrf.mxu1 }
 0xf13   :  { %v3460_v32 = vadd.f32 %v6973_v29, %v3459_v31 }
 0xf14   :  { %v7445_v35 = vpop.f32.mrf.mxu1 }
 0xf15   :  { %v8652_v34 = vadd.f32 %v3460_v32, %v8622_v24 }
 0xf16   :  { %v3462_v59 = vpop.f32.mrf.mxu1 }
 0xf17   :  { %v3463_v33 = vadd.f32 %v6973_v29, %v3462_v59  ;;  %v3470_v41 = vsel %vm118_vm0, %v8652_v34, 0.0  ;;  %v3476_v36 = vmul.f32 %v8652_v34, %v8652_v34 }
 0xf18   :  { %3471 = vadd.xlane.f32.xlu0 %v3470_v41  ;;  %v7446_v37 = vpop.f32.mrf.mxu1 }
 0xf19   :  { %v8659_v63 = vadd.f32 %v3463_v33, %v8629_v30  ;;  %v3478_v38 = vsel %vm118_vm0, %v3476_v36, 0.0 }
 0xf1b   :  { %v3473_v39 = vsel %vm118_vm0, %v8659_v63, 0.0  ;;  %v3477_v24 = vmul.f32 %v8659_v63, %v8659_v63 }
 0xf1c   :  { %3479 = vadd.xlane.f32.xlu0 %v3478_v38  ;;  %3474 = vadd.xlane.f32.xlu1 %v3473_v39 }
 0xf1d   :  { %v3481_v40 = vsel %vm118_vm0, %v3477_v24, 0.0 }
 0xf20   :  { %3482 = vadd.xlane.f32.xlu1 %v3481_v40 }
 0xfa1   :  { %v3472_v30 = vpop.xlane.xlu0 %3471 }
 0xfa2   :  { %v3484_v43 = vmul.f32 0.03125, %v3472_v30 }
 0xfa4   :  { %v3486_v44 = vmul.f32 %v3484_v43, %v3472_v30  ;;  %v3494_v11 = vsub.f32 %v8652_v34, %v3484_v43  ;;  %v7955_v43 = vld [vmem:[#allocation8] sm:$0xff] }
 0xfa5   :  { %v3480_v45 = vpop.xlane.xlu0 %3479  ;;  %v3475_v46 = vpop.xlane.xlu1 %3474 }
 0xfa6   :  { %v3488_v1 = vsub.f32 %v3480_v45, %v3486_v44  ;;  %v3485_v47 = vmul.f32 0.03125, %v3475_v46  ;;  %v3500_v15 = vmul.f32 %v6977_v12, %v3494_v11 }
 0xfa8   :  { %v3490_v49 = vmax.f32 %v3488_v1, 0.0  ;;  %v3487_v51 = vmul.f32 %v3485_v47, %v3475_v46  ;;  %v3495_v13 = vsub.f32 %v8659_v63, %v3485_v47  ;;  %v7956_v47 = vld [vmem:[#allocation8 + $0x8] sm:$0xff] }
 0xfa9   :  { %v3483_v52 = vpop.xlane.xlu1 %3482 }
 0xfaa   :  { %v3492_v54 = vmul.f32 0.032258064, %v3490_v49  ;;  %v3489_v55 = vsub.f32 %v3483_v52, %v3487_v51  ;;  %v3501_v16 = vmul.f32 %v6977_v12, %v3495_v13 }
 0xfac   :  { %7859 = vrsqrt.f32 %v3492_v54  ;;  %v3491_v56 = vmax.f32 %v3489_v55, 0.0  ;;  %vm3504_vm4 = vcmp.eq.f32.partialorder %v3492_v54, inf  ;;  %v3507_v61 = vand.u32 2147483648, %v3492_v54 }
 0xfad   :  { %vm3506_vm5 = vcmp.eq.f32.partialorder %v3492_v54, 0.0 }
 0xfae   :  { %v3493_v57 = vmul.f32 0.032258064, %v3491_v56 }
 0xfb0   :  { %7861 = vrsqrt.f32 %v3493_v57  ;;  %vm3511_vm9 = vcmp.eq.f32.partialorder %v3493_v57, inf  ;;  %v3514_v6 = vand.u32 2147483648, %v3493_v57  ;;  %vm3513_vm10 = vcmp.eq.f32.partialorder %v3493_v57, 0.0 }
 0xfb9   :  { %v7860_v58 = vpop.eup %7859 }
 0xfba   :  { %v3503_v60 = vmul.f32 %v7860_v58, %v3492_v54 }
 0xfbc   :  { %v3505_v62 = vsel %vm3504_vm4, %v3492_v54, %v3503_v60 }
 0xfbd   :  { %v3508_v2 = vsel %vm3506_vm5, %v3507_v61, %v3505_v62  ;;  %v7862_v3 = vpop.eup %7861 }
 0xfbe   :  { %v3516_v4 = vadd.f32 1e-06, %v3508_v2  ;;  %v3510_v5 = vmul.f32 %v7862_v3, %v3493_v57 }
 0xfc0   :  { %7863 = vrcp.f32 %v3516_v4  ;;  %v3512_v7 = vsel %vm3511_vm9, %v3493_v57, %v3510_v5 }
 0xfc1   :  { %v3515_v8 = vsel %vm3513_vm10, %v3514_v6, %v3512_v7 }
 0xfc2   :  { %v3517_v10 = vadd.f32 1e-06, %v3515_v8 }
 0xfc4   :  { %7865 = vrcp.f32 %v3517_v10 }
 0xfcd   :  { %v7864_v14 = vpop.eup %7863 }
 0xfce   :  { %v3519_v17 = vmul.f32 %v7864_v14, %v3500_v15 }
 0xfd0   :  { %v3526_v21 = vadd.f32 %v6978_v19, %v3519_v17 }
 0xfd1   :  { %v7866_v18 = vpop.eup %7865 }
 0xfd2   :  { %v3521_v20 = vmul.f32 %v7866_v18, %v3501_v16 }
 0xfd4   :  { %v3527_v22 = vadd.f32 %v6978_v19, %v3521_v20 }
 0xfd6   :  { %v3528_v50 = vpack.c.bf16 %v3527_v22, %v3526_v21 }
 0xfd8   :  { %7452 = vmatmul.mubr.msk.bf16.vlgmr.msra.gmra.mxu0 %vm118_vm0, %v3528_v50 }
 0xfd9   :  { %7457 = vmatprep.mubr.msk.f32.mxu0 %vm8120_vm1, %v8119_v9 }
0x1098   :  { %v3588_v23 = vpop.f32.mrf.mxu0 }
0x1099   :  { %v8674_v25 = vadd.f32 %v6979_v53, %v3588_v23 }
0x109a   :  { %v7453_v26 = vpop.f32.mrf.mxu0 }
0x109b   :  { %3601 = vrot.lane.b32.xlu1 %v8674_v25, %s8121_s4  ;;  %3597 = vrot.lane.b32.xlu0 %v8674_v25, %s8122_s5 }
0x109c   :  { %v3591_v27 = vpop.f32.mrf.mxu0 }
0x109d   :  { %v8680_v28 = vadd.f32 %v6979_v53, %v3591_v27 }
0x109e   :  { %v7454_v29 = vpop.f32.mrf.mxu0 }
0x109f   :  { %3605 = vrot.lane.b32.xlu0 %v8674_v25, %s8123_s29  ;;  %3599 = vrot.lane.b32.xlu1 %v8680_v28, %s8122_s5 }
0x10a3   :  { %3609 = vrot.lane.b32.xlu0 %v8674_v25, %s8124_s30  ;;  %3603 = vrot.lane.b32.xlu1 %v8680_v28, %s8121_s4 }
0x10a7   :  { %3607 = vrot.lane.b32.xlu1 %v8680_v28, %s8123_s29 }
0x10ab   :  { %3685 = vrot.lane.b32.xlu1 %v8680_v28, %s8124_s30 }
0x110d   :  { %v8694_v31 = vpop.permute.xlu1 %3601  ;;  %v8696_v32 = vpop.permute.xlu0 %3597 }
0x110e   :  { %3761 = vrot.lane.b32.xlu0 %v8696_v32, %s8124_s30 }
0x1111   :  { %v8700_v35 = vpop.permute.xlu0 %3605  ;;  %v8702_v59 = vpop.permute.xlu1 %3599 }
0x1112   :  { %3913 = vrot.lane.b32.xlu0 %v8694_v31, %s8124_s30  ;;  %3837 = vrot.lane.b32.xlu1 %v8702_v59, %s8124_s30 }
0x1115   :  { %v3610_v33 = vpop.permute.xlu0 %3609  ;;  %v8708_v41 = vpop.permute.xlu1 %3603 }
0x1116   :  { %4065 = vrot.lane.b32.xlu0 %v8700_v35, %s8124_s30  ;;  %7456 = vmatpush3.xpose.msk.msra.mxu0 %vm259_vm6, %v3610_v33 }
0x1117   :  { %3989 = vrot.lane.b32.xlu1 %v8708_v41, %s8124_s30  ;;  %7460 = vmatprep.subr.mxu0 %v8119_v9 }
0x1119   :  { %7458 = vmatmul.mubr.msk.f32.vlgmr.msra.gmra.mxu0 %vm259_vm6, %v8674_v25  ;;  %v8718_v36 = vpop.permute.xlu1 %3607 }
0x111a   :  { %7462 = vmatprep.mubr.msk.f32.mxu0 %vm8120_vm1, %v8119_v9 }
0x111b   :  { %4141 = vrot.lane.b32.xlu1 %v8718_v36, %s8124_s30 }
0x111d   :  { %v3686_v37 = vpop.permute.xlu1 %3685 }
0x111e   :  { %7461 = vmatpush3.xpose.msk.msra.mxu0 %vm259_vm6, %v3686_v37 }
0x111f   :  { %7470 = vmatprep.subr.mxu0 %v8119_v9 }
0x1121   :  { %7463 = vmatmul.mubr.msk.f32.vlgmr.msra.gmra.mxu0 %vm259_vm6, %v8680_v28 }
0x1122   :  { %7472 = vmatprep.mubr.msk.f32.mxu0 %vm8120_vm1, %v8119_v9 }
0x1180   :  { %v3762_v38 = vpop.permute.xlu0 %3761 }
0x1181   :  { %7466 = vmatpush3.xpose.msk.msra.mxu1 %vm259_vm6, %v3762_v38 }
0x1182   :  { %7475 = vmatprep.subr.mxu1 %v8119_v9 }
0x1184   :  { %7468 = vmatmul.mubr.msk.f32.vlgmr.msra.gmra.mxu1 %vm259_vm6, %v8696_v32  ;;  %v3914_v39 = vpop.permute.xlu0 %3913  ;;  %v3838_v24 = vpop.permute.xlu1 %3837 }
0x1185   :  { %7471 = vmatpush3.xpose.msk.msra.mxu0 %vm259_vm6, %v3838_v24  ;;  %7476 = vmatpush3.xpose.msk.msra.mxu1 %vm259_vm6, %v3914_v39 }
0x1186   :  { %7477 = vmatprep.mubr.msk.f32.mxu1 %vm8120_vm1, %v8119_v9  ;;  %7485 = vmatprep.subr.mxu1 %v8119_v9 }
0x1187   :  { %7480 = vmatprep.subr.mxu0 %v8119_v9 }
0x1188   :  { %7478 = vmatmul.mubr.msk.f32.vlgmr.msra.gmra.mxu1 %vm259_vm6, %v8694_v31  ;;  %v4066_v40 = vpop.permute.xlu0 %4065  ;;  %7473 = vmatmul.mubr.msk.f32.vlgmr.msra.gmra.mxu0 %vm259_vm6, %v8702_v59 }
0x1189   :  { %v3990_v42 = vpop.permute.xlu1 %3989  ;;  %7486 = vmatpush3.xpose.msk.msra.mxu1 %vm259_vm6, %v4066_v40  ;;  %7482 = vmatprep.mubr.msk.f32.mxu0 %vm8120_vm1, %v8119_v9 }
0x118a   :  { %7481 = vmatpush3.xpose.msk.msra.mxu0 %vm259_vm6, %v3990_v42  ;;  %7487 = vmatprep.mubr.msk.f32.mxu1 %vm8120_vm1, %v8119_v9 }
0x118b   :  { %7490 = vmatprep.subr.mxu0 %v8119_v9  ;;  %7495 = vmatprep.subr.mxu1 %v8119_v9 }
0x118c   :  { %7488 = vmatmul.mubr.msk.f32.vlgmr.msra.gmra.mxu1 %vm259_vm6, %v8700_v35 }
0x118d   :  { %7483 = vmatmul.mubr.msk.f32.vlgmr.msra.gmra.mxu0 %vm259_vm6, %v8708_v41  ;;  %v4142_v0 = vpop.permute.xlu1 %4141  ;;  %7497 = vmatprep.mubr.msk.f32.mxu1 %vm8120_vm1, %v8119_v9 }
0x118e   :  { %7491 = vmatpush3.xpose.msk.msra.mxu0 %vm259_vm6, %v4142_v0  ;;  %7492 = vmatprep.mubr.msk.f32.mxu0 %vm8120_vm1, %v8119_v9 }
0x118f   :  { %7500 = vmatprep.subr.mxu0 %v8119_v9 }
0x1191   :  { %7493 = vmatmul.mubr.msk.f32.vlgmr.msra.gmra.mxu0 %vm259_vm6, %v8718_v36 }
0x1192   :  { %7502 = vmatprep.mubr.msk.f32.mxu0 %vm8120_vm1, %v8119_v9 }
0x11d9   :  { %v3681_v30 = vpop.f32.mrf.mxu0 }
0x11da   :  { %v3682_v44 = vadd.f32 %v7955_v43, %v3681_v30 }
0x11db   :  { %v7459_v45 = vpop.f32.mrf.mxu0 }
0x11dc   :  { %v4217_v46 = vsel %vm259_vm6, %v3682_v44, -inf }
0x11dd   :  { %4218 = vmax.xlane.f32.xlu0 %v4217_v46 }
0x11e1   :  { %v3757_v1 = vpop.f32.mrf.mxu0 }
0x11e2   :  { %v3758_v49 = vadd.f32 %v7956_v47, %v3757_v1 }
0x11e3   :  { %v7464_v51 = vpop.f32.mrf.mxu0 }
0x11e4   :  { %v4220_v52 = vsel %vm259_vm6, %v3758_v49, -inf }
0x11e5   :  { %4221 = vmax.xlane.f32.xlu1 %v4220_v52 }
0x1244   :  { %v3833_v54 = vpop.f32.mrf.mxu1 }
0x1245   :  { %v3834_v55 = vadd.f32 %v7955_v43, %v3833_v54 }
0x1246   :  { %v7469_v56 = vpop.f32.mrf.mxu1 }
0x1247   :  { %v4223_v57 = vsel %vm259_vm6, %v3834_v55, -inf }
0x1248   :  { %v3985_v58 = vpop.f32.mrf.mxu1  ;;  %4224 = vmax.xlane.f32.xlu0 %v4223_v57  ;;  %v3909_v60 = vpop.f32.mrf.mxu0 }
0x1249   :  { %v3910_v61 = vadd.f32 %v7956_v47, %v3909_v60  ;;  %v3986_v3 = vadd.f32 %v7955_v43, %v3985_v58 }
0x124a   :  { %v7474_v62 = vpop.f32.mrf.mxu0  ;;  %v7479_v2 = vpop.f32.mrf.mxu1 }
0x124b   :  { %v4226_v4 = vsel %vm259_vm6, %v3910_v61, -inf  ;;  %v4229_v12 = vsel %vm259_vm6, %v3986_v3, -inf }
0x124c   :  { %v4137_v5 = vpop.f32.mrf.mxu1  ;;  %4227 = vmax.xlane.f32.xlu0 %v4226_v4 }
0x124d   :  { %v4061_v6 = vpop.f32.mrf.mxu0  ;;  %v4138_v10 = vadd.f32 %v7955_v43, %v4137_v5 }
0x124e   :  { %v4062_v7 = vadd.f32 %v7956_v47, %v4061_v6  ;;  %v7489_v8 = vpop.f32.mrf.mxu1 }
0x124f   :  { %v7484_v11 = vpop.f32.mrf.mxu0  ;;  %v4235_v17 = vsel %vm259_vm6, %v4138_v10, -inf }
0x1250   :  { %4230 = vmax.xlane.f32.xlu0 %v4229_v12  ;;  %v4232_v13 = vsel %vm259_vm6, %v4062_v7, -inf }
0x1251   :  { %4233 = vmax.xlane.f32.xlu1 %v4232_v13  ;;  %v4213_v14 = vpop.f32.mrf.mxu0 }
0x1252   :  { %v4214_v15 = vadd.f32 %v7956_v47, %v4213_v14 }
0x1253   :  { %v7494_v16 = vpop.f32.mrf.mxu0 }
0x1254   :  { %4236 = vmax.xlane.f32.xlu0 %v4235_v17  ;;  %v4238_v18 = vsel %vm259_vm6, %v4214_v15, -inf }
0x1255   :  { %4239 = vmax.xlane.f32.xlu1 %v4238_v18 }
0x1266   :  { %4381 = vrot.lane.b32.xlu1 %v8680_v28, %s8125_s7  ;;  %v4219_v19 = vpop.xlane.xlu0 %4218 }
0x1267   :  { %v4241_v20 = vsub.f32 %v3682_v44, %v4219_v19 }
0x1269   :  { %v4249_v21 = vmul.f32 1.442695, %v4241_v20 }
0x126a   :  { %4457 = vrot.lane.b32.xlu1 %v8696_v32, %s8125_s7  ;;  %4305 = vrot.lane.b32.xlu0 %v8674_v25, %s8125_s7 }
0x126b   :  { %7867 = vpow2.f32 %v4249_v21 }
0x126e   :  { %4533 = vrot.lane.b32.xlu1 %v8702_v59, %s8125_s7  ;;  %4609 = vrot.lane.b32.xlu0 %v8694_v31, %s8125_s7  ;;  %v4222_v22 = vpop.xlane.xlu1 %4221 }
0x126f   :  { %v4242_v50 = vsub.f32 %v3758_v49, %v4222_v22 }
0x1271   :  { %v4251_v53 = vmul.f32 1.442695, %v4242_v50 }
0x1272   :  { %4685 = vrot.lane.b32.xlu1 %v8708_v41, %s8125_s7 }
0x1273   :  { %7869 = vpow2.f32 %v4251_v53 }
0x1278   :  { %v8786_v23 = vpop.eup %7867 }
0x1279   :  { %v4265_v25 = vsel %vm259_vm6, %v8786_v23, 0.0 }
0x1280   :  { %v8790_v26 = vpop.eup %7869 }
0x1281   :  { %v4268_v27 = vsel %vm259_vm6, %v8790_v26, 0.0 }
0x128d   :  { %4266 = vadd.xlane.f32.xlu0 %v4265_v25 }
0x1296   :  { %4269 = vadd.xlane.f32.xlu1 %v4268_v27 }
0x12d1   :  { %v4225_v28 = vpop.xlane.xlu0 %4224 }
0x12d2   :  { %v4243_v29 = vsub.f32 %v3834_v55, %v4225_v28 }
0x12d4   :  { %v4253_v31 = vmul.f32 1.442695, %v4243_v29 }
0x12d5   :  { %v4228_v32 = vpop.xlane.xlu0 %4227 }
0x12d6   :  { %7871 = vpow2.f32 %v4253_v31  ;;  %v4244_v59 = vsub.f32 %v3910_v61, %v4228_v32 }
0x12d8   :  { %v4255_v33 = vmul.f32 1.442695, %v4244_v59 }
0x12d9   :  { %v4231_v41 = vpop.xlane.xlu0 %4230 }
0x12da   :  { %7873 = vpow2.f32 %v4255_v33  ;;  %v4245_v37 = vsub.f32 %v3986_v3, %v4231_v41  ;;  %v4234_v38 = vpop.xlane.xlu1 %4233 }
0x12db   :  { %v4246_v39 = vsub.f32 %v4062_v7, %v4234_v38 }
0x12dc   :  { %v4257_v24 = vmul.f32 1.442695, %v4245_v37  ;;  %v7759_v37 = vld [vmem:[#allocation10 + $0xac] ss:$28 sps:$4 sm:$0xff]  }
0x12dd   :  { %v4259_v40 = vmul.f32 1.442695, %v4246_v39  ;;  %v4237_v42 = vpop.xlane.xlu0 %4236 }
0x12de   :  { %7875 = vpow2.f32 %v4257_v24  ;;  %v4247_v0 = vsub.f32 %v4138_v10, %v4237_v42  ;;  %v4240_v30 = vpop.xlane.xlu1 %4239  ;;  %v7760_v24 = vld [vmem:[#allocation10 + $0x74] ss:$28 sps:$4 sm:$0xff]  }
0x12df   :  { %7877 = vpow2.f32 %v4259_v40  ;;  %v4248_v43 = vsub.f32 %v4214_v15, %v4240_v30 }
0x12e0   :  { %v4261_v44 = vmul.f32 1.442695, %v4247_v0 }
0x12e1   :  { %v4263_v45 = vmul.f32 1.442695, %v4248_v43  ;;  %v4306_v46 = vpop.permute.xlu0 %4305 }
0x12e2   :  { %7879 = vpow2.f32 %v4261_v44  ;;  %v4382_v1 = vpop.permute.xlu1 %4381  ;;  %7496 = vmatpush3.msra.mxu1 %v4306_v46 }
0x12e3   :  { %v7872_v47 = vpop.eup %7871  ;;  %7881 = vpow2.f32 %v4263_v45  ;;  %7501 = vmatpush3.msra.mxu0 %v4382_v1  ;;  %7505 = vmatprep.subr.mxu1 %v8119_v9 }
0x12e4   :  { %v4271_v49 = vsel %vm259_vm6, %v7872_v47, 0.0  ;;  %7510 = vmatprep.subr.mxu0 %v8119_v9 }
0x12e5   :  { %4272 = vadd.xlane.f32.xlu0 %v4271_v49  ;;  %v4610_v3 = vpop.permute.xlu0 %4609 }
0x12e6   :  { %v4458_v2 = vpop.permute.xlu1 %4457 }
0x12e7   :  { %v7874_v51 = vpop.eup %7873 }
0x12e8   :  { %v4274_v52 = vsel %vm259_vm6, %v7874_v51, 0.0 }
0x12e9   :  { %4275 = vadd.xlane.f32.xlu1 %v4274_v52 }
0x12ea   :  { %v4534_v4 = vpop.permute.xlu1 %4533 }
0x12eb   :  { %v7876_v54 = vpop.eup %7875 }
0x12ec   :  { %v7878_v55 = vpop.eup %7877  ;;  %v4277_v56 = vsel %vm259_vm6, %v7876_v54, 0.0 }
0x12ed   :  { %4278 = vadd.xlane.f32.xlu0 %v4277_v56  ;;  %v4280_v57 = vsel %vm259_vm6, %v7878_v55, 0.0 }
0x12ee   :  { %4281 = vadd.xlane.f32.xlu1 %v4280_v57  ;;  %v4686_v6 = vpop.permute.xlu1 %4685 }
0x12ef   :  { %v8800_v58 = vpop.eup %7879 }
0x12f0   :  { %v8802_v60 = vpop.eup %7881  ;;  %v4283_v61 = vsel %vm259_vm6, %v8800_v58, 0.0 }
0x12f1   :  { %4284 = vadd.xlane.f32.xlu0 %v4283_v61  ;;  %v4286_v62 = vsel %vm259_vm6, %v8802_v60, 0.0 }
0x12f2   :  { %4287 = vadd.xlane.f32.xlu1 %v4286_v62 }
0x1303   :  { %4837 = vrot.lane.b32.xlu1 %v8718_v36, %s8125_s7 }
0x1307   :  { %4761 = vrot.lane.b32.xlu0 %v8700_v35, %s8125_s7 }
0x1316   :  { %v4267_v5 = vpop.xlane.xlu0 %4266 }
0x1317   :  { %7883 = vrcp.f32 %v4267_v5 }
0x131f   :  { %v4270_v7 = vpop.xlane.xlu1 %4269 }
0x1320   :  { %7885 = vrcp.f32 %v4270_v7 }
0x1324   :  { %v7884_v8 = vpop.eup %7883 }
0x1325   :  { %v4297_v10 = vmul.f32 %v7884_v8, %v8786_v23 }
0x1327   :  { %7498 = vmatmul.mubr.msk.f32.vlgmr.msra.gmra.mxu1 %vm259_vm6, %v4297_v10  ;;  %v7007_v10 = vld [vmem:[#allocation11 + $0x14] ss:$0 sm:$0xff] }
0x1328   :  { %7506 = vmatpush3.msra.mxu1 %v4458_v2  ;;  %7507 = vmatprep.mubr.msk.f32.mxu1 %vm8120_vm1, %v8119_v9 }
0x1329   :  { %7515 = vmatprep.subr.mxu1 %v8119_v9 }
0x132d   :  { %v7886_v35 = vpop.eup %7885 }
0x132e   :  { %v4298_v36 = vmul.f32 %v7886_v35, %v8790_v26 }
0x1330   :  { %7503 = vmatmul.mubr.msk.f32.vlgmr.msra.gmra.mxu0 %vm259_vm6, %v4298_v36 }
0x1331   :  { %7511 = vmatpush3.msra.mxu0 %v4534_v4  ;;  %7512 = vmatprep.mubr.msk.f32.mxu0 %vm8120_vm1, %v8119_v9 }
0x1332   :  { %7520 = vmatprep.subr.mxu0 %v8119_v9 }
0x136e   :  { %v4273_v11 = vpop.xlane.xlu0 %4272 }
0x136f   :  { %7887 = vrcp.f32 %v4273_v11 }
0x1372   :  { %v4276_v12 = vpop.xlane.xlu1 %4275 }
0x1373   :  { %7889 = vrcp.f32 %v4276_v12 }
0x1376   :  { %v4279_v13 = vpop.xlane.xlu0 %4278 }
0x1377   :  { %7891 = vrcp.f32 %v4279_v13  ;;  %v4282_v14 = vpop.xlane.xlu1 %4281 }
0x1378   :  { %7893 = vrcp.f32 %v4282_v14 }
0x137a   :  { %v4285_v15 = vpop.xlane.xlu0 %4284 }
0x137b   :  { %7895 = vrcp.f32 %v4285_v15  ;;  %v4288_v16 = vpop.xlane.xlu1 %4287 }
0x137c   :  { %v7888_v17 = vpop.eup %7887  ;;  %7897 = vrcp.f32 %v4288_v16 }
0x137d   :  { %v4299_v18 = vmul.f32 %v7888_v17, %v7872_v47 }
0x137e   :  { %v4762_v23 = vpop.permute.xlu0 %4761 }
0x137f   :  { %7508 = vmatmul.mubr.msk.f32.vlgmr.msra.gmra.mxu1 %vm259_vm6, %v4299_v18  ;;  %v4838_v26 = vpop.permute.xlu1 %4837 }
0x1380   :  { %v7890_v19 = vpop.eup %7889  ;;  %7516 = vmatpush3.msra.mxu1 %v4610_v3  ;;  %7517 = vmatprep.mubr.msk.f32.mxu1 %vm8120_vm1, %v8119_v9 }
0x1381   :  { %v4300_v20 = vmul.f32 %v7890_v19, %v7874_v51  ;;  %7525 = vmatprep.subr.mxu1 %v8119_v9 }
0x1383   :  { %7513 = vmatmul.mubr.msk.f32.vlgmr.msra.gmra.mxu0 %vm259_vm6, %v4300_v20 }
0x1384   :  { %v7892_v21 = vpop.eup %7891  ;;  %7521 = vmatpush3.msra.mxu0 %v4686_v6  ;;  %7522 = vmatprep.mubr.msk.f32.mxu0 %vm8120_vm1, %v8119_v9 }
0x1385   :  { %v7894_v22 = vpop.eup %7893  ;;  %7530 = vmatprep.subr.mxu0 %v8119_v9  ;;  %v4301_v50 = vmul.f32 %v7892_v21, %v7876_v54 }
0x1386   :  { %v4302_v53 = vmul.f32 %v7894_v22, %v7878_v55  ;;  %v7761_v22 = vld [vmem:[#allocation10 + $0xb4] ss:$28 sps:$4 sm:$0xff]  }
0x1387   :  { %7518 = vmatmul.mubr.msk.f32.vlgmr.msra.gmra.mxu1 %vm259_vm6, %v4301_v50  ;;  %v7762_v50 = vld [vmem:[#allocation10 + $0x7c] ss:$28 sps:$4 sm:$0xff]  }
0x1388   :  { %v7896_v25 = vpop.eup %7895  ;;  %7523 = vmatmul.mubr.msk.f32.vlgmr.msra.gmra.mxu0 %vm259_vm6, %v4302_v53  ;;  %7526 = vmatpush3.msra.mxu1 %v4762_v23  ;;  %v7764_v53 = vld [vmem:[#allocation10 + $0x78] ss:$28 sps:$4 sm:$0xff]  }
0x1389   :  { %v7898_v27 = vpop.eup %7897  ;;  %7531 = vmatpush3.msra.mxu0 %v4838_v26  ;;  %7527 = vmatprep.mubr.msk.f32.mxu1 %vm8120_vm1, %v8119_v9  ;;  %v4303_v28 = vmul.f32 %v7896_v25, %v8800_v58 }
0x138a   :  { %7532 = vmatprep.mubr.msk.f32.mxu0 %vm8120_vm1, %v8119_v9  ;;  %v4304_v29 = vmul.f32 %v7898_v27, %v8802_v60  ;;  %7535 = vmatprep.subr.bf16.mxu1 %v8119_v9 }
0x138b   :  { %7528 = vmatmul.mubr.msk.f32.vlgmr.msra.gmra.mxu1 %vm259_vm6, %v4303_v28  ;;  %7543 = vmatprep.subr.bf16.mxu0 %v8119_v9 }
0x138c   :  { %7533 = vmatmul.mubr.msk.f32.vlgmr.msra.gmra.mxu0 %vm259_vm6, %v4304_v29  ;;  %7539 = vmatprep.mubr.msk.bf16.mxu1 %vm8120_vm1, %v8119_v9 }
0x138d   :  { %7547 = vmatprep.mubr.msk.bf16.mxu0 %vm8120_vm1, %v8119_v9  ;;  %7536 = vmatpush3.bf16.msra.mxu1 %v7759_v37 }
0x138e   :  { %7537 = vmatprep.subr.bf16.mxu1 %v8119_v9 }
0x1391   :  { %7538 = vmatpush3.bf16.msra.mxu1 %v7760_v24 }
0x1392   :  { %7551 = vmatprep.subr.bf16.mxu1 %v8119_v9 }
0x13e7   :  { %v4377_v31 = vpop.f32.mrf.mxu1 }
0x13e9   :  { %v7499_v32 = vpop.f32.mrf.mxu1 }
0x13f0   :  { %v4453_v59 = vpop.f32.mrf.mxu0 }
0x13f2   :  { %v7504_v33 = vpop.f32.mrf.mxu0 }
0x143f   :  { %v4529_v41 = vpop.f32.mrf.mxu1 }
0x1441   :  { %v7509_v38 = vpop.f32.mrf.mxu1 }
0x1443   :  { %v4605_v39 = vpop.f32.mrf.mxu0 }
0x1444   :  { %v7713_v40 = vpack.i.bf16 %v4605_v39, %v4529_v41 }
0x1445   :  { %v7514_v42 = vpop.f32.mrf.mxu0 }
0x1446   :  { %7714 = vrot.lane.b32.xlu0 %v7713_v40, %s8112_s27 }
0x1447   :  { %v4681_v0 = vpop.f32.mrf.mxu1 }
0x1448   :  { %v4757_v30 = vpop.f32.mrf.mxu0 }
0x1449   :  { %v7718_v43 = vpack.i.bf16 %v4757_v30, %v4681_v0  ;;  %v7519_v44 = vpop.f32.mrf.mxu1 }
0x144a   :  { %v7524_v45 = vpop.f32.mrf.mxu0 }
0x144b   :  { %7719 = vrot.lane.b32.xlu1 %v7718_v43, %s8126_s8  ;;  %v4833_v46 = vpop.f32.mrf.mxu1 }
0x144c   :  { %v4909_v1 = vpop.f32.mrf.mxu0 }
0x144d   :  { %v7723_v47 = vpack.i.bf16 %v4909_v1, %v4833_v46  ;;  %v7529_v49 = vpop.f32.mrf.mxu1 }
0x144e   :  { %v7534_v51 = vpop.f32.mrf.mxu0 }
0x144f   :  { %7724 = vrot.lane.b32.xlu0 %v7723_v47, %s8127_s9  ;;  %v7011_v51 = vld [vmem:[#allocation11 + $0xe] ss:$0 sm:$0xff] }
0x14b8   :  { %v7715_v52 = vpop.permute.xlu0 %7714 }
0x14b9   :  { %v7717_v55 = vunpack.i.h.bf16 %v7715_v52  ;;  %v7716_v56 = vunpack.i.l.bf16 %v7715_v52 }
0x14bb   :  { %v4938_v61 = vsel %vm259_vm6, %v4453_v59, %v7717_v55  ;;  %v4937_v62 = vsel %vm259_vm6, %v4377_v31, %v7716_v56 }
0x14bd   :  { %v7720_v54 = vpop.permute.xlu1 %7719 }
0x14be   :  { %v7722_v57 = vunpack.i.h.bf16 %v7720_v54  ;;  %v7721_v58 = vunpack.i.l.bf16 %v7720_v54 }
0x14c0   :  { %v4940_v4 = vsel %vm1588_vm7, %v4938_v61, %v7722_v57  ;;  %v4939_v5 = vsel %vm1588_vm7, %v4937_v62, %v7721_v58 }
0x14c1   :  { %v7725_v60 = vpop.permute.xlu0 %7724 }
0x14c2   :  { %v7727_v2 = vunpack.i.h.bf16 %v7725_v60  ;;  %v7726_v3 = vunpack.i.l.bf16 %v7725_v60  ;;  %v7012_v60 = vld [vmem:[#allocation11 + $0x11] ss:$0 sm:$0xff] }
0x14c4   :  { %v4942_v6 = vsel %vm1591_vm8, %v4940_v4, %v7727_v2  ;;  %v4941_v7 = vsel %vm1591_vm8, %v4939_v5, %v7726_v3  ;;  %v7017_v4 = vld [vmem:[#allocation11 + $0x16] ss:$0 sm:$0xff] }
0x14c5   :  { %v4943_v8 = vpack.c.bf16 %v4942_v6, %v4941_v7 }
0x14c7   :  { %7540 = vmatmul.mubr.msk.bf16.vlgmr.msra.gmra.mxu1 %vm118_vm0, %v4943_v8 }
0x14c8   :  { %7555 = vmatprep.mubr.msk.bf16.mxu1 %vm8120_vm1, %v8119_v9  ;;  %7552 = vmatpush3.bf16.msra.mxu1 %v7761_v22 }
0x14c9   :  { %7553 = vmatprep.subr.bf16.mxu1 %v8119_v9 }
0x14cc   :  { %7554 = vmatpush3.bf16.msra.mxu1 %v7762_v50 }
0x14cd   :  { %7569 = vmatprep.subr.mxu1 %v8119_v9 }
0x14cf   :  { %7556 = vmatmul.mubr.msk.bf16.vlgmr.msra.gmra.mxu1 %vm118_vm0, %v8427_v48 }
0x14d0   :  { %7571 = vmatprep.mubr.msk.f32.mxu1 %vm8120_vm1, %v8119_v9 }
0x1587   :  { %v5002_v35 = vpop.f32.mrf.mxu1 }
0x1588   :  { %v5003_v36 = vadd.f32 %v7007_v10, %v5002_v35 }
0x1589   :  { %v7541_v11 = vpop.f32.mrf.mxu1 }
0x158a   :  { %v8861_v12 = vadd.f32 %v5003_v36, %v8652_v34  ;;  %v7013_v11 = vld [vmem:[#allocation11 + $0x15] ss:$0 sm:$0xff] }
0x158b   :  { %v5005_v13 = vpop.f32.mrf.mxu1 }
0x158c   :  { %v5006_v14 = vadd.f32 %v7007_v10, %v5005_v13  ;;  %v5013_v15 = vsel %vm118_vm0, %v8861_v12, 0.0  ;;  %v5019_v16 = vmul.f32 %v8861_v12, %v8861_v12 }
0x158d   :  { %5014 = vadd.xlane.f32.xlu1 %v5013_v15  ;;  %v7542_v17 = vpop.f32.mrf.mxu1 }
0x158e   :  { %v8868_v18 = vadd.f32 %v5006_v14, %v8659_v63  ;;  %v5021_v19 = vsel %vm118_vm0, %v5019_v16, 0.0  ;;  %v7763_v63 = vld [vmem:[#allocation10 + $0xb0] ss:$28 sps:$4 sm:$0xff]  }
0x158f   :  { %5022 = vadd.xlane.f32.xlu0 %v5021_v19  ;;  %7544 = vmatpush3.bf16.msra.mxu0 %v7763_v63  ;;  %v5192_v5 = vpop.f32.mrf.mxu1 }
0x1590   :  { %v5016_v34 = vsel %vm118_vm0, %v8868_v18, 0.0  ;;  %v5020_v20 = vmul.f32 %v8868_v18, %v8868_v18  ;;  %7545 = vmatprep.subr.bf16.mxu0 %v8119_v9  ;;  %v8889_v6 = vadd.f32 %v7017_v4, %v5192_v5 }
0x1591   :  { %v7557_v7 = vpop.f32.mrf.mxu1 }
0x1592   :  { %v5024_v21 = vsel %vm118_vm0, %v5020_v20, 0.0 }
0x1593   :  { %5017 = vadd.xlane.f32.xlu0 %v5016_v34  ;;  %7546 = vmatpush3.bf16.msra.mxu0 %v7764_v53  ;;  %v5195_v8 = vpop.f32.mrf.mxu1 }
0x1594   :  { %7559 = vmatprep.subr.mxu0 %v8119_v9  ;;  %v8896_v10 = vadd.f32 %v7017_v4, %v5195_v8 }
0x1595   :  { %v7558_v35 = vpop.f32.mrf.mxu1 }
0x1597   :  { %5025 = vadd.xlane.f32.xlu0 %v5024_v21 }
0x159e   :  { %5215 = vrot.lane.b32.xlu1 %v8889_v6, %s8122_s5 }
0x15a2   :  { %5219 = vrot.lane.b32.xlu1 %v8889_v6, %s8121_s4 }
0x15ad   :  { %5217 = vrot.lane.b32.xlu0 %v8896_v10, %s8122_s5 }
0x15b1   :  { %5221 = vrot.lane.b32.xlu0 %v8896_v10, %s8121_s4 }
0x15b5   :  { %5225 = vrot.lane.b32.xlu0 %v8896_v10, %s8123_s29 }
0x1616   :  { %v5015_v23 = vpop.xlane.xlu1 %5014 }
0x1617   :  { %v5027_v25 = vmul.f32 0.03125, %v5015_v23 }
0x1618   :  { %v5023_v26 = vpop.xlane.xlu0 %5022 }
0x1619   :  { %v5029_v27 = vmul.f32 %v5027_v25, %v5015_v23  ;;  %v5037_v49 = vsub.f32 %v8861_v12, %v5027_v25 }
0x161a   :  { %v8906_v36 = vpop.permute.xlu1 %5215 }
0x161b   :  { %v5031_v28 = vsub.f32 %v5023_v26, %v5029_v27  ;;  %v5043_v55 = vmul.f32 %v7011_v51, %v5037_v49  ;;  %7570 = vmatpush3.xpose.msk.msra.mxu1 %vm259_vm6, %v8906_v36 }
0x161c   :  { %v5018_v29 = vpop.xlane.xlu0 %5017  ;;  %7579 = vmatprep.subr.mxu1 %v8119_v9 }
0x161d   :  { %v5033_v31 = vmax.f32 %v5031_v28, 0.0  ;;  %v5028_v32 = vmul.f32 0.03125, %v5018_v29 }
0x161e   :  { %v8933_v20 = vpop.permute.xlu1 %5219 }
0x161f   :  { %v5035_v48 = vmul.f32 0.032258064, %v5033_v31  ;;  %v5030_v59 = vmul.f32 %v5028_v32, %v5018_v29  ;;  %v5038_v52 = vsub.f32 %v8868_v18, %v5028_v32  ;;  %v7957_v29 = vld [vmem:[#allocation7] sm:$0xff] }
0x1620   :  { %v5026_v33 = vpop.xlane.xlu0 %5025 }
0x1621   :  { %7899 = vrsqrt.f32 %v5035_v48  ;;  %v5032_v41 = vsub.f32 %v5026_v33, %v5030_v59  ;;  %vm5047_vm11 = vcmp.eq.f32.partialorder %v5035_v48, inf  ;;  %v5050_v40 = vand.u32 2147483648, %v5035_v48  ;;  %v7958_v33 = vld [vmem:[#allocation7 + $0x8] sm:$0xff] }
0x1622   :  { %vm5049_vm12 = vcmp.eq.f32.partialorder %v5035_v48, 0.0  ;;  %v5044_v56 = vmul.f32 %v7011_v51, %v5038_v52 }
0x1623   :  { %v5034_v37 = vmax.f32 %v5032_v41, 0.0 }
0x1624   :  { %v8921_v34 = vpop.permute.xlu0 %5217 }
0x1625   :  { %v5036_v38 = vmul.f32 0.032258064, %v5034_v37 }
0x1627   :  { %7901 = vrsqrt.f32 %v5036_v38  ;;  %vm5054_vm14 = vcmp.eq.f32.partialorder %v5036_v38, inf  ;;  %v5057_v45 = vand.u32 2147483648, %v5036_v38  ;;  %vm5056_vm15 = vcmp.eq.f32.partialorder %v5036_v38, 0.0 }
0x1628   :  { %v8935_v21 = vpop.permute.xlu0 %5221 }
0x162c   :  { %v8944_v63 = vpop.permute.xlu0 %5225 }
0x162e   :  { %v7900_v39 = vpop.eup %7899 }
0x162f   :  { %v5046_v24 = vmul.f32 %v7900_v39, %v5035_v48 }
0x1631   :  { %v5048_v42 = vsel %vm5047_vm11, %v5035_v48, %v5046_v24 }
0x1632   :  { %v5051_v0 = vsel %vm5049_vm12, %v5050_v40, %v5048_v42 }
0x1633   :  { %v5059_v30 = vadd.f32 1e-06, %v5051_v0 }
0x1634   :  { %v7902_v43 = vpop.eup %7901 }
0x1635   :  { %v5053_v44 = vmul.f32 %v7902_v43, %v5036_v38  ;;  %7903 = vrcp.f32 %v5059_v30 }
0x1637   :  { %v5055_v46 = vsel %vm5054_vm14, %v5036_v38, %v5053_v44 }
0x1638   :  { %v5058_v1 = vsel %vm5056_vm15, %v5057_v45, %v5055_v46 }
0x1639   :  { %v5060_v47 = vadd.f32 1e-06, %v5058_v1 }
0x163b   :  { %7905 = vrcp.f32 %v5060_v47 }
0x1642   :  { %v7904_v54 = vpop.eup %7903 }
0x1643   :  { %v5062_v57 = vmul.f32 %v7904_v54, %v5043_v55 }
0x1645   :  { %v5069_v62 = vadd.f32 %v7012_v60, %v5062_v57 }
0x1648   :  { %v7906_v58 = vpop.eup %7905 }
0x1649   :  { %v5064_v61 = vmul.f32 %v7906_v58, %v5044_v56 }
0x164b   :  { %v5070_v2 = vadd.f32 %v7012_v60, %v5064_v61 }
0x164d   :  { %v5071_v3 = vpack.c.bf16 %v5070_v2, %v5069_v62 }
0x164f   :  { %7548 = vmatmul.mubr.msk.bf16.vlgmr.msra.gmra.mxu0 %vm118_vm0, %v5071_v3 }
0x1650   :  { %7561 = vmatprep.mubr.msk.f32.mxu0 %vm8120_vm1, %v8119_v9  ;;  %7560 = vmatpush3.xpose.msk.msra.mxu0 %vm259_vm6, %v8889_v6 }
0x1651   :  { %7564 = vmatprep.subr.mxu0 %v8119_v9 }
0x170f   :  { %v5130_v13 = vpop.f32.mrf.mxu0 }
0x1710   :  { %v5131_v14 = vadd.f32 %v7013_v11, %v5130_v13 }
0x1711   :  { %v7549_v15 = vpop.f32.mrf.mxu0 }
0x1712   :  { %5201 = vrot.lane.b32.xlu1 %v5131_v14, %s8122_s5  ;;  %7562 = vmatmul.mubr.msk.f32.vlgmr.msra.gmra.mxu0 %vm259_vm6, %v5131_v14 }
0x1713   :  { %7565 = vmatpush3.xpose.msk.msra.mxu0 %vm259_vm6, %v8896_v10  ;;  %v5133_v16 = vpop.f32.mrf.mxu0  ;;  %7566 = vmatprep.mubr.msk.f32.mxu0 %vm8120_vm1, %v8119_v9 }
0x1714   :  { %v5134_v17 = vadd.f32 %v7013_v11, %v5133_v16  ;;  %7574 = vmatprep.subr.mxu0 %v8119_v9 }
0x1715   :  { %v7550_v19 = vpop.f32.mrf.mxu0 }
0x1716   :  { %5205 = vrot.lane.b32.xlu1 %v5131_v14, %s8121_s4  ;;  %5207 = vrot.lane.b32.xlu0 %v5134_v17, %s8121_s4 }
0x1717   :  { %7567 = vmatmul.mubr.msk.f32.vlgmr.msra.gmra.mxu0 %vm259_vm6, %v5134_v17 }
0x1718   :  { %7575 = vmatpush3.xpose.msk.msra.mxu0 %vm259_vm6, %v8921_v34  ;;  %7576 = vmatprep.mubr.msk.f32.mxu0 %vm8120_vm1, %v8119_v9 }
0x1719   :  { %7584 = vmatprep.subr.mxu0 %v8119_v9 }
0x171a   :  { %5211 = vrot.lane.b32.xlu0 %v5134_v17, %s8123_s29  ;;  %5203 = vrot.lane.b32.xlu1 %v5134_v17, %s8122_s5 }
0x171e   :  { %5223 = vrot.lane.b32.xlu1 %v8889_v6, %s8123_s29 }
0x1722   :  { %5209 = vrot.lane.b32.xlu1 %v5131_v14, %s8123_s29 }
0x1784   :  { %v5202_v22 = vpop.permute.xlu1 %5201 }
0x1785   :  { %7572 = vmatmul.mubr.msk.f32.vlgmr.msra.gmra.mxu1 %vm259_vm6, %v5202_v22 }
0x1786   :  { %7580 = vmatpush3.xpose.msk.msra.mxu1 %vm259_vm6, %v8933_v20  ;;  %7581 = vmatprep.mubr.msk.f32.mxu1 %vm8120_vm1, %v8119_v9 }
0x1787   :  { %7589 = vmatprep.subr.mxu1 %v8119_v9 }
0x1788   :  { %v5206_v50 = vpop.permute.xlu1 %5205  ;;  %v5208_v23 = vpop.permute.xlu0 %5207 }
0x1789   :  { %7582 = vmatmul.mubr.msk.f32.vlgmr.msra.gmra.mxu1 %vm259_vm6, %v5206_v50 }
0x178a   :  { %7591 = vmatprep.mubr.msk.f32.mxu1 %vm8120_vm1, %v8119_v9 }
0x178c   :  { %v5204_v53 = vpop.permute.xlu1 %5203  ;;  %v5212_v26 = vpop.permute.xlu0 %5211 }
0x178d   :  { %7577 = vmatmul.mubr.msk.f32.vlgmr.msra.gmra.mxu0 %vm259_vm6, %v5204_v53 }
0x178e   :  { %7585 = vmatpush3.xpose.msk.msra.mxu0 %vm259_vm6, %v8935_v21  ;;  %7586 = vmatprep.mubr.msk.f32.mxu0 %vm8120_vm1, %v8119_v9 }
0x178f   :  { %7594 = vmatprep.subr.mxu0 %v8119_v9 }
0x1790   :  { %v8954_v25 = vpop.permute.xlu1 %5223 }
0x1791   :  { %7587 = vmatmul.mubr.msk.f32.vlgmr.msra.gmra.mxu0 %vm259_vm6, %v5208_v23  ;;  %7590 = vmatpush3.xpose.msk.msra.mxu1 %vm259_vm6, %v8954_v25 }
0x1792   :  { %7595 = vmatpush3.xpose.msk.msra.mxu0 %vm259_vm6, %v8944_v63  ;;  %7596 = vmatprep.mubr.msk.f32.mxu0 %vm8120_vm1, %v8119_v9 }
0x1793   :  { %7599 = vmatprep.subr.mxu1 %v8119_v9  ;;  %7604 = vmatprep.subr.mxu0 %v8119_v9 }
0x1794   :  { %v5210_v27 = vpop.permute.xlu1 %5209 }
0x1795   :  { %7592 = vmatmul.mubr.msk.f32.vlgmr.msra.gmra.mxu1 %vm259_vm6, %v5210_v27  ;;  %7597 = vmatmul.mubr.msk.f32.vlgmr.msra.gmra.mxu0 %vm259_vm6, %v5212_v26 }
0x1796   :  { %7606 = vmatprep.mubr.msk.f32.mxu0 %vm8120_vm1, %v8119_v9  ;;  %7601 = vmatprep.mubr.msk.f32.mxu1 %vm8120_vm1, %v8119_v9 }
0x17d2   :  { %v5297_v28 = vpop.f32.mrf.mxu0 }
0x17d3   :  { %v5298_v31 = vadd.f32 %v7957_v29, %v5297_v28 }
0x17d4   :  { %v7563_v32 = vpop.f32.mrf.mxu0 }
0x17d5   :  { %v5819_v48 = vsel %vm259_vm6, %v5298_v31, -inf }
0x17d6   :  { %5820 = vmax.xlane.f32.xlu1 %v5819_v48 }
0x17d7   :  { %v5371_v59 = vpop.f32.mrf.mxu0 }
0x17d8   :  { %v5372_v41 = vadd.f32 %v7958_v33, %v5371_v59 }
0x17d9   :  { %v7568_v37 = vpop.f32.mrf.mxu0 }
0x17da   :  { %v5822_v38 = vsel %vm259_vm6, %v5372_v41, -inf }
0x17db   :  { %5823 = vmax.xlane.f32.xlu0 %v5822_v38 }
0x1845   :  { %v5445_v39 = vpop.f32.mrf.mxu1 }
0x1846   :  { %v5446_v24 = vadd.f32 %v7957_v29, %v5445_v39 }
0x1847   :  { %v7573_v40 = vpop.f32.mrf.mxu1 }
0x1848   :  { %v5825_v42 = vsel %vm259_vm6, %v5446_v24, -inf }
0x1849   :  { %v5593_v0 = vpop.f32.mrf.mxu1  ;;  %5826 = vmax.xlane.f32.xlu0 %v5825_v42 }
0x184a   :  { %v5594_v30 = vadd.f32 %v7957_v29, %v5593_v0 }
0x184b   :  { %v7583_v43 = vpop.f32.mrf.mxu1 }
0x184c   :  { %v5831_v44 = vsel %vm259_vm6, %v5594_v30, -inf }
0x184d   :  { %5832 = vmax.xlane.f32.xlu1 %v5831_v44  ;;  %v5519_v45 = vpop.f32.mrf.mxu0 }
0x184e   :  { %v5520_v46 = vadd.f32 %v7958_v33, %v5519_v45 }
0x184f   :  { %v7578_v1 = vpop.f32.mrf.mxu0 }
0x1850   :  { %v5828_v47 = vsel %vm259_vm6, %v5520_v46, -inf }
0x1851   :  { %5829 = vmax.xlane.f32.xlu0 %v5828_v47  ;;  %v5667_v49 = vpop.f32.mrf.mxu0 }
0x1852   :  { %v5668_v51 = vadd.f32 %v7958_v33, %v5667_v49 }
0x1853   :  { %v7588_v52 = vpop.f32.mrf.mxu0 }
0x1854   :  { %v5834_v54 = vsel %vm259_vm6, %v5668_v51, -inf }
0x1855   :  { %v5741_v55 = vpop.f32.mrf.mxu1  ;;  %5835 = vmax.xlane.f32.xlu0 %v5834_v54  ;;  %v5815_v56 = vpop.f32.mrf.mxu0 }
0x1856   :  { %v5742_v57 = vadd.f32 %v7957_v29, %v5741_v55  ;;  %v5816_v58 = vadd.f32 %v7958_v33, %v5815_v56 }
0x1857   :  { %v7593_v60 = vpop.f32.mrf.mxu1  ;;  %v7598_v61 = vpop.f32.mrf.mxu0 }
0x1858   :  { %v5837_v62 = vsel %vm259_vm6, %v5742_v57, -inf  ;;  %v5840_v2 = vsel %vm259_vm6, %v5816_v58, -inf }
0x1859   :  { %5838 = vmax.xlane.f32.xlu1 %v5837_v62  ;;  %5841 = vmax.xlane.f32.xlu0 %v5840_v2 }
0x185f   :  { %v5821_v7 = vpop.xlane.xlu1 %5820 }
0x1864   :  { %v5824_v3 = vpop.xlane.xlu0 %5823 }
0x1865   :  { %v5844_v4 = vsub.f32 %v5372_v41, %v5824_v3 }
0x1867   :  { %v5853_v5 = vmul.f32 1.442695, %v5844_v4 }
0x1869   :  { %7907 = vpow2.f32 %v5853_v5 }
0x186a   :  { %5907 = vrot.lane.b32.xlu1 %v8889_v6, %s8124_s30  ;;  %v5843_v6 = vsub.f32 %v5298_v31, %v5821_v7 }
0x186c   :  { %v5851_v8 = vmul.f32 1.442695, %v5843_v6 }
0x186e   :  { %6059 = vrot.lane.b32.xlu1 %v8906_v36, %s8124_s30  ;;  %7909 = vpow2.f32 %v5851_v8 }
0x186f   :  { %5983 = vrot.lane.b32.xlu0 %v8896_v10, %s8124_s30 }
0x1872   :  { %6135 = vrot.lane.b32.xlu1 %v8921_v34, %s8124_s30 }
0x1873   :  { %6287 = vrot.lane.b32.xlu0 %v8935_v21, %s8124_s30 }
0x1876   :  { %6211 = vrot.lane.b32.xlu1 %v8933_v20, %s8124_s30  ;;  %v8991_v35 = vpop.eup %7907 }
0x1877   :  { %v5870_v10 = vsel %vm259_vm6, %v8991_v35, 0.0 }
0x187b   :  { %v8995_v36 = vpop.eup %7909 }
0x187c   :  { %v5867_v11 = vsel %vm259_vm6, %v8995_v36, 0.0 }
0x1892   :  { %5871 = vadd.xlane.f32.xlu0 %v5870_v10 }
0x189a   :  { %5868 = vadd.xlane.f32.xlu1 %v5867_v11 }
0x18d2   :  { %v5827_v13 = vpop.xlane.xlu0 %5826 }
0x18d3   :  { %v5845_v14 = vsub.f32 %v5446_v24, %v5827_v13 }
0x18d5   :  { %v5855_v15 = vmul.f32 1.442695, %v5845_v14 }
0x18d6   :  { %v5833_v16 = vpop.xlane.xlu1 %5832 }
0x18d7   :  { %7911 = vpow2.f32 %v5855_v15  ;;  %v5847_v17 = vsub.f32 %v5594_v30, %v5833_v16 }
0x18d9   :  { %v5859_v19 = vmul.f32 1.442695, %v5847_v17 }
0x18da   :  { %v5830_v34 = vpop.xlane.xlu0 %5829 }
0x18db   :  { %7913 = vpow2.f32 %v5859_v19  ;;  %v5846_v20 = vsub.f32 %v5520_v46, %v5830_v34 }
0x18dd   :  { %v5857_v21 = vmul.f32 1.442695, %v5846_v20  ;;  %v7765_v20 = vld [vmem:[#allocation10 + $0xb8] ss:$28 sps:$4 sm:$0xff]  }
0x18de   :  { %v5836_v22 = vpop.xlane.xlu0 %5835 }
0x18df   :  { %7915 = vpow2.f32 %v5857_v21  ;;  %v5848_v50 = vsub.f32 %v5668_v51, %v5836_v22 }
0x18e1   :  { %v5861_v53 = vmul.f32 1.442695, %v5848_v50  ;;  %v7766_v50 = vld [vmem:[#allocation10 + $0x80] ss:$28 sps:$4 sm:$0xff]  }
0x18e2   :  { %v5839_v23 = vpop.xlane.xlu1 %5838  ;;  %v5842_v26 = vpop.xlane.xlu0 %5841 }
0x18e3   :  { %7917 = vpow2.f32 %v5861_v53  ;;  %v5849_v27 = vsub.f32 %v5742_v57, %v5839_v23  ;;  %v5850_v28 = vsub.f32 %v5816_v58, %v5842_v26 }
0x18e4   :  { %v7912_v29 = vpop.eup %7911 }
0x18e5   :  { %v5863_v31 = vmul.f32 1.442695, %v5849_v27  ;;  %v5865_v32 = vmul.f32 1.442695, %v5850_v28  ;;  %v5873_v48 = vsel %vm259_vm6, %v7912_v29, 0.0 }
0x18e6   :  { %v5908_v59 = vpop.permute.xlu1 %5907  ;;  %5874 = vadd.xlane.f32.xlu1 %v5873_v48  ;;  %v5984_v33 = vpop.permute.xlu0 %5983 }
0x18e7   :  { %7919 = vpow2.f32 %v5863_v31  ;;  %7600 = vmatpush3.msra.mxu1 %v5908_v59  ;;  %7605 = vmatpush3.msra.mxu0 %v5984_v33 }
0x18e8   :  { %v7914_v41 = vpop.eup %7913  ;;  %7921 = vpow2.f32 %v5865_v32  ;;  %7614 = vmatprep.subr.mxu0 %v8119_v9  ;;  %7609 = vmatprep.subr.mxu1 %v8119_v9 }
0x18e9   :  { %v5879_v37 = vsel %vm259_vm6, %v7914_v41, 0.0 }
0x18ea   :  { %5880 = vadd.xlane.f32.xlu1 %v5879_v37  ;;  %v6060_v44 = vpop.permute.xlu1 %6059  ;;  %v6288_v45 = vpop.permute.xlu0 %6287 }
0x18ec   :  { %v7916_v38 = vpop.eup %7915 }
0x18ed   :  { %v5876_v39 = vsel %vm259_vm6, %v7916_v38, 0.0 }
0x18ee   :  { %5877 = vadd.xlane.f32.xlu0 %v5876_v39  ;;  %v6136_v46 = vpop.permute.xlu1 %6135 }
0x18f0   :  { %v9004_v24 = vpop.eup %7917 }
0x18f1   :  { %v5882_v40 = vsel %vm259_vm6, %v9004_v24, 0.0 }
0x18f2   :  { %5883 = vadd.xlane.f32.xlu0 %v5882_v40  ;;  %v6212_v47 = vpop.permute.xlu1 %6211 }
0x18f4   :  { %v9008_v42 = vpop.eup %7919 }
0x18f5   :  { %v9010_v0 = vpop.eup %7921  ;;  %v5885_v30 = vsel %vm259_vm6, %v9008_v42, 0.0 }
0x18f6   :  { %5886 = vadd.xlane.f32.xlu1 %v5885_v30  ;;  %v5888_v43 = vsel %vm259_vm6, %v9010_v0, 0.0 }
0x18f7   :  { %5889 = vadd.xlane.f32.xlu0 %v5888_v43 }
0x1907   :  { %6363 = vrot.lane.b32.xlu1 %v8954_v25, %s8124_s30 }
0x190d   :  { %6439 = vrot.lane.b32.xlu0 %v8944_v63, %s8124_s30 }
0x191b   :  { %v5872_v1 = vpop.xlane.xlu0 %5871 }
0x191c   :  { %7923 = vrcp.f32 %v5872_v1 }
0x1923   :  { %v5869_v49 = vpop.xlane.xlu1 %5868 }
0x1924   :  { %7925 = vrcp.f32 %v5869_v49 }
0x1929   :  { %v7924_v51 = vpop.eup %7923 }
0x192a   :  { %v5900_v52 = vmul.f32 %v7924_v51, %v8991_v35  ;;  %v7045_v51 = vld [vmem:[#allocation11 + $0x17] ss:$0 sm:$0xff] }
0x192c   :  { %7607 = vmatmul.mubr.msk.f32.vlgmr.msra.gmra.mxu0 %vm259_vm6, %v5900_v52 }
0x192d   :  { %7615 = vmatpush3.msra.mxu0 %v6136_v46  ;;  %7616 = vmatprep.mubr.msk.f32.mxu0 %vm8120_vm1, %v8119_v9 }
0x192e   :  { %7624 = vmatprep.subr.mxu0 %v8119_v9 }
0x1931   :  { %v7926_v63 = vpop.eup %7925 }
0x1932   :  { %v5899_v25 = vmul.f32 %v7926_v63, %v8995_v36 }
0x1934   :  { %7602 = vmatmul.mubr.msk.f32.vlgmr.msra.gmra.mxu1 %vm259_vm6, %v5899_v25 }
0x1935   :  { %7610 = vmatpush3.msra.mxu1 %v6060_v44  ;;  %7611 = vmatprep.mubr.msk.f32.mxu1 %vm8120_vm1, %v8119_v9 }
0x1936   :  { %7619 = vmatprep.subr.mxu1 %v8119_v9 }
0x196f   :  { %v5875_v54 = vpop.xlane.xlu1 %5874 }
0x1970   :  { %7927 = vrcp.f32 %v5875_v54 }
0x1973   :  { %v5881_v55 = vpop.xlane.xlu1 %5880 }
0x1974   :  { %7929 = vrcp.f32 %v5881_v55 }
0x1977   :  { %v5878_v56 = vpop.xlane.xlu0 %5877 }
0x1978   :  { %7931 = vrcp.f32 %v5878_v56 }
0x197b   :  { %v5884_v57 = vpop.xlane.xlu0 %5883 }
0x197c   :  { %7933 = vrcp.f32 %v5884_v57 }
0x197d   :  { %v7928_v58 = vpop.eup %7927 }
0x197e   :  { %v5901_v60 = vmul.f32 %v7928_v58, %v7912_v29 }
0x197f   :  { %v5887_v61 = vpop.xlane.xlu1 %5886 }
0x1980   :  { %7935 = vrcp.f32 %v5887_v61  ;;  %v5890_v62 = vpop.xlane.xlu0 %5889  ;;  %7612 = vmatmul.mubr.msk.f32.vlgmr.msra.gmra.mxu1 %vm259_vm6, %v5901_v60 }
0x1981   :  { %v7930_v2 = vpop.eup %7929  ;;  %7937 = vrcp.f32 %v5890_v62  ;;  %7620 = vmatpush3.msra.mxu1 %v6212_v47  ;;  %7621 = vmatprep.mubr.msk.f32.mxu1 %vm8120_vm1, %v8119_v9 }
0x1982   :  { %7629 = vmatprep.subr.mxu1 %v8119_v9  ;;  %v5903_v3 = vmul.f32 %v7930_v2, %v7914_v41 }
0x1983   :  { %v6364_v4 = vpop.permute.xlu1 %6363 }
0x1984   :  { %7622 = vmatmul.mubr.msk.f32.vlgmr.msra.gmra.mxu1 %vm259_vm6, %v5903_v3  ;;  %v6440_v35 = vpop.permute.xlu0 %6439 }
0x1985   :  { %v7932_v5 = vpop.eup %7931  ;;  %7630 = vmatpush3.msra.mxu1 %v6364_v4  ;;  %7631 = vmatprep.mubr.msk.f32.mxu1 %vm8120_vm1, %v8119_v9  ;;  %v7767_v4 = vld [vmem:[#allocation10 + $0xbc] ss:$28 sps:$4 sm:$0xff]  }
0x1986   :  { %v5902_v7 = vmul.f32 %v7932_v5, %v7916_v38  ;;  %7639 = vmatprep.subr.bf16.mxu1 %v8119_v9  ;;  %v7768_v5 = vld [vmem:[#allocation10 + $0x84] ss:$28 sps:$4 sm:$0xff]  }
0x1988   :  { %7617 = vmatmul.mubr.msk.f32.vlgmr.msra.gmra.mxu0 %vm259_vm6, %v5902_v7 }
0x1989   :  { %v7934_v6 = vpop.eup %7933  ;;  %7625 = vmatpush3.msra.mxu0 %v6288_v45  ;;  %7626 = vmatprep.mubr.msk.f32.mxu0 %vm8120_vm1, %v8119_v9 }
0x198a   :  { %7634 = vmatprep.subr.mxu0 %v8119_v9  ;;  %v5904_v8 = vmul.f32 %v7934_v6, %v9004_v24 }
0x198c   :  { %7627 = vmatmul.mubr.msk.f32.vlgmr.msra.gmra.mxu0 %vm259_vm6, %v5904_v8 }
0x198d   :  { %v7936_v10 = vpop.eup %7935  ;;  %7635 = vmatpush3.msra.mxu0 %v6440_v35  ;;  %7636 = vmatprep.mubr.msk.f32.mxu0 %vm8120_vm1, %v8119_v9 }
0x198e   :  { %v7938_v36 = vpop.eup %7937  ;;  %v5905_v11 = vmul.f32 %v7936_v10, %v9008_v42  ;;  %7647 = vmatprep.subr.bf16.mxu0 %v8119_v9 }
0x198f   :  { %v5906_v13 = vmul.f32 %v7938_v36, %v9010_v0 }
0x1990   :  { %7632 = vmatmul.mubr.msk.f32.vlgmr.msra.gmra.mxu1 %vm259_vm6, %v5905_v11 }
0x1991   :  { %7637 = vmatmul.mubr.msk.f32.vlgmr.msra.gmra.mxu0 %vm259_vm6, %v5906_v13  ;;  %7643 = vmatprep.mubr.msk.bf16.mxu1 %vm8120_vm1, %v8119_v9 }
0x1992   :  { %7651 = vmatprep.mubr.msk.bf16.mxu0 %vm8120_vm1, %v8119_v9  ;;  %7640 = vmatpush3.bf16.msra.mxu1 %v7765_v20 }
0x1993   :  { %7641 = vmatprep.subr.bf16.mxu1 %v8119_v9  ;;  %7648 = vmatpush3.bf16.msra.mxu0 %v7767_v4 }
0x1994   :  { %7649 = vmatprep.subr.bf16.mxu0 %v8119_v9 }
0x1996   :  { %7642 = vmatpush3.bf16.msra.mxu1 %v7766_v50 }
0x1997   :  { %7655 = vmatprep.subr.bf16.mxu1 %v8119_v9  ;;  %7650 = vmatpush3.bf16.msra.mxu0 %v7768_v5 }
0x19ec   :  { %v6055_v14 = vpop.f32.mrf.mxu0 }
0x19ee   :  { %v7608_v15 = vpop.f32.mrf.mxu0 }
0x19f4   :  { %v5979_v16 = vpop.f32.mrf.mxu1 }
0x19f6   :  { %v7603_v17 = vpop.f32.mrf.mxu1 }
0x1a40   :  { %v6131_v19 = vpop.f32.mrf.mxu1 }
0x1a42   :  { %v7613_v34 = vpop.f32.mrf.mxu1 }
0x1a44   :  { %v6283_v21 = vpop.f32.mrf.mxu1 }
0x1a46   :  { %v7623_v22 = vpop.f32.mrf.mxu1 }
0x1a48   :  { %v6207_v53 = vpop.f32.mrf.mxu0 }
0x1a49   :  { %v7728_v23 = vpack.i.bf16 %v6207_v53, %v6131_v19 }
0x1a4a   :  { %v7618_v26 = vpop.f32.mrf.mxu0 }
0x1a4b   :  { %7729 = vrot.lane.b32.xlu1 %v7728_v23, %s8112_s27 }
0x1a4c   :  { %v6359_v27 = vpop.f32.mrf.mxu0 }
0x1a4d   :  { %v7733_v28 = vpack.i.bf16 %v6359_v27, %v6283_v21 }
0x1a4e   :  { %v7628_v29 = vpop.f32.mrf.mxu0 }
0x1a4f   :  { %7734 = vrot.lane.b32.xlu0 %v7733_v28, %s8126_s8 }
0x1a50   :  { %v6435_v31 = vpop.f32.mrf.mxu1 }
0x1a51   :  { %v6511_v32 = vpop.f32.mrf.mxu0 }
0x1a52   :  { %v7738_v48 = vpack.i.bf16 %v6511_v32, %v6435_v31  ;;  %v7633_v59 = vpop.f32.mrf.mxu1 }
0x1a53   :  { %v7638_v33 = vpop.f32.mrf.mxu0  ;;  %v7049_v59 = vld [vmem:[#allocation11 + $0xf] ss:$0 sm:$0xff] }
0x1a54   :  { %7739 = vrot.lane.b32.xlu1 %v7738_v48, %s8127_s9 }
0x1abd   :  { %v7730_v41 = vpop.permute.xlu1 %7729 }
0x1abe   :  { %v7732_v38 = vunpack.i.h.bf16 %v7730_v41  ;;  %v7731_v39 = vunpack.i.l.bf16 %v7730_v41 }
0x1ac0   :  { %v6540_v0 = vsel %vm259_vm6, %v6055_v14, %v7732_v38  ;;  %v6539_v30 = vsel %vm259_vm6, %v5979_v16, %v7731_v39 }
0x1ac1   :  { %v7735_v37 = vpop.permute.xlu0 %7734 }
0x1ac2   :  { %v7737_v24 = vunpack.i.h.bf16 %v7735_v37  ;;  %v7736_v40 = vunpack.i.l.bf16 %v7735_v37 }
0x1ac4   :  { %v6542_v45 = vsel %vm1588_vm7, %v6540_v0, %v7737_v24  ;;  %v6541_v46 = vsel %vm1588_vm7, %v6539_v30, %v7736_v40  ;;  %v7050_v40 = vld [vmem:[#allocation11 + $0x12] ss:$0 sm:$0xff] }
0x1ac6   :  { %v7740_v42 = vpop.permute.xlu1 %7739 }
0x1ac7   :  { %v7742_v43 = vunpack.i.h.bf16 %v7740_v42  ;;  %v7741_v44 = vunpack.i.l.bf16 %v7740_v42 }
0x1ac9   :  { %v6544_v1 = vsel %vm1591_vm8, %v6542_v45, %v7742_v43  ;;  %v6543_v47 = vsel %vm1591_vm8, %v6541_v46, %v7741_v44  ;;  %v7770_v44 = vld [vmem:[#allocation10 + $0x88] ss:$28 sps:$4 sm:$0xff]   ;;  %v7051_v46 = vld [vmem:[#allocation11 + $0x18] ss:$0 sm:$0xff] }
0x1aca   :  { %v6545_v49 = vpack.c.bf16 %v6544_v1, %v6543_v47  ;;  %v6765_v45 = vsel %vm3415_vm13, %v7770_v44, 0 }
0x1acc   :  { %7644 = vmatmul.mubr.msk.bf16.vlgmr.msra.gmra.mxu1 %vm118_vm0, %v6545_v49 }
0x1acd   :  { %7659 = vmatprep.mubr.msk.bf16.mxu1 %vm8120_vm1, %v8119_v9 }
0x1b8c   :  { %v6604_v52 = vpop.f32.mrf.mxu1 }
0x1b8d   :  { %v6605_v63 = vadd.f32 %v7045_v51, %v6604_v52 }
0x1b8e   :  { %v7645_v25 = vpop.f32.mrf.mxu1 }
0x1b8f   :  { %v9070_v54 = vadd.f32 %v6605_v63, %v8861_v12 }
0x1b90   :  { %v6607_v55 = vpop.f32.mrf.mxu1 }
0x1b91   :  { %v6608_v56 = vadd.f32 %v7045_v51, %v6607_v55  ;;  %v6615_v57 = vsel %vm118_vm0, %v9070_v54, 0.0  ;;  %v6621_v58 = vmul.f32 %v9070_v54, %v9070_v54 }
0x1b92   :  { %6616 = vadd.xlane.f32.xlu0 %v6615_v57  ;;  %v7646_v60 = vpop.f32.mrf.mxu1  ;;  %v7055_v57 = vld [vmem:[#allocation11 + $0x19] ss:$0 sm:$0xff] }
0x1b93   :  { %v9077_v61 = vadd.f32 %v6608_v56, %v8868_v18  ;;  %v6623_v62 = vsel %vm118_vm0, %v6621_v58, 0.0  ;;  %v7769_v18 = vld [vmem:[#allocation10 + $0xc0] ss:$28 sps:$4 sm:$0xff]  }
0x1b94   :  { %v6768_v7 = vsel %vm3415_vm13, %v7769_v18, 0 }
0x1b95   :  { %v6618_v2 = vsel %vm118_vm0, %v9077_v61, 0.0  ;;  %v6622_v12 = vmul.f32 %v9077_v61, %v9077_v61  ;;  %7656 = vmatpush3.bf16.xpose.msra.mxu1 %v6768_v7 }
0x1b96   :  { %6624 = vadd.xlane.f32.xlu0 %v6623_v62  ;;  %6619 = vadd.xlane.f32.xlu1 %v6618_v2 }
0x1b97   :  { %v6626_v3 = vsel %vm118_vm0, %v6622_v12, 0.0  ;;  %7657 = vmatprep.subr.bf16.mxu1 %v8119_v9 }
0x1b9a   :  { %6627 = vadd.xlane.f32.xlu0 %v6626_v3 }
0x1b9d   :  { %7658 = vmatpush3.bf16.xpose.msra.mxu1 %v6765_v45 }
0x1c1b   :  { %v6617_v6 = vpop.xlane.xlu0 %6616 }
0x1c1c   :  { %v6629_v8 = vmul.f32 0.03125, %v6617_v6 }
0x1c1e   :  { %v6631_v35 = vmul.f32 %v6629_v8, %v6617_v6  ;;  %v6639_v48 = vsub.f32 %v9070_v54, %v6629_v8 }
0x1c1f   :  { %v6625_v10 = vpop.xlane.xlu0 %6624  ;;  %v6620_v36 = vpop.xlane.xlu1 %6619 }
0x1c20   :  { %v6633_v11 = vsub.f32 %v6625_v10, %v6631_v35  ;;  %v6630_v13 = vmul.f32 0.03125, %v6620_v36  ;;  %v6645_v37 = vmul.f32 %v7049_v59, %v6639_v48 }
0x1c22   :  { %v6635_v14 = vmax.f32 %v6633_v11, 0.0  ;;  %v6632_v15 = vmul.f32 %v6630_v13, %v6620_v36  ;;  %v6640_v33 = vsub.f32 %v9077_v61, %v6630_v13 }
0x1c23   :  { %v6628_v16 = vpop.xlane.xlu0 %6627 }
0x1c24   :  { %v6637_v17 = vmul.f32 0.032258064, %v6635_v14  ;;  %v6634_v19 = vsub.f32 %v6628_v16, %v6632_v15  ;;  %v6646_v38 = vmul.f32 %v7049_v59, %v6640_v33 }
0x1c26   :  { %7939 = vrsqrt.f32 %v6637_v17  ;;  %v6636_v34 = vmax.f32 %v6634_v19, 0.0  ;;  %vm6649_vm1 = vcmp.eq.f32.partialorder %v6637_v17, inf  ;;  %v6652_v9 = vand.u32 2147483648, %v6637_v17 }
0x1c27   :  { %vm6651_vm6 = vcmp.eq.f32.partialorder %v6637_v17, 0.0 }
0x1c28   :  { %v6638_v20 = vmul.f32 0.032258064, %v6636_v34 }
0x1c2a   :  { %7941 = vrsqrt.f32 %v6638_v20  ;;  %vm6656_vm7 = vcmp.eq.f32.partialorder %v6638_v20, inf  ;;  %v6659_v28 = vand.u32 2147483648, %v6638_v20  ;;  %vm6658_vm8 = vcmp.eq.f32.partialorder %v6638_v20, 0.0 }
0x1c33   :  { %v7940_v21 = vpop.eup %7939 }
0x1c34   :  { %v6648_v22 = vmul.f32 %v7940_v21, %v6637_v17 }
0x1c36   :  { %v6650_v50 = vsel %vm6649_vm1, %v6637_v17, %v6648_v22 }
0x1c37   :  { %v6653_v53 = vsel %vm6651_vm6, %v6652_v9, %v6650_v50  ;;  %v7942_v23 = vpop.eup %7941 }
0x1c38   :  { %v6661_v26 = vadd.f32 1e-06, %v6653_v53  ;;  %v6655_v27 = vmul.f32 %v7942_v23, %v6638_v20 }
0x1c3a   :  { %7943 = vrcp.f32 %v6661_v26  ;;  %v6657_v29 = vsel %vm6656_vm7, %v6638_v20, %v6655_v27 }
0x1c3b   :  { %v6660_v31 = vsel %vm6658_vm8, %v6659_v28, %v6657_v29 }
0x1c3c   :  { %v6662_v32 = vadd.f32 1e-06, %v6660_v31 }
0x1c3e   :  { %7945 = vrcp.f32 %v6662_v32 }
0x1c47   :  { %v7944_v41 = vpop.eup %7943 }
0x1c48   :  { %v6664_v39 = vmul.f32 %v7944_v41, %v6645_v37  ;;  %v7059_v41 = vld [vmem:[#allocation11 + $0x1a] ss:$0 sm:$0xff] }
0x1c4a   :  { %v6671_v0 = vadd.f32 %v7050_v40, %v6664_v39 }
0x1c4b   :  { %v7946_v24 = vpop.eup %7945 }
0x1c4c   :  { %v6666_v42 = vmul.f32 %v7946_v24, %v6646_v38  ;;  %v7060_v24 = vld [vmem:[#allocation11 + $0x1b] ss:$0 sm:$0xff] }
0x1c4e   :  { %v6672_v30 = vadd.f32 %v7050_v40, %v6666_v42 }
0x1c50   :  { %v6673_v43 = vpack.c.bf16 %v6672_v30, %v6671_v0 }
0x1c52   :  { %7652 = vmatmul.mubr.msk.bf16.vlgmr.msra.gmra.mxu0 %vm118_vm0, %v6673_v43 }
0x1d12   :  { %v6732_v1 = vpop.f32.mrf.mxu0 }
0x1d13   :  { %v6733_v49 = vadd.f32 %v7051_v46, %v6732_v1 }
0x1d14   :  { %v7653_v47 = vpop.f32.mrf.mxu0 }
0x1d15   :  { %v6739_v25 = vmax.f32 %v6733_v49, 0.0 }
0x1d16   :  { %v6735_v51 = vpop.f32.mrf.mxu0 }
0x1d17   :  { %v6736_v52 = vadd.f32 %v7051_v46, %v6735_v51 }
0x1d18   :  { %v7654_v63 = vpop.f32.mrf.mxu0 }
0x1d19   :  { %v6740_v55 = vmax.f32 %v6736_v52, 0.0 }
0x1d1b   :  { %v6741_v56 = vpack.c.bf16 %v6740_v55, %v6739_v25 }
0x1d1d   :  { %7660 = vmatmul.mubr.msk.bf16.vlgmr.msra.gmra.mxu1 %vm3415_vm13, %v6741_v56 }
0x1ddd   :  { %v6804_v58 = vpop.f32.mrf.mxu1 }
0x1dde   :  { %v6805_v60 = vadd.f32 %v7055_v57, %v6804_v58 }
0x1ddf   :  { %v7661_v62 = vpop.f32.mrf.mxu1 }
0x1de0   :  { %v6811_v2 = vadd.f32 %v6805_v60, %v9070_v54 }
0x1de1   :  { %v6807_v12 = vpop.f32.mrf.mxu1 }
0x1de2   :  { %v6808_v3 = vadd.f32 %v7055_v57, %v6807_v12  ;;  %v6815_v4 = vsel %vm118_vm0, %v6811_v2, 0.0  ;;  %v6821_v5 = vmul.f32 %v6811_v2, %v6811_v2 }
0x1de3   :  { %6816 = vadd.xlane.f32.xlu0 %v6815_v4  ;;  %v7662_v18 = vpop.f32.mrf.mxu1 }
0x1de4   :  { %v6812_v7 = vadd.f32 %v6808_v3, %v9077_v61  ;;  %v6823_v6 = vsel %vm118_vm0, %v6821_v5, 0.0 }
0x1de6   :  { %v6818_v8 = vsel %vm118_vm0, %v6812_v7, 0.0  ;;  %v6822_v35 = vmul.f32 %v6812_v7, %v6812_v7 }
0x1de7   :  { %6824 = vadd.xlane.f32.xlu0 %v6823_v6  ;;  %6819 = vadd.xlane.f32.xlu1 %v6818_v8 }
0x1de8   :  { %v6826_v10 = vsel %vm118_vm0, %v6822_v35, 0.0 }
0x1deb   :  { %6827 = vadd.xlane.f32.xlu1 %v6826_v10 }
0x1e6c   :  { %v6817_v54 = vpop.xlane.xlu0 %6816 }
0x1e6d   :  { %v6829_v36 = vmul.f32 0.03125, %v6817_v54 }
0x1e6f   :  { %v6831_v11 = vmul.f32 %v6829_v36, %v6817_v54  ;;  %v6839_v33 = vsub.f32 %v6811_v2, %v6829_v36 }
0x1e70   :  { %v6825_v13 = vpop.xlane.xlu0 %6824  ;;  %v6820_v14 = vpop.xlane.xlu1 %6819 }
0x1e71   :  { %v6833_v15 = vsub.f32 %v6825_v13, %v6831_v11  ;;  %v6830_v16 = vmul.f32 0.03125, %v6820_v14  ;;  %v6845_v37 = vmul.f32 %v7059_v41, %v6839_v33 }
0x1e73   :  { %v6835_v17 = vmax.f32 %v6833_v15, 0.0  ;;  %v6832_v19 = vmul.f32 %v6830_v16, %v6820_v14  ;;  %v6840_v39 = vsub.f32 %v6812_v7, %v6830_v16 }
0x1e74   :  { %v6828_v61 = vpop.xlane.xlu1 %6827 }
0x1e75   :  { %v6837_v34 = vmul.f32 0.032258064, %v6835_v17  ;;  %v6834_v20 = vsub.f32 %v6828_v61, %v6832_v19  ;;  %v6846_v0 = vmul.f32 %v7059_v41, %v6840_v39 }
0x1e77   :  { %7947 = vrsqrt.f32 %v6837_v34  ;;  %v6836_v21 = vmax.f32 %v6834_v20, 0.0  ;;  %vm6849_vm13 = vcmp.eq.f32.partialorder %v6837_v34, inf  ;;  %v6852_v53 = vand.u32 2147483648, %v6837_v34 }
0x1e78   :  { %vm6851_vm2 = vcmp.eq.f32.partialorder %v6837_v34, 0.0 }
0x1e79   :  { %v6838_v22 = vmul.f32 0.032258064, %v6836_v21 }
0x1e7b   :  { %7949 = vrsqrt.f32 %v6838_v22  ;;  %vm6856_vm3 = vcmp.eq.f32.partialorder %v6838_v22, inf  ;;  %v6859_v31 = vand.u32 2147483648, %v6838_v22  ;;  %vm6858_vm4 = vcmp.eq.f32.partialorder %v6838_v22, 0.0 }
0x1e84   :  { %v7948_v9 = vpop.eup %7947 }
0x1e85   :  { %v6848_v50 = vmul.f32 %v7948_v9, %v6837_v34 }
0x1e87   :  { %v6850_v23 = vsel %vm6849_vm13, %v6837_v34, %v6848_v50 }
0x1e88   :  { %v6853_v26 = vsel %vm6851_vm2, %v6852_v53, %v6850_v23  ;;  %v7950_v27 = vpop.eup %7949 }
0x1e89   :  { %v6861_v28 = vadd.f32 1e-06, %v6853_v26  ;;  %v6855_v29 = vmul.f32 %v7950_v27, %v6838_v22 }
0x1e8b   :  { %7951 = vrcp.f32 %v6861_v28  ;;  %v6857_v32 = vsel %vm6856_vm3, %v6838_v22, %v6855_v29 }
0x1e8c   :  { %v6860_v48 = vsel %vm6858_vm4, %v6859_v31, %v6857_v32 }
0x1e8d   :  { %v6862_v59 = vadd.f32 1e-06, %v6860_v48 }
0x1e8f   :  { %7953 = vrcp.f32 %v6862_v59 }
0x1e98   :  { %v7952_v38 = vpop.eup %7951 }
0x1e99   :  { %v6864_v40 = vmul.f32 %v7952_v38, %v6845_v37 }
0x1e9b   :  { %v6871_v42 = vadd.f32 %v7060_v24, %v6864_v40 }
0x1e9c   :  { %v7954_v30 = vpop.eup %7953 }
0x1e9d   :  { %6873 = vst.msk [vmem:[#allocation13] sm:$0xff] %vm118_vm0, %v6871_v42  ;;  %v6866_v43 = vmul.f32 %v7954_v30, %v6846_v0 }
0x1e9f   :  { %v6872_v44 = vadd.f32 %v7060_v24, %v6866_v43 }
0x1ea1   :  { %6874 = vst.msk [vmem:[#allocation13 + $0x8] sm:$0xff] %vm118_vm0, %v6872_v44 }
0x1ea2   :  { %8090 = shalt.err (!%p8087_p6)
}
0x1ea3   :  { %6886 = dma.vmem_to_hbm [thread:$0]  %s6881_s11, 256, %s9113_s6, [#allocation4], %s8111_s26, %s8111_s26, %s8112_s27  }
0x1ea4   :  { %8107 = dma.done.wait [#allocation4], 256  }
0x1ea5   :  { %8108 = vsyncadd [#allocation4], 4294967040 }
0x1ea6   :  { %6890 = vsyncpa [#allocation3], 1 }
0x1ea7   :  { %6891 = vsyncpa [#allocation6], 1 }
0x1ea8   :  { %6892 = vsyncpa [#allocation9], 1 }
0x1ea9   :  { %6893 = vsyncpa [#allocation12], 1 }
0x1eaa   :  { %6894 = vsyncpa [#allocation4], 1 }

</bundles_post_ra>
